<compile_context>
chip_gen: v5e
topology: v5e:2x2
jax: 0.10.0
libtpu: 0.0.40
codegen_flags: <defaults>
</compile_context>

<pallas_src>
import jax
import jax.numpy as jnp
import numpy as np
from jax import lax
from jax.experimental import pallas as pl
from jax.experimental.pallas import tpu as pltpu

NC_PAD = 128      # padded class dim (10 -> 128) for a lane-dense logits store
NB_TARGET = 32    # images per grid step at real batch sizes (fills MXU rows)


# ------------------------------ fused kernel --------------------------------

def _tiny_emoji_net_kernel(p1_ref, w1_ref, b1_ref, w2_ref, b2_ref,
                           w3_ref, b3_ref, w4_ref, b4_ref, wc_ref, bc_ref,
                           o_ref, a2p_ref, a3p_ref, a4p_ref):
    """Whole TinyEmojiNet forward for one block of `nb` images."""
    f32 = jnp.float32
    bf16 = jnp.bfloat16

    def conv_matmul(x_bf16, w_ref, b_ref):
        # One MXU matmul over all spatial positions; bias + ReLU in f32.
        y = jnp.dot(x_bf16, w_ref[...], preferred_element_type=f32)
        return jnp.maximum(y + b_ref[...], 0.0)

    def maxpool2x2(y, n, hh, ww, c):
        # y: (n*hh*ww, c) f32, rows ordered (n, h, w).  Channels stay on the
        # lane axis; horizontally / vertically adjacent pixels are paired on
        # sublane/outer axes -- no (R,c)->(R/2,2c) lane re-tiling.
        hp, wp = hh // 2, ww // 2
        z = y.reshape(n * hh, wp, 2, c)
        mw = jnp.maximum(z[:, :, 0, :], z[:, :, 1, :])        # (n*hh, wp, c)
        z2 = mw.reshape(n * hp, 2, wp, c)
        mh = jnp.maximum(z2[:, 0, :, :], z2[:, 1, :, :])      # (n*hp, wp, c)
        return mh.reshape(n, hp, wp, c)

    def store_padded(dst_ref, y4):
        # Write pooled activations into the interior of the zero-halo scratch.
        # Only the 1-px halo needs zeros: zero the 4 border slabs instead of
        # the whole buffer (interior is fully overwritten every grid step, so
        # this is also correct with per-core scratch on v7x).
        n, hp2, wp2, c = dst_ref.shape
        zrow = jnp.zeros((n, 1, wp2, c), dst_ref.dtype)
        zcol = jnp.zeros((n, hp2, 1, c), dst_ref.dtype)
        dst_ref[:, 0:1, :, :] = zrow
        dst_ref[:, hp2 - 1:hp2, :, :] = zrow
        dst_ref[:, :, 0:1, :] = zcol
        dst_ref[:, :, wp2 - 1:wp2, :] = zcol
        dst_ref[:, 1:hp2 - 1, 1:wp2 - 1, :] = y4

    def conv_taps(pad_ref, w_ref, b_ref):
        # 3x3 / pad=1 conv as ONE matmul: in-VMEM im2col from 9 shifted
        # slices of the zero-halo scratch (tap order matches the (kh,kw,cin)
        # flattening of the HWIO weights).
        n, hp2, wp2, cin = pad_ref.shape
        hh, ww = hp2 - 2, wp2 - 2
        taps = [pad_ref[:, dy:dy + hh, dx:dx + ww, :].reshape(n * hh * ww, cin)
                for dy in range(3) for dx in range(3)]
        xcat = jnp.concatenate(taps, axis=-1).astype(bf16)   # (n*hh*ww, 9*cin)
        return conv_matmul(xcat, w_ref, b_ref)

    nb = a2p_ref.shape[0]
    h2, w2 = a2p_ref.shape[1] - 2, a2p_ref.shape[2] - 2
    h1, w1 = 2 * h2, 2 * w2
    h3, w3 = a3p_ref.shape[1] - 2, a3p_ref.shape[2] - 2
    h4, w4 = a4p_ref.shape[1] - 2, a4p_ref.shape[2] - 2

    # layer 1: conv 3->32 (wrapper-built im2col slab) + ReLU + maxpool 2x2
    x1 = p1_ref[...].reshape(nb * h1 * w1, p1_ref.shape[2])  # bf16
    y1 = conv_matmul(x1, w1_ref, b1_ref)                     # (nb*H*W, 32) f32
    store_padded(a2p_ref, maxpool2x2(y1, nb, h1, w1, y1.shape[1]))

    # layer 2: conv 32->64 + ReLU + maxpool 2x2
    y2 = conv_taps(a2p_ref, w2_ref, b2_ref)
    store_padded(a3p_ref, maxpool2x2(y2, nb, h2, w2, y2.shape[1]))

    # layer 3: conv 64->128 + ReLU + maxpool 2x2
    y3 = conv_taps(a3p_ref, w3_ref, b3_ref)
    store_padded(a4p_ref, maxpool2x2(y3, nb, h3, w3, y3.shape[1]))

    # layer 4: conv 128->256 + ReLU, global average pool, linear classifier
    y4 = conv_taps(a4p_ref, w4_ref, b4_ref)                  # (nb*h4*w4, 256) f32
    cout = y4.shape[1]
    npos = h4 * w4
    pooled = jnp.sum(y4.reshape(nb, npos, cout), axis=1) * (1.0 / npos)  # (nb,256)
    logits = jnp.dot(pooled.astype(bf16), wc_ref[...],
                     preferred_element_type=f32) + bc_ref[...]
    o_ref[...] = logits.reshape(nb, 1, logits.shape[1])


# --------------------------- wrapper / glue code ----------------------------

def _im2col_3x3(x_nhwc):
    """3x3 / padding=1 patches: (N,H,W,C) -> (N,H,W,9C); tap order (dy,dx,c)."""
    N, H, W, C = x_nhwc.shape
    xp = jnp.pad(x_nhwc, ((0, 0), (1, 1), (1, 1), (0, 0)))
    taps = [xp[:, dy:dy + H, dx:dx + W, :] for dy in range(3) for dx in range(3)]
    return jnp.concatenate(taps, axis=-1)


@jax.jit
def tiny_emoji_net_pallas(x_nchw, params):
    N, C, H, W = x_nchw.shape
    num_classes = params["fc"][0].shape[1]

    # Grid / block-batch choice:
    #   * keep >= 2 "parallel" grid steps whenever possible (v7x has 2 TCs and
    #     the pipeline needs something to prefetch),
    #   * cap NB at NB_TARGET so deep-layer matmul M (4*NB .. 256*NB) fills
    #     MXU rows without blowing up per-step VMEM; grow G for larger N.
    if N >= 4 * NB_TARGET:
        NB = NB_TARGET
        G = -(-N // NB)
    elif N >= 2:
        G = 2
        NB = -(-N // G)
    else:
        G, NB = 1, max(N, 1)
    Npad = G * NB

    x = jnp.transpose(x_nchw, (0, 2, 3, 1))                  # NCHW -> NHWC
    if Npad > N:
        x = jnp.pad(x, ((0, Npad - N), (0, 0), (0, 0), (0, 0)))

    # Layer-1 im2col slab: (Npad, H*W, 27) -> (Npad, H*W, 32) bf16.
    # Pad K only to the next multiple of 8 (NOT 128): the MXU pads K
    # internally, and this keeps the only large HBM input ~4x smaller.
    k1 = 9 * C
    k1p = ((k1 + 7) // 8) * 8
    p1 = _im2col_3x3(x).reshape(Npad, H * W, k1)
    p1 = jnp.pad(p1, ((0, 0), (0, 0), (0, k1p - k1))).astype(jnp.bfloat16)

    # Weights -> (9*Cin, Cout) bf16 matrices; biases stay f32 rows (1, Cout).
    wmats, brows = [], []
    for wk, bk in params["conv"]:
        kh, kw, cin, cout = wk.shape
        wmats.append(wk.reshape(kh * kw * cin, cout).astype(jnp.bfloat16))
        brows.append(bk.reshape(1, cout).astype(jnp.float32))
    w1m = jnp.pad(wmats[0], ((0, k1p - wmats[0].shape[0]), (0, 0)))
    w2m, w3m, w4m = wmats[1], wmats[2], wmats[3]
    b1r, b2r, b3r, b4r = brows
    wc, bc = params["fc"]
    wcp = jnp.pad(wc.astype(jnp.bfloat16), ((0, 0), (0, NC_PAD - num_classes)))
    bcp = jnp.pad(bc.astype(jnp.float32), ((0, NC_PAD - num_classes),)).reshape(1, NC_PAD)

    hp, wp = H // 2, W // 2          # after pool 1
    hq, wq = hp // 2, wp // 2        # after pool 2
    hr, wr = hq // 2, wq // 2        # after pool 3

    const2 = lambda g: (0, 0)
    out = pl.pallas_call(
        _tiny_emoji_net_kernel,
        out_shape=jax.ShapeDtypeStruct((Npad, 1, NC_PAD), jnp.float32),
        grid=(G,),
        in_specs=[
            pl.BlockSpec((NB, H * W, k1p), lambda g: (g, 0, 0)),
            pl.BlockSpec(w1m.shape, const2), pl.BlockSpec(b1r.shape, const2),
            pl.BlockSpec(w2m.shape, const2), pl.BlockSpec(b2r.shape, const2),
            pl.BlockSpec(w3m.shape, const2), pl.BlockSpec(b3r.shape, const2),
            pl.BlockSpec(w4m.shape, const2), pl.BlockSpec(b4r.shape, const2),
            pl.BlockSpec(wcp.shape, const2), pl.BlockSpec(bcp.shape, const2),
        ],
        out_specs=pl.BlockSpec((NB, 1, NC_PAD), lambda g: (g, 0, 0)),
        scratch_shapes=[
            pltpu.VMEM((NB, hp + 2, wp + 2, 32), jnp.float32),   # zero-halo act, layer-2 in
            pltpu.VMEM((NB, hq + 2, wq + 2, 64), jnp.float32),   # zero-halo act, layer-3 in
            pltpu.VMEM((NB, hr + 2, wr + 2, 128), jnp.float32),  # zero-halo act, layer-4 in
        ],
        compiler_params=pltpu.CompilerParams(
            dimension_semantics=("parallel",),
            # Explicit per-step budget: double-buffered p1 block
            # (2 * NB * H*W * k1p * 2B) + ~1.7 MB (double-buffered) weights +
            # <2 MB f32 scratch + in-kernel temporaries; comfortably below
            # 48 MiB for NB <= 64, and 48 MiB fits v7x's 64 MiB physical VMEM.
            vmem_limit_bytes=48 * 1024 * 1024),
    )(p1, w1m, b1r, w2m, b2r, w3m, b3r, w4m, b4r, wcp, bcp)

    return out.reshape(Npad, NC_PAD)[:N, :num_classes]


# ------------------------------ parameters ----------------------------------

def init_params(key, num_classes=10):
    """Deterministic synthetic parameters matching TinyEmojiNet shapes."""
    chans = [(3, 32), (32, 64), (64, 128), (128, 256)]
    keys = jax.random.split(key, 2 * len(chans) + 2)
    params = {"conv": [], "fc": None}
    ki = 0
    for cin, cout in chans:
        fan_in = 9 * cin
        # HWIO layout (kh, kw, cin, cout) matches the im2col tap/channel order.
        w = jax.random.normal(keys[ki], (3, 3, cin, cout), jnp.float32) / np.sqrt(fan_in)
        ki += 1
        b = jax.random.normal(keys[ki], (cout,), jnp.float32) * 0.01
        ki += 1
        params["conv"].append((w, b))
    wc = jax.random.normal(keys[ki], (256, num_classes), jnp.float32) / np.sqrt(256.0)
    ki += 1
    bc = jax.random.normal(keys[ki], (num_classes,), jnp.float32) * 0.01
    params["fc"] = (wc, bc)
    return params


# ------------------------------ reference -----------------------------------

def tiny_emoji_net_ref(x_nchw, params):
    """Pure-JAX reference (matches PyTorch semantics) for validation."""
    y = x_nchw
    for li, (w_hwio, b) in enumerate(params["conv"]):
        w_oihw = jnp.transpose(w_hwio, (3, 2, 0, 1))
        y = lax.conv_general_dilated(y, w_oihw, (1, 1), ((1, 1), (1, 1)),
                                     dimension_numbers=("NCHW", "OIHW", "NCHW"))
        y = jnp.maximum(y + b[None, :, None, None], 0.0)
        if li < 3:
            y = lax.reduce_window(y, -jnp.inf, lax.max,
                                  (1, 1, 2, 2), (1, 1, 2, 2), "VALID")
    pooled = jnp.mean(y, axis=(2, 3))                        # AdaptiveAvgPool2d(1)
    wc, bc = params["fc"]
    return pooled @ wc + bc


if __name__ == "__main__":
    key = jax.random.PRNGKey(0)
    kx, kp = jax.random.split(key)
    x = jax.random.normal(kx, (2, 3, 16, 16), jnp.float32)   # NCHW like PyTorch
    params = init_params(kp, num_classes=10)

    logits = tiny_emoji_net_pallas(x, params)
    logits = jax.block_until_ready(logits)
    assert logits.shape == (2, 10)

    ref = tiny_emoji_net_ref(x, params)
    np.testing.assert_allclose(np.asarray(logits), np.asarray(ref),
                               rtol=5e-2, atol=5e-2)
    print("KERNEL_OK")
</pallas_src>

<mosaic_0001>
module attributes {stable_mosaic.version = 11 : i64} {
  func.func @_tiny_emoji_net_kernel(%arg0: i32, %arg1: memref<1x256x32xbf16, #tpu.memory_space<vmem>>, %arg2: memref<32x32xbf16, #tpu.memory_space<vmem>>, %arg3: memref<1x32xf32, #tpu.memory_space<vmem>>, %arg4: memref<288x64xbf16, #tpu.memory_space<vmem>>, %arg5: memref<1x64xf32, #tpu.memory_space<vmem>>, %arg6: memref<576x128xbf16, #tpu.memory_space<vmem>>, %arg7: memref<1x128xf32, #tpu.memory_space<vmem>>, %arg8: memref<1152x256xbf16, #tpu.memory_space<vmem>>, %arg9: memref<1x256xf32, #tpu.memory_space<vmem>>, %arg10: memref<256x128xbf16, #tpu.memory_space<vmem>>, %arg11: memref<1x128xf32, #tpu.memory_space<vmem>>, %arg12: memref<1x1x128xf32, #tpu.memory_space<vmem>>, %arg13: memref<1x10x10x32xf32, #tpu.memory_space<vmem>>, %arg14: memref<1x6x6x64xf32, #tpu.memory_space<vmem>>, %arg15: memref<1x4x4x128xf32, #tpu.memory_space<vmem>>) attributes {dimension_semantics = [#tpu.dimension_semantics<parallel>], iteration_bounds = array<i64: 2>, scalar_prefetch = 0 : i64, scratch_operands = 3 : i64, tpu.core_type = #tpu.core_type<tc>, window_params = [{transform_indices = @transform_0, window_bounds = array<i64: 1, 256, 32>}, {pipeline_mode = #tpu.pipeline_mode<synchronous>, transform_indices = @transform_1, window_bounds = array<i64: 32, 32>}, {pipeline_mode = #tpu.pipeline_mode<synchronous>, transform_indices = @transform_2, window_bounds = array<i64: 1, 32>}, {pipeline_mode = #tpu.pipeline_mode<synchronous>, transform_indices = @transform_3, window_bounds = array<i64: 288, 64>}, {pipeline_mode = #tpu.pipeline_mode<synchronous>, transform_indices = @transform_4, window_bounds = array<i64: 1, 64>}, {pipeline_mode = #tpu.pipeline_mode<synchronous>, transform_indices = @transform_5, window_bounds = array<i64: 576, 128>}, {pipeline_mode = #tpu.pipeline_mode<synchronous>, transform_indices = @transform_6, window_bounds = array<i64: 1, 128>}, {pipeline_mode = #tpu.pipeline_mode<synchronous>, transform_indices = @transform_7, window_bounds = array<i64: 1152, 256>}, {pipeline_mode = #tpu.pipeline_mode<synchronous>, transform_indices = @transform_8, window_bounds = array<i64: 1, 256>}, {pipeline_mode = #tpu.pipeline_mode<synchronous>, transform_indices = @transform_9, window_bounds = array<i64: 256, 128>}, {pipeline_mode = #tpu.pipeline_mode<synchronous>, transform_indices = @transform_10, window_bounds = array<i64: 1, 128>}, {transform_indices = @transform_11, window_bounds = array<i64: 1, 1, 128>}]} {
    %c0 = arith.constant 0 : index
    %c0_0 = arith.constant 0 : index
    %c0_1 = arith.constant 0 : index
    %0 = vector.load %arg1[%c0, %c0_0, %c0_1] : memref<1x256x32xbf16, #tpu.memory_space<vmem>>, vector<1x256x32xbf16>
    %1 = vector.shape_cast %0 : vector<1x256x32xbf16> to vector<256x32xbf16>
    %c0_2 = arith.constant 0 : index
    %c0_3 = arith.constant 0 : index
    %2 = vector.load %arg2[%c0_2, %c0_3] : memref<32x32xbf16, #tpu.memory_space<vmem>>, vector<32x32xbf16>
    %cst = arith.constant dense<0.000000e+00> : vector<256x32xf32>
    %3 = tpu.matmul %1, %2, %cst {dimension_numbers = #tpu.dot_dimension_numbers<[1], [0], [0], [1], [0, 0, 1, 1], [], []>} : vector<256x32xbf16>, vector<32x32xbf16>, vector<256x32xf32> -> vector<256x32xf32>
    %c0_4 = arith.constant 0 : index
    %c0_5 = arith.constant 0 : index
    %4 = vector.load %arg3[%c0_4, %c0_5] : memref<1x32xf32, #tpu.memory_space<vmem>>, vector<1x32xf32>
    %5 = vector.broadcast %4 : vector<1x32xf32> to vector<256x32xf32>
    %6 = arith.addf %3, %5 : vector<256x32xf32>
    %cst_6 = arith.constant 0.000000e+00 : f32
    %7 = vector.broadcast %cst_6 : f32 to vector<256x32xf32>
    %8 = arith.maximumf %6, %7 : vector<256x32xf32>
    %9 = vector.shape_cast %8 : vector<256x32xf32> to vector<16x8x2x32xf32>
    %10 = vector.extract_strided_slice %9 {offsets = [0, 0, 0, 0], sizes = [16, 8, 1, 32], strides = [1, 1, 1, 1]} : vector<16x8x2x32xf32> to vector<16x8x1x32xf32>
    %11 = vector.shape_cast %10 : vector<16x8x1x32xf32> to vector<16x8x32xf32>
    %12 = vector.extract_strided_slice %9 {offsets = [0, 0, 1, 0], sizes = [16, 8, 1, 32], strides = [1, 1, 1, 1]} : vector<16x8x2x32xf32> to vector<16x8x1x32xf32>
    %13 = vector.shape_cast %12 : vector<16x8x1x32xf32> to vector<16x8x32xf32>
    %14 = arith.maximumf %11, %13 : vector<16x8x32xf32>
    %15 = vector.shape_cast %14 : vector<16x8x32xf32> to vector<8x2x8x32xf32>
    %16 = vector.extract_strided_slice %15 {offsets = [0, 0, 0, 0], sizes = [8, 1, 8, 32], strides = [1, 1, 1, 1]} : vector<8x2x8x32xf32> to vector<8x1x8x32xf32>
    %17 = vector.shape_cast %16 : vector<8x1x8x32xf32> to vector<8x8x32xf32>
    %18 = vector.extract_strided_slice %15 {offsets = [0, 1, 0, 0], sizes = [8, 1, 8, 32], strides = [1, 1, 1, 1]} : vector<8x2x8x32xf32> to vector<8x1x8x32xf32>
    %19 = vector.shape_cast %18 : vector<8x1x8x32xf32> to vector<8x8x32xf32>
    %20 = arith.maximumf %17, %19 : vector<8x8x32xf32>
    %21 = vector.shape_cast %20 : vector<8x8x32xf32> to vector<1x8x8x32xf32>
    %cst_7 = arith.constant 0.000000e+00 : f32
    %22 = vector.broadcast %cst_7 : f32 to vector<1x1x10x32xf32>
    %cst_8 = arith.constant 0.000000e+00 : f32
    %23 = vector.broadcast %cst_8 : f32 to vector<1x10x1x32xf32>
    %c0_9 = arith.constant 0 : index
    %c0_10 = arith.constant 0 : index
    %c0_11 = arith.constant 0 : index
    %c0_12 = arith.constant 0 : index
    %24 = vector.load %arg13[%c0_9, %c0_10, %c0_11, %c0_12] : memref<1x10x10x32xf32, #tpu.memory_space<vmem>>, vector<1x1x10x32xf32>
    tpu.vector_store %arg13[%c0_9, %c0_10, %c0_11, %c0_12], %22 {strides = array<i32>} : memref<1x10x10x32xf32, #tpu.memory_space<vmem>>, vector<1x1x10x32xf32>,
    %c0_13 = arith.constant 0 : index
    %c9 = arith.constant 9 : index
    %c0_14 = arith.constant 0 : index
    %c0_15 = arith.constant 0 : index
    %25 = vector.load %arg13[%c0_13, %c9, %c0_14, %c0_15] : memref<1x10x10x32xf32, #tpu.memory_space<vmem>>, vector<1x1x10x32xf32>
    tpu.vector_store %arg13[%c0_13, %c9, %c0_14, %c0_15], %22 {strides = array<i32>} : memref<1x10x10x32xf32, #tpu.memory_space<vmem>>, vector<1x1x10x32xf32>,
    %c0_16 = arith.constant 0 : index
    %c0_17 = arith.constant 0 : index
    %c0_18 = arith.constant 0 : index
    %c0_19 = arith.constant 0 : index
    %26 = vector.load %arg13[%c0_16, %c0_17, %c0_18, %c0_19] : memref<1x10x10x32xf32, #tpu.memory_space<vmem>>, vector<1x10x1x32xf32>
    tpu.vector_store %arg13[%c0_16, %c0_17, %c0_18, %c0_19], %23 {strides = array<i32>} : memref<1x10x10x32xf32, #tpu.memory_space<vmem>>, vector<1x10x1x32xf32>,
    %c0_20 = arith.constant 0 : index
    %c0_21 = arith.constant 0 : index
    %c9_22 = arith.constant 9 : index
    %c0_23 = arith.constant 0 : index
    %27 = vector.load %arg13[%c0_20, %c0_21, %c9_22, %c0_23] : memref<1x10x10x32xf32, #tpu.memory_space<vmem>>, vector<1x10x1x32xf32>
    tpu.vector_store %arg13[%c0_20, %c0_21, %c9_22, %c0_23], %23 {strides = array<i32>} : memref<1x10x10x32xf32, #tpu.memory_space<vmem>>, vector<1x10x1x32xf32>,
    %c0_24 = arith.constant 0 : index
    %c1 = arith.constant 1 : index
    %c1_25 = arith.constant 1 : index
    %c0_26 = arith.constant 0 : index
    %28 = vector.load %arg13[%c0_24, %c1, %c1_25, %c0_26] : memref<1x10x10x32xf32, #tpu.memory_space<vmem>>, vector<1x8x8x32xf32>
    tpu.vector_store %arg13[%c0_24, %c1, %c1_25, %c0_26], %21 {strides = array<i32>} : memref<1x10x10x32xf32, #tpu.memory_space<vmem>>, vector<1x8x8x32xf32>,
    %c0_27 = arith.constant 0 : index
    %c0_28 = arith.constant 0 : index
    %c0_29 = arith.constant 0 : index
    %c0_30 = arith.constant 0 : index
    %29 = vector.load %arg13[%c0_27, %c0_28, %c0_29, %c0_30] : memref<1x10x10x32xf32, #tpu.memory_space<vmem>>, vector<1x8x8x32xf32>
    %30 = vector.shape_cast %29 : vector<1x8x8x32xf32> to vector<64x32xf32>
    %c0_31 = arith.constant 0 : index
    %c0_32 = arith.constant 0 : index
    %c1_33 = arith.constant 1 : index
    %c0_34 = arith.constant 0 : index
    %31 = vector.load %arg13[%c0_31, %c0_32, %c1_33, %c0_34] : memref<1x10x10x32xf32, #tpu.memory_space<vmem>>, vector<1x8x8x32xf32>
    %32 = vector.shape_cast %31 : vector<1x8x8x32xf32> to vector<64x32xf32>
    %c0_35 = arith.constant 0 : index
    %c0_36 = arith.constant 0 : index
    %c2 = arith.constant 2 : index
    %c0_37 = arith.constant 0 : index
    %33 = vector.load %arg13[%c0_35, %c0_36, %c2, %c0_37] : memref<1x10x10x32xf32, #tpu.memory_space<vmem>>, vector<1x8x8x32xf32>
    %34 = vector.shape_cast %33 : vector<1x8x8x32xf32> to vector<64x32xf32>
    %c0_38 = arith.constant 0 : index
    %c1_39 = arith.constant 1 : index
    %c0_40 = arith.constant 0 : index
    %c0_41 = arith.constant 0 : index
    %35 = vector.load %arg13[%c0_38, %c1_39, %c0_40, %c0_41] : memref<1x10x10x32xf32, #tpu.memory_space<vmem>>, vector<1x8x8x32xf32>
    %36 = vector.shape_cast %35 : vector<1x8x8x32xf32> to vector<64x32xf32>
    %c0_42 = arith.constant 0 : index
    %c1_43 = arith.constant 1 : index
    %c1_44 = arith.constant 1 : index
    %c0_45 = arith.constant 0 : index
    %37 = vector.load %arg13[%c0_42, %c1_43, %c1_44, %c0_45] : memref<1x10x10x32xf32, #tpu.memory_space<vmem>>, vector<1x8x8x32xf32>
    %38 = vector.shape_cast %37 : vector<1x8x8x32xf32> to vector<64x32xf32>
    %c0_46 = arith.constant 0 : index
    %c1_47 = arith.constant 1 : index
    %c2_48 = arith.constant 2 : index
    %c0_49 = arith.constant 0 : index
    %39 = vector.load %arg13[%c0_46, %c1_47, %c2_48, %c0_49] : memref<1x10x10x32xf32, #tpu.memory_space<vmem>>, vector<1x8x8x32xf32>
    %40 = vector.shape_cast %39 : vector<1x8x8x32xf32> to vector<64x32xf32>
    %c0_50 = arith.constant 0 : index
    %c2_51 = arith.constant 2 : index
    %c0_52 = arith.constant 0 : index
    %c0_53 = arith.constant 0 : index
    %41 = vector.load %arg13[%c0_50, %c2_51, %c0_52, %c0_53] : memref<1x10x10x32xf32, #tpu.memory_space<vmem>>, vector<1x8x8x32xf32>
    %42 = vector.shape_cast %41 : vector<1x8x8x32xf32> to vector<64x32xf32>
    %c0_54 = arith.constant 0 : index
    %c2_55 = arith.constant 2 : index
    %c1_56 = arith.constant 1 : index
    %c0_57 = arith.constant 0 : index
    %43 = vector.load %arg13[%c0_54, %c2_55, %c1_56, %c0_57] : memref<1x10x10x32xf32, #tpu.memory_space<vmem>>, vector<1x8x8x32xf32>
    %44 = vector.shape_cast %43 : vector<1x8x8x32xf32> to vector<64x32xf32>
    %c0_58 = arith.constant 0 : index
    %c2_59 = arith.constant 2 : index
    %c2_60 = arith.constant 2 : index
    %c0_61 = arith.constant 0 : index
    %45 = vector.load %arg13[%c0_58, %c2_59, %c2_60, %c0_61] : memref<1x10x10x32xf32, #tpu.memory_space<vmem>>, vector<1x8x8x32xf32>
    %46 = vector.shape_cast %45 : vector<1x8x8x32xf32> to vector<64x32xf32>
    %47 = tpu.concatenate %30, %32, %34, %36, %38, %40, %42, %44, %46 in 1 : vector<64x32xf32>, vector<64x32xf32>, vector<64x32xf32>, vector<64x32xf32>, vector<64x32xf32>, vector<64x32xf32>, vector<64x32xf32>, vector<64x32xf32>, vector<64x32xf32> -> vector<64x288xf32>
    %48 = arith.truncf %47 : vector<64x288xf32> to vector<64x288xbf16>
    %c0_62 = arith.constant 0 : index
    %c0_63 = arith.constant 0 : index
    %49 = vector.load %arg4[%c0_62, %c0_63] : memref<288x64xbf16, #tpu.memory_space<vmem>>, vector<288x64xbf16>
    %cst_64 = arith.constant dense<0.000000e+00> : vector<64x64xf32>
    %50 = tpu.matmul %48, %49, %cst_64 {dimension_numbers = #tpu.dot_dimension_numbers<[1], [0], [0], [1], [0, 0, 1, 1], [], []>} : vector<64x288xbf16>, vector<288x64xbf16>, vector<64x64xf32> -> vector<64x64xf32>
    %c0_65 = arith.constant 0 : index
    %c0_66 = arith.constant 0 : index
    %51 = vector.load %arg5[%c0_65, %c0_66] : memref<1x64xf32, #tpu.memory_space<vmem>>, vector<1x64xf32>
    %52 = vector.broadcast %51 : vector<1x64xf32> to vector<64x64xf32>
    %53 = arith.addf %50, %52 : vector<64x64xf32>
    %cst_67 = arith.constant 0.000000e+00 : f32
    %54 = vector.broadcast %cst_67 : f32 to vector<64x64xf32>
    %55 = arith.maximumf %53, %54 : vector<64x64xf32>
    %56 = vector.shape_cast %55 : vector<64x64xf32> to vector<8x4x2x64xf32>
    %57 = vector.extract_strided_slice %56 {offsets = [0, 0, 0, 0], sizes = [8, 4, 1, 64], strides = [1, 1, 1, 1]} : vector<8x4x2x64xf32> to vector<8x4x1x64xf32>
    %58 = vector.shape_cast %57 : vector<8x4x1x64xf32> to vector<8x4x64xf32>
    %59 = vector.extract_strided_slice %56 {offsets = [0, 0, 1, 0], sizes = [8, 4, 1, 64], strides = [1, 1, 1, 1]} : vector<8x4x2x64xf32> to vector<8x4x1x64xf32>
    %60 = vector.shape_cast %59 : vector<8x4x1x64xf32> to vector<8x4x64xf32>
    %61 = arith.maximumf %58, %60 : vector<8x4x64xf32>
    %62 = vector.shape_cast %61 : vector<8x4x64xf32> to vector<4x2x4x64xf32>
    %63 = vector.extract_strided_slice %62 {offsets = [0, 0, 0, 0], sizes = [4, 1, 4, 64], strides = [1, 1, 1, 1]} : vector<4x2x4x64xf32> to vector<4x1x4x64xf32>
    %64 = vector.shape_cast %63 : vector<4x1x4x64xf32> to vector<4x4x64xf32>
    %65 = vector.extract_strided_slice %62 {offsets = [0, 1, 0, 0], sizes = [4, 1, 4, 64], strides = [1, 1, 1, 1]} : vector<4x2x4x64xf32> to vector<4x1x4x64xf32>
    %66 = vector.shape_cast %65 : vector<4x1x4x64xf32> to vector<4x4x64xf32>
    %67 = arith.maximumf %64, %66 : vector<4x4x64xf32>
    %68 = vector.shape_cast %67 : vector<4x4x64xf32> to vector<1x4x4x64xf32>
    %cst_68 = arith.constant 0.000000e+00 : f32
    %69 = vector.broadcast %cst_68 : f32 to vector<1x1x6x64xf32>
    %cst_69 = arith.constant 0.000000e+00 : f32
    %70 = vector.broadcast %cst_69 : f32 to vector<1x6x1x64xf32>
    %c0_70 = arith.constant 0 : index
    %c0_71 = arith.constant 0 : index
    %c0_72 = arith.constant 0 : index
    %c0_73 = arith.constant 0 : index
    %71 = vector.load %arg14[%c0_70, %c0_71, %c0_72, %c0_73] : memref<1x6x6x64xf32, #tpu.memory_space<vmem>>, vector<1x1x6x64xf32>
    tpu.vector_store %arg14[%c0_70, %c0_71, %c0_72, %c0_73], %69 {strides = array<i32>} : memref<1x6x6x64xf32, #tpu.memory_space<vmem>>, vector<1x1x6x64xf32>,
    %c0_74 = arith.constant 0 : index
    %c5 = arith.constant 5 : index
    %c0_75 = arith.constant 0 : index
    %c0_76 = arith.constant 0 : index
    %72 = vector.load %arg14[%c0_74, %c5, %c0_75, %c0_76] : memref<1x6x6x64xf32, #tpu.memory_space<vmem>>, vector<1x1x6x64xf32>
    tpu.vector_store %arg14[%c0_74, %c5, %c0_75, %c0_76], %69 {strides = array<i32>} : memref<1x6x6x64xf32, #tpu.memory_space<vmem>>, vector<1x1x6x64xf32>,
    %c0_77 = arith.constant 0 : index
    %c0_78 = arith.constant 0 : index
    %c0_79 = arith.constant 0 : index
    %c0_80 = arith.constant 0 : index
    %73 = vector.load %arg14[%c0_77, %c0_78, %c0_79, %c0_80] : memref<1x6x6x64xf32, #tpu.memory_space<vmem>>, vector<1x6x1x64xf32>
    tpu.vector_store %arg14[%c0_77, %c0_78, %c0_79, %c0_80], %70 {strides = array<i32>} : memref<1x6x6x64xf32, #tpu.memory_space<vmem>>, vector<1x6x1x64xf32>,
    %c0_81 = arith.constant 0 : index
    %c0_82 = arith.constant 0 : index
    %c5_83 = arith.constant 5 : index
    %c0_84 = arith.constant 0 : index
    %74 = vector.load %arg14[%c0_81, %c0_82, %c5_83, %c0_84] : memref<1x6x6x64xf32, #tpu.memory_space<vmem>>, vector<1x6x1x64xf32>
    tpu.vector_store %arg14[%c0_81, %c0_82, %c5_83, %c0_84], %70 {strides = array<i32>} : memref<1x6x6x64xf32, #tpu.memory_space<vmem>>, vector<1x6x1x64xf32>,
    %c0_85 = arith.constant 0 : index
    %c1_86 = arith.constant 1 : index
    %c1_87 = arith.constant 1 : index
    %c0_88 = arith.constant 0 : index
    %75 = vector.load %arg14[%c0_85, %c1_86, %c1_87, %c0_88] : memref<1x6x6x64xf32, #tpu.memory_space<vmem>>, vector<1x4x4x64xf32>
    tpu.vector_store %arg14[%c0_85, %c1_86, %c1_87, %c0_88], %68 {strides = array<i32>} : memref<1x6x6x64xf32, #tpu.memory_space<vmem>>, vector<1x4x4x64xf32>,
    %c0_89 = arith.constant 0 : index
    %c0_90 = arith.constant 0 : index
    %c0_91 = arith.constant 0 : index
    %c0_92 = arith.constant 0 : index
    %76 = vector.load %arg14[%c0_89, %c0_90, %c0_91, %c0_92] : memref<1x6x6x64xf32, #tpu.memory_space<vmem>>, vector<1x4x4x64xf32>
    %77 = vector.shape_cast %76 : vector<1x4x4x64xf32> to vector<16x64xf32>
    %c0_93 = arith.constant 0 : index
    %c0_94 = arith.constant 0 : index
    %c1_95 = arith.constant 1 : index
    %c0_96 = arith.constant 0 : index
    %78 = vector.load %arg14[%c0_93, %c0_94, %c1_95, %c0_96] : memref<1x6x6x64xf32, #tpu.memory_space<vmem>>, vector<1x4x4x64xf32>
    %79 = vector.shape_cast %78 : vector<1x4x4x64xf32> to vector<16x64xf32>
    %c0_97 = arith.constant 0 : index
    %c0_98 = arith.constant 0 : index
    %c2_99 = arith.constant 2 : index
    %c0_100 = arith.constant 0 : index
    %80 = vector.load %arg14[%c0_97, %c0_98, %c2_99, %c0_100] : memref<1x6x6x64xf32, #tpu.memory_space<vmem>>, vector<1x4x4x64xf32>
    %81 = vector.shape_cast %80 : vector<1x4x4x64xf32> to vector<16x64xf32>
    %c0_101 = arith.constant 0 : index
    %c1_102 = arith.constant 1 : index
    %c0_103 = arith.constant 0 : index
    %c0_104 = arith.constant 0 : index
    %82 = vector.load %arg14[%c0_101, %c1_102, %c0_103, %c0_104] : memref<1x6x6x64xf32, #tpu.memory_space<vmem>>, vector<1x4x4x64xf32>
    %83 = vector.shape_cast %82 : vector<1x4x4x64xf32> to vector<16x64xf32>
    %c0_105 = arith.constant 0 : index
    %c1_106 = arith.constant 1 : index
    %c1_107 = arith.constant 1 : index
    %c0_108 = arith.constant 0 : index
    %84 = vector.load %arg14[%c0_105, %c1_106, %c1_107, %c0_108] : memref<1x6x6x64xf32, #tpu.memory_space<vmem>>, vector<1x4x4x64xf32>
    %85 = vector.shape_cast %84 : vector<1x4x4x64xf32> to vector<16x64xf32>
    %c0_109 = arith.constant 0 : index
    %c1_110 = arith.constant 1 : index
    %c2_111 = arith.constant 2 : index
    %c0_112 = arith.constant 0 : index
    %86 = vector.load %arg14[%c0_109, %c1_110, %c2_111, %c0_112] : memref<1x6x6x64xf32, #tpu.memory_space<vmem>>, vector<1x4x4x64xf32>
    %87 = vector.shape_cast %86 : vector<1x4x4x64xf32> to vector<16x64xf32>
    %c0_113 = arith.constant 0 : index
    %c2_114 = arith.constant 2 : index
    %c0_115 = arith.constant 0 : index
    %c0_116 = arith.constant 0 : index
    %88 = vector.load %arg14[%c0_113, %c2_114, %c0_115, %c0_116] : memref<1x6x6x64xf32, #tpu.memory_space<vmem>>, vector<1x4x4x64xf32>
    %89 = vector.shape_cast %88 : vector<1x4x4x64xf32> to vector<16x64xf32>
    %c0_117 = arith.constant 0 : index
    %c2_118 = arith.constant 2 : index
    %c1_119 = arith.constant 1 : index
    %c0_120 = arith.constant 0 : index
    %90 = vector.load %arg14[%c0_117, %c2_118, %c1_119, %c0_120] : memref<1x6x6x64xf32, #tpu.memory_space<vmem>>, vector<1x4x4x64xf32>
    %91 = vector.shape_cast %90 : vector<1x4x4x64xf32> to vector<16x64xf32>
    %c0_121 = arith.constant 0 : index
    %c2_122 = arith.constant 2 : index
    %c2_123 = arith.constant 2 : index
    %c0_124 = arith.constant 0 : index
    %92 = vector.load %arg14[%c0_121, %c2_122, %c2_123, %c0_124] : memref<1x6x6x64xf32, #tpu.memory_space<vmem>>, vector<1x4x4x64xf32>
    %93 = vector.shape_cast %92 : vector<1x4x4x64xf32> to vector<16x64xf32>
    %94 = tpu.concatenate %77, %79, %81, %83, %85, %87, %89, %91, %93 in 1 : vector<16x64xf32>, vector<16x64xf32>, vector<16x64xf32>, vector<16x64xf32>, vector<16x64xf32>, vector<16x64xf32>, vector<16x64xf32>, vector<16x64xf32>, vector<16x64xf32> -> vector<16x576xf32>
    %95 = arith.truncf %94 : vector<16x576xf32> to vector<16x576xbf16>
    %c0_125 = arith.constant 0 : index
    %c0_126 = arith.constant 0 : index
    %96 = vector.load %arg6[%c0_125, %c0_126] : memref<576x128xbf16, #tpu.memory_space<vmem>>, vector<576x128xbf16>
    %cst_127 = arith.constant dense<0.000000e+00> : vector<16x128xf32>
    %97 = tpu.matmul %95, %96, %cst_127 {dimension_numbers = #tpu.dot_dimension_numbers<[1], [0], [0], [1], [0, 0, 1, 1], [], []>} : vector<16x576xbf16>, vector<576x128xbf16>, vector<16x128xf32> -> vector<16x128xf32>
    %c0_128 = arith.constant 0 : index
    %c0_129 = arith.constant 0 : index
    %98 = vector.load %arg7[%c0_128, %c0_129] : memref<1x128xf32, #tpu.memory_space<vmem>>, vector<1x128xf32>
    %99 = vector.broadcast %98 : vector<1x128xf32> to vector<16x128xf32>
    %100 = arith.addf %97, %99 : vector<16x128xf32>
    %cst_130 = arith.constant 0.000000e+00 : f32
    %101 = vector.broadcast %cst_130 : f32 to vector<16x128xf32>
    %102 = arith.maximumf %100, %101 : vector<16x128xf32>
    %103 = vector.shape_cast %102 : vector<16x128xf32> to vector<4x2x2x128xf32>
    %104 = vector.extract_strided_slice %103 {offsets = [0, 0, 0, 0], sizes = [4, 2, 1, 128], strides = [1, 1, 1, 1]} : vector<4x2x2x128xf32> to vector<4x2x1x128xf32>
    %105 = vector.shape_cast %104 : vector<4x2x1x128xf32> to vector<4x2x128xf32>
    %106 = vector.extract_strided_slice %103 {offsets = [0, 0, 1, 0], sizes = [4, 2, 1, 128], strides = [1, 1, 1, 1]} : vector<4x2x2x128xf32> to vector<4x2x1x128xf32>
    %107 = vector.shape_cast %106 : vector<4x2x1x128xf32> to vector<4x2x128xf32>
    %108 = arith.maximumf %105, %107 : vector<4x2x128xf32>
    %109 = vector.shape_cast %108 : vector<4x2x128xf32> to vector<2x2x2x128xf32>
    %110 = vector.extract_strided_slice %109 {offsets = [0, 0, 0, 0], sizes = [2, 1, 2, 128], strides = [1, 1, 1, 1]} : vector<2x2x2x128xf32> to vector<2x1x2x128xf32>
    %111 = vector.shape_cast %110 : vector<2x1x2x128xf32> to vector<2x2x128xf32>
    %112 = vector.extract_strided_slice %109 {offsets = [0, 1, 0, 0], sizes = [2, 1, 2, 128], strides = [1, 1, 1, 1]} : vector<2x2x2x128xf32> to vector<2x1x2x128xf32>
    %113 = vector.shape_cast %112 : vector<2x1x2x128xf32> to vector<2x2x128xf32>
    %114 = arith.maximumf %111, %113 : vector<2x2x128xf32>
    %115 = vector.shape_cast %114 : vector<2x2x128xf32> to vector<1x2x2x128xf32>
    %cst_131 = arith.constant 0.000000e+00 : f32
    %116 = vector.broadcast %cst_131 : f32 to vector<1x1x4x128xf32>
    %cst_132 = arith.constant 0.000000e+00 : f32
    %117 = vector.broadcast %cst_132 : f32 to vector<1x4x1x128xf32>
    %c0_133 = arith.constant 0 : index
    %c0_134 = arith.constant 0 : index
    %c0_135 = arith.constant 0 : index
    %c0_136 = arith.constant 0 : index
    %118 = vector.load %arg15[%c0_133, %c0_134, %c0_135, %c0_136] : memref<1x4x4x128xf32, #tpu.memory_space<vmem>>, vector<1x1x4x128xf32>
    tpu.vector_store %arg15[%c0_133, %c0_134, %c0_135, %c0_136], %116 {strides = array<i32>} : memref<1x4x4x128xf32, #tpu.memory_space<vmem>>, vector<1x1x4x128xf32>,
    %c0_137 = arith.constant 0 : index
    %c3 = arith.constant 3 : index
    %c0_138 = arith.constant 0 : index
    %c0_139 = arith.constant 0 : index
    %119 = vector.load %arg15[%c0_137, %c3, %c0_138, %c0_139] : memref<1x4x4x128xf32, #tpu.memory_space<vmem>>, vector<1x1x4x128xf32>
    tpu.vector_store %arg15[%c0_137, %c3, %c0_138, %c0_139], %116 {strides = array<i32>} : memref<1x4x4x128xf32, #tpu.memory_space<vmem>>, vector<1x1x4x128xf32>,
    %c0_140 = arith.constant 0 : index
    %c0_141 = arith.constant 0 : index
    %c0_142 = arith.constant 0 : index
    %c0_143 = arith.constant 0 : index
    %120 = vector.load %arg15[%c0_140, %c0_141, %c0_142, %c0_143] : memref<1x4x4x128xf32, #tpu.memory_space<vmem>>, vector<1x4x1x128xf32>
    tpu.vector_store %arg15[%c0_140, %c0_141, %c0_142, %c0_143], %117 {strides = array<i32>} : memref<1x4x4x128xf32, #tpu.memory_space<vmem>>, vector<1x4x1x128xf32>,
    %c0_144 = arith.constant 0 : index
    %c0_145 = arith.constant 0 : index
    %c3_146 = arith.constant 3 : index
    %c0_147 = arith.constant 0 : index
    %121 = vector.load %arg15[%c0_144, %c0_145, %c3_146, %c0_147] : memref<1x4x4x128xf32, #tpu.memory_space<vmem>>, vector<1x4x1x128xf32>
    tpu.vector_store %arg15[%c0_144, %c0_145, %c3_146, %c0_147], %117 {strides = array<i32>} : memref<1x4x4x128xf32, #tpu.memory_space<vmem>>, vector<1x4x1x128xf32>,
    %c0_148 = arith.constant 0 : index
    %c1_149 = arith.constant 1 : index
    %c1_150 = arith.constant 1 : index
    %c0_151 = arith.constant 0 : index
    %122 = vector.load %arg15[%c0_148, %c1_149, %c1_150, %c0_151] : memref<1x4x4x128xf32, #tpu.memory_space<vmem>>, vector<1x2x2x128xf32>
    tpu.vector_store %arg15[%c0_148, %c1_149, %c1_150, %c0_151], %115 {strides = array<i32>} : memref<1x4x4x128xf32, #tpu.memory_space<vmem>>, vector<1x2x2x128xf32>,
    %c0_152 = arith.constant 0 : index
    %c0_153 = arith.constant 0 : index
    %c0_154 = arith.constant 0 : index
    %c0_155 = arith.constant 0 : index
    %123 = vector.load %arg15[%c0_152, %c0_153, %c0_154, %c0_155] : memref<1x4x4x128xf32, #tpu.memory_space<vmem>>, vector<1x2x2x128xf32>
    %124 = vector.shape_cast %123 : vector<1x2x2x128xf32> to vector<4x128xf32>
    %c0_156 = arith.constant 0 : index
    %c0_157 = arith.constant 0 : index
    %c1_158 = arith.constant 1 : index
    %c0_159 = arith.constant 0 : index
    %125 = vector.load %arg15[%c0_156, %c0_157, %c1_158, %c0_159] : memref<1x4x4x128xf32, #tpu.memory_space<vmem>>, vector<1x2x2x128xf32>
    %126 = vector.shape_cast %125 : vector<1x2x2x128xf32> to vector<4x128xf32>
    %c0_160 = arith.constant 0 : index
    %c0_161 = arith.constant 0 : index
    %c2_162 = arith.constant 2 : index
    %c0_163 = arith.constant 0 : index
    %127 = vector.load %arg15[%c0_160, %c0_161, %c2_162, %c0_163] : memref<1x4x4x128xf32, #tpu.memory_space<vmem>>, vector<1x2x2x128xf32>
    %128 = vector.shape_cast %127 : vector<1x2x2x128xf32> to vector<4x128xf32>
    %c0_164 = arith.constant 0 : index
    %c1_165 = arith.constant 1 : index
    %c0_166 = arith.constant 0 : index
    %c0_167 = arith.constant 0 : index
    %129 = vector.load %arg15[%c0_164, %c1_165, %c0_166, %c0_167] : memref<1x4x4x128xf32, #tpu.memory_space<vmem>>, vector<1x2x2x128xf32>
    %130 = vector.shape_cast %129 : vector<1x2x2x128xf32> to vector<4x128xf32>
    %c0_168 = arith.constant 0 : index
    %c1_169 = arith.constant 1 : index
    %c1_170 = arith.constant 1 : index
    %c0_171 = arith.constant 0 : index
    %131 = vector.load %arg15[%c0_168, %c1_169, %c1_170, %c0_171] : memref<1x4x4x128xf32, #tpu.memory_space<vmem>>, vector<1x2x2x128xf32>
    %132 = vector.shape_cast %131 : vector<1x2x2x128xf32> to vector<4x128xf32>
    %c0_172 = arith.constant 0 : index
    %c1_173 = arith.constant 1 : index
    %c2_174 = arith.constant 2 : index
    %c0_175 = arith.constant 0 : index
    %133 = vector.load %arg15[%c0_172, %c1_173, %c2_174, %c0_175] : memref<1x4x4x128xf32, #tpu.memory_space<vmem>>, vector<1x2x2x128xf32>
    %134 = vector.shape_cast %133 : vector<1x2x2x128xf32> to vector<4x128xf32>
    %c0_176 = arith.constant 0 : index
    %c2_177 = arith.constant 2 : index
    %c0_178 = arith.constant 0 : index
    %c0_179 = arith.constant 0 : index
    %135 = vector.load %arg15[%c0_176, %c2_177, %c0_178, %c0_179] : memref<1x4x4x128xf32, #tpu.memory_space<vmem>>, vector<1x2x2x128xf32>
    %136 = vector.shape_cast %135 : vector<1x2x2x128xf32> to vector<4x128xf32>
    %c0_180 = arith.constant 0 : index
    %c2_181 = arith.constant 2 : index
    %c1_182 = arith.constant 1 : index
    %c0_183 = arith.constant 0 : index
    %137 = vector.load %arg15[%c0_180, %c2_181, %c1_182, %c0_183] : memref<1x4x4x128xf32, #tpu.memory_space<vmem>>, vector<1x2x2x128xf32>
    %138 = vector.shape_cast %137 : vector<1x2x2x128xf32> to vector<4x128xf32>
    %c0_184 = arith.constant 0 : index
    %c2_185 = arith.constant 2 : index
    %c2_186 = arith.constant 2 : index
    %c0_187 = arith.constant 0 : index
    %139 = vector.load %arg15[%c0_184, %c2_185, %c2_186, %c0_187] : memref<1x4x4x128xf32, #tpu.memory_space<vmem>>, vector<1x2x2x128xf32>
    %140 = vector.shape_cast %139 : vector<1x2x2x128xf32> to vector<4x128xf32>
    %141 = tpu.concatenate %124, %126, %128, %130, %132, %134, %136, %138, %140 in 1 : vector<4x128xf32>, vector<4x128xf32>, vector<4x128xf32>, vector<4x128xf32>, vector<4x128xf32>, vector<4x128xf32>, vector<4x128xf32>, vector<4x128xf32>, vector<4x128xf32> -> vector<4x1152xf32>
    %142 = arith.truncf %141 : vector<4x1152xf32> to vector<4x1152xbf16>
    %c0_188 = arith.constant 0 : index
    %c0_189 = arith.constant 0 : index
    %143 = vector.load %arg8[%c0_188, %c0_189] : memref<1152x256xbf16, #tpu.memory_space<vmem>>, vector<1152x256xbf16>
    %cst_190 = arith.constant dense<0.000000e+00> : vector<4x256xf32>
    %144 = tpu.matmul %142, %143, %cst_190 {dimension_numbers = #tpu.dot_dimension_numbers<[1], [0], [0], [1], [0, 0, 1, 1], [], []>} : vector<4x1152xbf16>, vector<1152x256xbf16>, vector<4x256xf32> -> vector<4x256xf32>
    %c0_191 = arith.constant 0 : index
    %c0_192 = arith.constant 0 : index
    %145 = vector.load %arg9[%c0_191, %c0_192] : memref<1x256xf32, #tpu.memory_space<vmem>>, vector<1x256xf32>
    %146 = vector.broadcast %145 : vector<1x256xf32> to vector<4x256xf32>
    %147 = arith.addf %144, %146 : vector<4x256xf32>
    %cst_193 = arith.constant 0.000000e+00 : f32
    %148 = vector.broadcast %cst_193 : f32 to vector<4x256xf32>
    %149 = arith.maximumf %147, %148 : vector<4x256xf32>
    %150 = vector.shape_cast %149 : vector<4x256xf32> to vector<1x4x256xf32>
    %cst_194 = arith.constant dense<0.000000e+00> : vector<1x256xf32>
    %151 = vector.multi_reduction <add>, %150, %cst_194 [1] : vector<1x4x256xf32> to vector<1x256xf32>
    %cst_195 = arith.constant 2.500000e-01 : f32
    %152 = vector.broadcast %cst_195 : f32 to vector<1x256xf32>
    %153 = arith.mulf %151, %152 : vector<1x256xf32>
    %154 = arith.truncf %153 : vector<1x256xf32> to vector<1x256xbf16>
    %c0_196 = arith.constant 0 : index
    %c0_197 = arith.constant 0 : index
    %155 = vector.load %arg10[%c0_196, %c0_197] : memref<256x128xbf16, #tpu.memory_space<vmem>>, vector<256x128xbf16>
    %cst_198 = arith.constant dense<0.000000e+00> : vector<1x128xf32>
    %156 = tpu.matmul %154, %155, %cst_198 {dimension_numbers = #tpu.dot_dimension_numbers<[1], [0], [0], [1], [0, 0, 1, 1], [], []>} : vector<1x256xbf16>, vector<256x128xbf16>, vector<1x128xf32> -> vector<1x128xf32>
    %c0_199 = arith.constant 0 : index
    %c0_200 = arith.constant 0 : index
    %157 = vector.load %arg11[%c0_199, %c0_200] : memref<1x128xf32, #tpu.memory_space<vmem>>, vector<1x128xf32>
    %158 = arith.addf %156, %157 : vector<1x128xf32>
    %159 = vector.shape_cast %158 : vector<1x128xf32> to vector<1x1x128xf32>
    %c0_201 = arith.constant 0 : index
    %c0_202 = arith.constant 0 : index
    %c0_203 = arith.constant 0 : index
    %160 = vector.load %arg12[%c0_201, %c0_202, %c0_203] : memref<1x1x128xf32, #tpu.memory_space<vmem>>, vector<1x1x128xf32>
    tpu.vector_store %arg12[%c0_201, %c0_202, %c0_203], %159 {strides = array<i32>} : memref<1x1x128xf32, #tpu.memory_space<vmem>>, vector<1x1x128xf32>,
    return
  }
  func.func @transform_0(%arg0: i32) -> (i32, i32, i32) {
    %c0_i32 = arith.constant 0 : i32
    %c0_i32_0 = arith.constant 0 : i32
    %c0_i32_1 = arith.constant 0 : i32
    return %arg0, %c0_i32, %c0_i32_0 : i32, i32, i32
  }
  func.func @transform_1(%arg0: i32) -> (i32, i32) {
    %c0_i32 = arith.constant 0 : i32
    %c0_i32_0 = arith.constant 0 : i32
    %c0_i32_1 = arith.constant 0 : i32
    return %c0_i32, %c0_i32_0 : i32, i32
  }
  func.func @transform_2(%arg0: i32) -> (i32, i32) {
    %c0_i32 = arith.constant 0 : i32
    %c0_i32_0 = arith.constant 0 : i32
    %c0_i32_1 = arith.constant 0 : i32
    return %c0_i32, %c0_i32_0 : i32, i32
  }
  func.func @transform_3(%arg0: i32) -> (i32, i32) {
    %c0_i32 = arith.constant 0 : i32
    %c0_i32_0 = arith.constant 0 : i32
    %c0_i32_1 = arith.constant 0 : i32
    return %c0_i32, %c0_i32_0 : i32, i32
  }
  func.func @transform_4(%arg0: i32) -> (i32, i32) {
    %c0_i32 = arith.constant 0 : i32
    %c0_i32_0 = arith.constant 0 : i32
    %c0_i32_1 = arith.constant 0 : i32
    return %c0_i32, %c0_i32_0 : i32, i32
  }
  func.func @transform_5(%arg0: i32) -> (i32, i32) {
    %c0_i32 = arith.constant 0 : i32
    %c0_i32_0 = arith.constant 0 : i32
    %c0_i32_1 = arith.constant 0 : i32
    return %c0_i32, %c0_i32_0 : i32, i32
  }
  func.func @transform_6(%arg0: i32) -> (i32, i32) {
    %c0_i32 = arith.constant 0 : i32
    %c0_i32_0 = arith.constant 0 : i32
    %c0_i32_1 = arith.constant 0 : i32
    return %c0_i32, %c0_i32_0 : i32, i32
  }
  func.func @transform_7(%arg0: i32) -> (i32, i32) {
    %c0_i32 = arith.constant 0 : i32
    %c0_i32_0 = arith.constant 0 : i32
    %c0_i32_1 = arith.constant 0 : i32
    return %c0_i32, %c0_i32_0 : i32, i32
  }
  func.func @transform_8(%arg0: i32) -> (i32, i32) {
    %c0_i32 = arith.constant 0 : i32
    %c0_i32_0 = arith.constant 0 : i32
    %c0_i32_1 = arith.constant 0 : i32
    return %c0_i32, %c0_i32_0 : i32, i32
  }
  func.func @transform_9(%arg0: i32) -> (i32, i32) {
    %c0_i32 = arith.constant 0 : i32
    %c0_i32_0 = arith.constant 0 : i32
    %c0_i32_1 = arith.constant 0 : i32
    return %c0_i32, %c0_i32_0 : i32, i32
  }
  func.func @transform_10(%arg0: i32) -> (i32, i32) {
    %c0_i32 = arith.constant 0 : i32
    %c0_i32_0 = arith.constant 0 : i32
    %c0_i32_1 = arith.constant 0 : i32
    return %c0_i32, %c0_i32_0 : i32, i32
  }
  func.func @transform_11(%arg0: i32) -> (i32, i32, i32) {
    %c0_i32 = arith.constant 0 : i32
    %c0_i32_0 = arith.constant 0 : i32
    %c0_i32_1 = arith.constant 0 : i32
    return %arg0, %c0_i32, %c0_i32_0 : i32, i32, i32
  }
}

</mosaic_0001>

<bundles_post_ra>
// kernel: tiny_emoji_net_pallas.1
= control target key start
LH: loop header
LB: loop body
LE: loop exit
PB: predicated region body
PF: predicated region fallthrough
CT: control target
= control target key end

     0   :  { %s8057_s0 = inlined_call_operand.vmem [shape: bf16[2,256,32], index: 0, kind: input, shape index: {}]   ;;  %s8058_s1 = inlined_call_operand.vmem [shape: bf16[32,32], index: 1, kind: input, shape index: {}]   ;;  %s8059_s2 = inlined_call_operand.vmem [shape: f32[1,32], index: 2, kind: input, shape index: {}]   ;;  %s8060_s3 = inlined_call_operand.vmem [shape: bf16[288,64], index: 3, kind: input, shape index: {}]   ;;  %s8061_s4 = inlined_call_operand.vmem [shape: f32[1,64], index: 4, kind: input, shape index: {}]   ;;  %s8062_s5 = inlined_call_operand.vmem [shape: bf16[576,128], index: 5, kind: input, shape index: {}]   ;;  %s8063_s6 = inlined_call_operand.vmem [shape: f32[1,128], index: 6, kind: input, shape index: {}]   ;;  %s8064_s7 = inlined_call_operand.vmem [shape: bf16[1152,256], index: 7, kind: input, shape index: {}]   ;;  %s8065_s8 = inlined_call_operand.vmem [shape: f32[1,256], index: 8, kind: input, shape index: {}]   ;;  %s8066_s9 = inlined_call_operand.vmem [shape: bf16[256,128], index: 9, kind: input, shape index: {}]   ;;  %s8067_s10 = inlined_call_operand.vmem [shape: f32[1,128], index: 10, kind: input, shape index: {}]   ;;  %s8068_s11 = inlined_call_operand.hbm [shape: f32[2,1,128], index: 11, kind: output, shape index: {}]  }
   0x1   :  { %8069 = sst [smem:[#allocation8_spill]] %s8057_s0 }
   0x2   :  { %8070 = sst [smem:[#allocation9_spill]] %s8058_s1 }
   0x3   :  { %16 = vsyncpa [#allocation6], 0 }
   0x4   :  { %18 = vsyncpa [#allocation6 + $0x1], 0  ;;  %s6332_s17 = smov 0   ;;  %s6334_s18 = smov 0  }
   0x5   :  { %s6336_s19 = smov 0   ;;  %s6338_s20 = smov 0  }
   0x6 LB: > { %s6353_s21 = sadd.s32 4294967295, %s6266_s20   ;;  %s4659_s22 = sadd.s32 4294967294, %s6266_s20   ;;  %s6266_s20 = sphi %s6338_s20, %s8078_s20   ;;  %s6262_s19 = sphi %s6336_s19, %s8077_s19   ;;  %s6258_s18 = sphi %s6334_s18, %s8076_s18   ;;  %s6254_s17 = sphi %s6332_s17, %s8075_s17  }
   0x7   : > { %s6357_s23 = sadd.s32 1, %s6266_s20   ;;  %s267_s24 = sadd.s32 1, %s6262_s19 }
   0x8   : > { %s264_s25 = ssub.s32 %s6266_s20, %s6357_s23  ;;  %p277_p0 = scmp.ne.s32.totalorder %s6262_s19, %s6258_s18 }
   0x9   : > { %p265_p1 = scmp.eq.s32.totalorder %s264_s25, 0  ;;  %p278_p2 = scmp.eq.s32.totalorder %s6353_s21, 1 }
   0xa   : > { %p283_p3 = scmp.ne.s32.totalorder %s6258_s18, %s6254_s17  ;;  %p284_p4 = scmp.eq.s32.totalorder %s4659_s22, 1 }
   0xb   : > { %s6368_s26 = scalar_select %p265_p1, %s6262_s19, %s267_s24  }
   0xc   : > { %p6370_p5 = por %p278_p2, %p277_p0  ;;  %p6374_p6 = por %p284_p4, %p283_p3 }
   0xd   : > { %p4662_p7 = scmp.ge.s32.totalorder %s6266_s20, 1  ;;  %p340_p8 = scmp.lt.s32.totalorder %s6266_s20, 3 }
   0xf   : > { %p341_p9 = pnand %p4662_p7, %p340_p8 }
  0x10   : > { %s8073_s1 = sld [smem:[#allocation9_spill]] (!%p341_p9)  ;;  %p379_p10 = scmp.lt.s32.totalorder (!%p341_p9), %s6353_s21, 1 }
  0x11   : > { %344 = sbr.rel (%p341_p9) target bundleno = 1475 (0x5c3), region = 64  ;;  %s8074_s0 = sld [smem:[#allocation8_spill]] (!%p341_p9) }
  0x12   : > { %s6269_s30 = smov (!%p341_p9), 64   ;;  %s6270_s16 = smov (!%p341_p9), 32  }
  0x13   : > { %s6271_s22 = smov (!%p341_p9), 96   ;;  %s6224_s25 = scalar_lea.hbm (!%p341_p9), %s8068_s11, 2 }
  0x16   : > { %v5802_v0 = vld [vmem:[%s8073_s1 + $0x8] sm:$0xff]  ;;  %v5801_v1 = vld [vmem:[%s8073_s1] sm:$0xff]  ;;  %s380_s14 = scalar_select %p379_p10, %s6353_s21, 1  ;;  %vm517_vm0 = vcmask 261120   ;;  %vm1488_vm1 = vcmask 254976   ;;  %v6268_v15 = vmov 0.0  }
  0x17   : > { %572 = vmatpush.bf16.msra.mxu0 %v5802_v0  ;;  %v6414_v12 = vld [vmem:[%s8059_s2] ss:$0 sm:$0xff]  ;;  %1487 = vst.msk [vmem:[#allocation2] sm:$0xff] %vm517_vm0, %v6268_v15  ;;  %vm1493_vm2 = vcmask 253952   ;;  %vm1642_vm3 = vcmask 1041409   ;;  %vm1644_vm4 = vcmask 1042434  }
  0x18   : > { %s5784_s15 = sshll.u32 %s380_s14, 7  ;;  %1489 = vst.msk [vmem:[#allocation2 + $0x8] sm:$0x3] %vm1488_vm1, %v6268_v15  ;;  %vm1646_vm5 = vcmask 1043459   ;;  %vm1648_vm6 = vcmask 1044484   ;;  %vm1650_vm7 = vcmask 1045509  }
  0x19   : > { %s6391_s24 = scalar_lea.vmem %s8074_s0, %s5784_s15  ;;  %1492 = vst.msk [vmem:[#allocation2 + $0x98] sm:$0x3] %vm1488_vm1, %v6268_v15  ;;  %vm1652_vm8 = vcmask 1046534   ;;  %vm1654_vm9 = vcmask 1047559   ;;  %vm1995_vm10 = vcmask 523264   ;;  %vm2004_vm11 = vcmask 785408  }
  0x1a   : > { %v5785_v2 = vld [vmem:[%s6391_s24] sm:$0xff]  ;;  %v5786_v3 = vld [vmem:[%s6391_s24 + $0x8] sm:$0xff]  ;;  %v5787_v4 = vld [vmem:[%s6391_s24 + $0x10] sm:$0xff]  ;;  %1494 = vst.msk [vmem:[#allocation2] sm:$0x1] %vm1493_vm2, %v6268_v15  ;;  %vm2504_vm12 = vcmask 521216  }
  0x1b   : > { %573 = vmatpush.bf16.msra.mxu0 %v5801_v1  ;;  %v5788_v5 = vld [vmem:[%s6391_s24 + $0x18] sm:$0xff]  ;;  %v5789_v6 = vld [vmem:[%s6391_s24 + $0x20] sm:$0xff]  ;;  %v5790_v7 = vld [vmem:[%s6391_s24 + $0x28] sm:$0xff]  ;;  %1504 = vst.msk [vmem:[#allocation2 + $0x9] sm:$0x1] %vm1493_vm2, %v6268_v15  ;;  %vm2508_vm13 = vcmask 516096  }
  0x1c   : > { %v5791_v8 = vld [vmem:[%s6391_s24 + $0x30] sm:$0xff]  ;;  %v5792_v9 = vld [vmem:[%s6391_s24 + $0x38] sm:$0xff]  ;;  %v5793_v10 = vld [vmem:[%s6391_s24 + $0x40] sm:$0xff]  ;;  %1505 = vst.msk [vmem:[#allocation2 + $0x19] sm:$0x1] %vm1493_vm2, %v6268_v15  ;;  %vm2570_vm14 = vcmask 519168  }
  0x1d   : > { %v5794_v17 = vld [vmem:[%s6391_s24 + $0x48] sm:$0xff]  ;;  %1491 = vst.msk [vmem:[#allocation2 + $0x90] sm:$0xff] %vm517_vm0, %v6268_v15  ;;  %vm4416_vm15 = vcmask 1043456   ;;  %s377_s15 = sand.u32 1, %s6258_s18  }
  0x1e   : > { %4737 = vmatmul.msk.bf16.vlgmr.msra.gmra.mxu0 %vm517_vm0, %v5785_v2  ;;  %1495 = vst.msk [vmem:[#allocation2 + $0x10] sm:$0x1] %vm1493_vm2, %v6268_v15  ;;  %v5795_v2 = vld [vmem:[%s6391_s24 + $0x50] sm:$0xff]  ;;  %s378_s12 = scalar_lea.vmem [#allocation5], %s377_s15 }
  0x1f   : > { %1496 = vst.msk [vmem:[#allocation2 + $0x20] sm:$0x1] %vm1493_vm2, %v6268_v15  ;;  %s4602_s13 = sshll.u32 %s378_s12, 4  ;;  %s4603_s13 = int_to_ptr.vmem [resolvable:$true] %s4602_s13 }
  0x20   : > { %1497 = vst.msk [vmem:[#allocation2 + $0x30] sm:$0x1] %vm1493_vm2, %v6268_v15 }
  0x21   : > { %1498 = vst.msk [vmem:[#allocation2 + $0x40] sm:$0x1] %vm1493_vm2, %v6268_v15 }
  0x22   : > { %1499 = vst.msk [vmem:[#allocation2 + $0x50] sm:$0x1] %vm1493_vm2, %v6268_v15 }
  0x23   : > { %1500 = vst.msk [vmem:[#allocation2 + $0x60] sm:$0x1] %vm1493_vm2, %v6268_v15 }
  0x24   : > { %1501 = vst.msk [vmem:[#allocation2 + $0x70] sm:$0x1] %vm1493_vm2, %v6268_v15 }
  0x25   : > { %1502 = vst.msk [vmem:[#allocation2 + $0x80] sm:$0x1] %vm1493_vm2, %v6268_v15 }
  0x26   : > { %1506 = vst.msk [vmem:[#allocation2 + $0x29] sm:$0x1] %vm1493_vm2, %v6268_v15 }
  0x27   : > { %1507 = vst.msk [vmem:[#allocation2 + $0x39] sm:$0x1] %vm1493_vm2, %v6268_v15 }
  0x28   : > { %1508 = vst.msk [vmem:[#allocation2 + $0x49] sm:$0x1] %vm1493_vm2, %v6268_v15 }
  0x29   : > { %1509 = vst.msk [vmem:[#allocation2 + $0x59] sm:$0x1] %vm1493_vm2, %v6268_v15 }
  0x2a   : > { %1510 = vst.msk [vmem:[#allocation2 + $0x69] sm:$0x1] %vm1493_vm2, %v6268_v15 }
  0x2b   : > { %1511 = vst.msk [vmem:[#allocation2 + $0x79] sm:$0x1] %vm1493_vm2, %v6268_v15 }
  0x2c   : > { %1512 = vst.msk [vmem:[#allocation2 + $0x89] sm:$0x1] %vm1493_vm2, %v6268_v15 }
  0x2d   : > { %1513 = vst.msk [vmem:[#allocation2 + $0x99] sm:$0x1] %vm1493_vm2, %v6268_v15 }
  0x2e   : > { %4738 = vmatmul.msk.bf16.gmra.mxu0 %vm517_vm0, %v5786_v3  ;;  %3193 = vst [vmem:[#allocation4] sm:$0xf] %v6268_v15 }
  0x2f   : > { %3195 = vst [vmem:[#allocation4 + $0xc] sm:$0xf] %v6268_v15 }
  0x30   : > { %3197 = vst [vmem:[#allocation4 + $0x4] sm:$0x1] %v6268_v15 }
  0x31   : > { %3198 = vst [vmem:[#allocation4 + $0x8] sm:$0x1] %v6268_v15 }
  0x32   : > { %3201 = vst [vmem:[#allocation4 + $0x7] sm:$0x1] %v6268_v15 }
  0x33   : > { %3202 = vst [vmem:[#allocation4 + $0xb] sm:$0x1] %v6268_v15 }
  0x34   : > { %1503 = vst.msk [vmem:[#allocation2 + $0x90] sm:$0x1] %vm1493_vm2, %v6268_v15 }
  0x35   : > { %3196 = vst [vmem:[#allocation4] sm:$0x1] %v6268_v15 }
  0x36   : > { %3199 = vst [vmem:[#allocation4 + $0xc] sm:$0x1] %v6268_v15 }
  0x37   : > { %3200 = vst [vmem:[#allocation4 + $0x3] sm:$0x1] %v6268_v15 }
  0x38   : > { %3203 = vst [vmem:[#allocation4 + $0xf] sm:$0x1] %v6268_v15 }
  0x39   : > { %2505 = vst.msk [vmem:[#allocation3] sm:$0x3f] %vm2504_vm12, %v6268_v15 }
  0x3a   : > { %2507 = vst.msk [vmem:[#allocation3 + $0x28] sm:$0x3f] %vm2504_vm12, %v6268_v15 }
  0x3b   : > { %2509 = vst.msk [vmem:[#allocation3] sm:$0x1] %vm2508_vm13, %v6268_v15 }
  0x3c   : > { %2510 = vst.msk [vmem:[#allocation3 + $0x8] sm:$0x1] %vm2508_vm13, %v6268_v15 }
  0x3d   : > { %2514 = vst.msk [vmem:[#allocation3 + $0x28] sm:$0x1] %vm2508_vm13, %v6268_v15 }
  0x3e   : > { %4739 = vmatmul.msk.bf16.gmra.mxu0 %vm517_vm0, %v5787_v4  ;;  %2515 = vst.msk [vmem:[#allocation3 + $0x5] sm:$0x1] %vm2508_vm13, %v6268_v15 }
  0x3f   : > { %2516 = vst.msk [vmem:[#allocation3 + $0xd] sm:$0x1] %vm2508_vm13, %v6268_v15 }
  0x40   : > { %2520 = vst.msk [vmem:[#allocation3 + $0x2d] sm:$0x1] %vm2508_vm13, %v6268_v15 }
  0x41   : > { %2511 = vst.msk [vmem:[#allocation3 + $0x10] sm:$0x1] %vm2508_vm13, %v6268_v15 }
  0x42   : > { %2512 = vst.msk [vmem:[#allocation3 + $0x18] sm:$0x1] %vm2508_vm13, %v6268_v15 }
  0x43   : > { %2513 = vst.msk [vmem:[#allocation3 + $0x20] sm:$0x1] %vm2508_vm13, %v6268_v15 }
  0x44   : > { %2517 = vst.msk [vmem:[#allocation3 + $0x15] sm:$0x1] %vm2508_vm13, %v6268_v15 }
  0x45   : > { %2518 = vst.msk [vmem:[#allocation3 + $0x1d] sm:$0x1] %vm2508_vm13, %v6268_v15 }
  0x46   : > { %2519 = vst.msk [vmem:[#allocation3 + $0x25] sm:$0x1] %vm2508_vm13, %v6268_v15 }
  0x4e   : > { %4740 = vmatmul.msk.bf16.gmra.mxu0 %vm517_vm0, %v5788_v5 }
  0x5e   : > { %4741 = vmatmul.msk.bf16.gmra.mxu0 %vm517_vm0, %v5789_v6 }
  0x6e   : > { %4742 = vmatmul.msk.bf16.gmra.mxu0 %vm517_vm0, %v5790_v7 }
  0x7e   : > { %4743 = vmatmul.msk.bf16.gmra.mxu0 %vm517_vm0, %v5791_v8 }
  0x8e   : > { %4744 = vmatmul.msk.bf16.gmra.mxu0 %vm517_vm0, %v5792_v9 }
  0x9b   : > { %v575_v11 = vpop.f32.mrf.mxu0 }
  0x9c   : > { %v576_v13 = vadd.f32 %v6414_v12, %v575_v11 }
  0x9e   : > { %4745 = vmatmul.msk.bf16.gmra.mxu0 %vm517_vm0, %v5793_v10  ;;  %v655_v16 = vmax.f32 %v576_v13, 0.0 }
  0xa0   : > { %v719_v18 = vrot.slane %v655_v16, 2  ;;  %v720_v19 = vrot.slane %v655_v16, 4  ;;  %v721_v23 = vrot.slane %v655_v16, 6  ;;  %v4753_v24 = vrot.slane %v655_v16, 9 }
  0xa2   : > { %v4754_v26 = vrot.slane %v719_v18, 9  ;;  %v4755_v27 = vrot.slane %v720_v19, 9  ;;  %v4756_v33 = vrot.slane %v721_v23, 9  ;;  %v1295_v34 = vmax.f32 %v655_v16, %v4753_v24 }
  0xa3   : > { %v577_v14 = vpop.f32.mrf.mxu0 }
  0xa4   : > { %v578_v20 = vadd.f32 %v6414_v12, %v577_v14  ;;  %v1296_v39 = vmax.f32 %v719_v18, %v4754_v26  ;;  %v1297_v40 = vmax.f32 %v720_v19, %v4755_v27  ;;  %v1298_v52 = vmax.f32 %v721_v23, %v4756_v33 }
  0xa6   : > { %v6437_v28 = vmax.f32 %v578_v20, 0.0 }
  0xa8   : > { %v722_v41 = vrot.slane %v6437_v28, 2  ;;  %v723_v42 = vrot.slane %v6437_v28, 4  ;;  %v724_v44 = vrot.slane %v6437_v28, 6  ;;  %v4757_v53 = vrot.slane %v6437_v28, 9 }
  0xaa   : > { %v4758_v54 = vrot.slane %v722_v41, 9  ;;  %v4759_v56 = vrot.slane %v723_v42, 9  ;;  %v4760_v57 = vrot.slane %v724_v44, 9  ;;  %v1299_v8 = vmax.f32 %v6437_v28, %v4757_v53 }
  0xab   : > { %v580_v21 = vpop.f32.mrf.mxu0 }
  0xac   : > { %v581_v22 = vadd.f32 %v6414_v12, %v580_v21  ;;  %v1300_v9 = vmax.f32 %v722_v41, %v4758_v54  ;;  %v1301_v10 = vmax.f32 %v723_v42, %v4759_v56  ;;  %v1302_v13 = vmax.f32 %v724_v44, %v4760_v57  ;;  %v1738_v41 = vld [vmem:[#allocation2 + $0x2] sm:$0xff] }
  0xae   : > { %v657_v25 = vmax.f32 %v581_v22, 0.0  ;;  %4746 = vmatmul.msk.bf16.gmra.mxu0 %vm517_vm0, %v5794_v17 }
  0xb0   : > { %v725_v29 = vrot.slane %v657_v25, 2  ;;  %v726_v30 = vrot.slane %v657_v25, 4  ;;  %v727_v31 = vrot.slane %v657_v25, 6  ;;  %v4761_v32 = vrot.slane %v657_v25, 9 }
  0xb2   : > { %v4762_v35 = vrot.slane %v725_v29, 9  ;;  %v4763_v36 = vrot.slane %v726_v30, 9  ;;  %v4764_v37 = vrot.slane %v727_v31, 9  ;;  %v1303_v38 = vmax.f32 %v657_v25, %v4761_v32 }
  0xb3   : > { %v582_v43 = vpop.f32.mrf.mxu0 }
  0xb4   : > { %v1304_v45 = vmax.f32 %v725_v29, %v4762_v35  ;;  %v1305_v46 = vmax.f32 %v726_v30, %v4763_v36  ;;  %v1423_v47 = vmax.f32 %v1295_v34, %v1303_v38  ;;  %v583_v48 = vadd.f32 %v6414_v12, %v582_v43  ;;  %v5796_v36 = vld [vmem:[%s6391_s24 + $0x58] sm:$0xff] }
  0xb5   : > { %v1306_v49 = vmax.f32 %v727_v31, %v4764_v37 }
  0xb6   : > { %v1424_v50 = vmax.f32 %v1296_v39, %v1304_v45  ;;  %v1425_v51 = vmax.f32 %v1297_v40, %v1305_v46  ;;  %v658_v55 = vmax.f32 %v583_v48, 0.0  ;;  %v1578_v58 = vperm.slane %v1423_v47, 0 }
  0xb7   : > { %v1426_v0 = vmax.f32 %v1298_v52, %v1306_v49 }
  0xb8   : > { %v1579_v59 = vperm.slane %v1424_v50, 0  ;;  %v728_v60 = vrot.slane %v658_v55, 2  ;;  %v729_v61 = vrot.slane %v658_v55, 4  ;;  %v730_v62 = vrot.slane %v658_v55, 6 }
  0xb9   : > { %v4765_v63 = vrot.slane %v658_v55, 9  ;;  %v1580_v1 = vperm.slane %v1425_v51, 0  ;;  %v1581_v20 = vperm.slane %v1426_v0, 0 }
  0xba   : > { %v1643_v3 = vsel %vm1642_vm3, %v1579_v59, %v1578_v58  ;;  %v4766_v4 = vrot.slane %v728_v60, 9  ;;  %v4767_v5 = vrot.slane %v729_v61, 9  ;;  %v4768_v6 = vrot.slane %v730_v62, 9 }
  0xbb   : > { %v585_v7 = vpop.f32.mrf.mxu0  ;;  %v1307_v11 = vmax.f32 %v658_v55, %v4765_v63  ;;  %v1645_v18 = vsel %vm1644_vm4, %v1580_v1, %v1643_v3 }
  0xbc   : > { %v1308_v14 = vmax.f32 %v728_v60, %v4766_v4  ;;  %v1309_v16 = vmax.f32 %v729_v61, %v4767_v5  ;;  %v1310_v17 = vmax.f32 %v730_v62, %v4768_v6  ;;  %v1647_v25 = vsel %vm1646_vm5, %v1581_v20, %v1645_v18 }
  0xbd   : > { %v1427_v19 = vmax.f32 %v1299_v8, %v1307_v11  ;;  %v586_v31 = vadd.f32 %v6414_v12, %v585_v7 }
  0xbe   : > { %4747 = vmatmul.msk.bf16.gmra.mxu0 %vm517_vm0, %v5795_v2  ;;  %v1428_v21 = vmax.f32 %v1300_v9, %v1308_v14  ;;  %v1429_v22 = vmax.f32 %v1301_v10, %v1309_v16  ;;  %v1430_v23 = vmax.f32 %v1302_v13, %v1310_v17 }
  0xbf   : > { %v1582_v24 = vperm.slane %v1427_v19, 0  ;;  %v659_v35 = vmax.f32 %v586_v31, 0.0 }
  0xc0   : > { %v1583_v26 = vperm.slane %v1428_v21, 0  ;;  %v1584_v27 = vperm.slane %v1429_v22, 0  ;;  %v1585_v29 = vperm.slane %v1430_v23, 0 }
  0xc1   : > { %v1649_v28 = vsel %vm1648_vm6, %v1582_v24, %v1647_v25  ;;  %v731_v37 = vrot.slane %v659_v35, 2  ;;  %v732_v38 = vrot.slane %v659_v35, 4  ;;  %v733_v43 = vrot.slane %v659_v35, 6 }
  0xc2   : > { %v1651_v30 = vsel %vm1650_vm7, %v1583_v26, %v1649_v28  ;;  %v4769_v44 = vrot.slane %v659_v35, 9  ;;  %v5797_v26 = vld [vmem:[%s6391_s24 + $0x60] sm:$0xff] }
  0xc3   : > { %v587_v32 = vpop.f32.mrf.mxu0  ;;  %v1653_v33 = vsel %vm1652_vm8, %v1584_v27, %v1651_v30  ;;  %v4770_v48 = vrot.slane %v731_v37, 9  ;;  %v4771_v49 = vrot.slane %v732_v38, 9  ;;  %v4772_v55 = vrot.slane %v733_v43, 9 }
  0xc4   : > { %v1655_v34 = vsel %vm1654_vm9, %v1585_v29, %v1653_v33  ;;  %v588_v39 = vadd.f32 %v6414_v12, %v587_v32  ;;  %v1311_v56 = vmax.f32 %v659_v35, %v4769_v44 }
  0xc5   : > { %1714 = vst.msk [vmem:[#allocation2 + $0x11] sm:$0xff] %vm517_vm0, %v1655_v34  ;;  %v1312_v61 = vmax.f32 %v731_v37, %v4770_v48  ;;  %v1313_v62 = vmax.f32 %v732_v38, %v4771_v49  ;;  %v1314_v10 = vmax.f32 %v733_v43, %v4772_v55 }
  0xc6   : > { %v660_v50 = vmax.f32 %v588_v39, 0.0 }
  0xc8   : > { %v734_v63 = vrot.slane %v660_v50, 2  ;;  %v735_v0 = vrot.slane %v660_v50, 4  ;;  %v736_v2 = vrot.slane %v660_v50, 6  ;;  %v4773_v11 = vrot.slane %v660_v50, 9 }
  0xca   : > { %v4774_v13 = vrot.slane %v734_v63, 9  ;;  %v4775_v16 = vrot.slane %v735_v0, 9  ;;  %v4776_v17 = vrot.slane %v736_v2, 9  ;;  %v1315_v32 = vmax.f32 %v660_v50, %v4773_v11 }
  0xcb   : > { %v590_v40 = vpop.f32.mrf.mxu0 }
  0xcc   : > { %v591_v42 = vadd.f32 %v6414_v12, %v590_v40  ;;  %v6499_v45 = vld [vmem:[#allocation2 + $0x12] sm:$0xff]  ;;  %v1316_v33 = vmax.f32 %v734_v63, %v4774_v13  ;;  %v1317_v34 = vmax.f32 %v735_v0, %v4775_v16 }
  0xcd   : > { %v6080_v47 = vpack.i.bf16 %v6499_v45, %v1738_v41 }
  0xce   : > { %v661_v46 = vmax.f32 %v591_v42, 0.0  ;;  %4748 = vmatmul.msk.bf16.gmra.mxu0 %vm517_vm0, %v5796_v36  ;;  %v1318_v36 = vmax.f32 %v736_v2, %v4776_v17  ;;  %v5819_v2 = vld [vmem:[%s8060_s3 + $0x80] sm:$0xff] }
  0xcf   : > { %6081 = vrot.lane.b32.xlu2 %v6080_v47, %s6269_s30 }
  0xd0   : > { %v737_v51 = vrot.slane %v661_v46, 2  ;;  %v738_v52 = vrot.slane %v661_v46, 4  ;;  %v739_v53 = vrot.slane %v661_v46, 6  ;;  %v4777_v54 = vrot.slane %v661_v46, 9 }
  0xd2   : > { %v4778_v57 = vrot.slane %v737_v51, 9  ;;  %v4779_v58 = vrot.slane %v738_v52, 9  ;;  %v4780_v59 = vrot.slane %v739_v53, 9  ;;  %v1319_v60 = vmax.f32 %v661_v46, %v4777_v54 }
  0xd3   : > { %v592_v1 = vpop.f32.mrf.mxu0 }
  0xd4   : > { %v1320_v3 = vmax.f32 %v737_v51, %v4778_v57  ;;  %v1321_v4 = vmax.f32 %v738_v52, %v4779_v58  ;;  %v1431_v5 = vmax.f32 %v1311_v56, %v1319_v60  ;;  %v593_v6 = vadd.f32 %v6414_v12, %v592_v1  ;;  %v5798_v60 = vld [vmem:[%s6391_s24 + $0x68] sm:$0xff] }
  0xd5   : > { %v1322_v7 = vmax.f32 %v739_v53, %v4780_v59  ;;  %v5820_v59 = vld [vmem:[%s8060_s3 + $0x88] sm:$0xff] }
  0xd6   : > { %v1432_v8 = vmax.f32 %v1312_v61, %v1320_v3  ;;  %v1433_v9 = vmax.f32 %v1313_v62, %v1321_v4  ;;  %v662_v14 = vmax.f32 %v593_v6, 0.0  ;;  %v1586_v18 = vperm.slane %v1431_v5, 0  ;;  %2273 = vmatpush.bf16.msra.mxu3 %v5820_v59  ;;  %v1746_v6 = vld [vmem:[#allocation2 + $0x10] sm:$0xff] }
  0xd7   : > { %v1434_v24 = vmax.f32 %v1314_v10, %v1322_v7 }
  0xd8   : > { %v1587_v19 = vperm.slane %v1432_v8, 0  ;;  %v740_v20 = vrot.slane %v662_v14, 2  ;;  %v741_v21 = vrot.slane %v662_v14, 4  ;;  %v742_v22 = vrot.slane %v662_v14, 6 }
  0xd9   : > { %v4781_v23 = vrot.slane %v662_v14, 9  ;;  %v1588_v25 = vperm.slane %v1433_v9, 0  ;;  %v1589_v42 = vperm.slane %v1434_v24, 0 }
  0xda   : > { %v1656_v27 = vsel %vm1642_vm3, %v1587_v19, %v1586_v18  ;;  %v4782_v28 = vrot.slane %v740_v20, 9  ;;  %v4783_v29 = vrot.slane %v741_v21, 9  ;;  %v4784_v30 = vrot.slane %v742_v22, 9  ;;  %2274 = vmatpush.bf16.msra.mxu3 %v5819_v2 }
  0xdb   : > { %v595_v31 = vpop.f32.mrf.mxu0  ;;  %v1323_v35 = vmax.f32 %v662_v14, %v4781_v23  ;;  %v1657_v40 = vsel %vm1644_vm4, %v1588_v25, %v1656_v27 }
  0xdc   : > { %v1324_v37 = vmax.f32 %v740_v20, %v4782_v28  ;;  %v1325_v38 = vmax.f32 %v741_v21, %v4783_v29  ;;  %v1326_v39 = vmax.f32 %v742_v22, %v4784_v30  ;;  %v1658_v48 = vsel %vm1646_vm5, %v1589_v42, %v1657_v40 }
  0xdd   : > { %v1435_v41 = vmax.f32 %v1315_v32, %v1323_v35  ;;  %v596_v54 = vadd.f32 %v6414_v12, %v595_v31 }
  0xde   : > { %4749 = vmatmul.msk.bf16.gmra.mxu0 %vm517_vm0, %v5797_v26  ;;  %v1436_v43 = vmax.f32 %v1316_v33, %v1324_v37  ;;  %v1437_v44 = vmax.f32 %v1317_v34, %v1325_v38  ;;  %v1438_v46 = vmax.f32 %v1318_v36, %v1326_v39 }
  0xdf   : > { %v1590_v47 = vperm.slane %v1435_v41, 0  ;;  %v663_v58 = vmax.f32 %v596_v54, 0.0 }
  0xe0   : > { %v1591_v49 = vperm.slane %v1436_v43, 0  ;;  %v1592_v50 = vperm.slane %v1437_v44, 0  ;;  %v1593_v52 = vperm.slane %v1438_v46, 0 }
  0xe1   : > { %v1659_v51 = vsel %vm1648_vm6, %v1590_v47, %v1658_v48  ;;  %v743_v61 = vrot.slane %v663_v58, 2  ;;  %v744_v62 = vrot.slane %v663_v58, 4  ;;  %v745_v3 = vrot.slane %v663_v58, 6 }
  0xe2   : > { %v1660_v53 = vsel %vm1650_vm7, %v1591_v49, %v1659_v51  ;;  %v4785_v4 = vrot.slane %v663_v58, 9 }
  0xe3   : > { %v597_v55 = vpop.f32.mrf.mxu0  ;;  %v1661_v56 = vsel %vm1652_vm8, %v1592_v50, %v1660_v53  ;;  %v4786_v11 = vrot.slane %v743_v61, 9  ;;  %v4787_v13 = vrot.slane %v744_v62, 9  ;;  %v4788_v20 = vrot.slane %v745_v3, 9  ;;  %v5799_v53 = vld [vmem:[%s6391_s24 + $0x70] sm:$0xff] }
  0xe4   : > { %v1662_v57 = vsel %vm1654_vm9, %v1593_v52, %v1661_v56  ;;  %v598_v63 = vadd.f32 %v6414_v12, %v597_v55  ;;  %v1327_v21 = vmax.f32 %v663_v58, %v4785_v4 }
  0xe5   : > { %1715 = vst.msk [vmem:[#allocation2 + $0x21] sm:$0xff] %vm517_vm0, %v1662_v57  ;;  %v1328_v25 = vmax.f32 %v743_v61, %v4786_v11  ;;  %v1329_v26 = vmax.f32 %v744_v62, %v4787_v13  ;;  %v1330_v38 = vmax.f32 %v745_v3, %v4788_v20 }
  0xe6   : > { %v664_v14 = vmax.f32 %v598_v63, 0.0 }
  0xe8   : > { %v746_v27 = vrot.slane %v664_v14, 2  ;;  %v747_v28 = vrot.slane %v664_v14, 4  ;;  %v748_v30 = vrot.slane %v664_v14, 6  ;;  %v4789_v39 = vrot.slane %v664_v14, 9 }
  0xea   : > { %v4790_v40 = vrot.slane %v746_v27, 9  ;;  %v4791_v42 = vrot.slane %v747_v28, 9  ;;  %v4792_v43 = vrot.slane %v748_v30, 9  ;;  %v1331_v59 = vmax.f32 %v664_v14, %v4789_v39 }
  0xeb   : > { %v600_v0 = vpop.f32.mrf.mxu0 }
  0xec   : > { %v601_v1 = vadd.f32 %v6414_v12, %v600_v0  ;;  %v6525_v5 = vld [vmem:[#allocation2 + $0x22] sm:$0xff]  ;;  %v1333_v61 = vmax.f32 %v747_v28, %v4791_v42  ;;  %v1334_v63 = vmax.f32 %v748_v30, %v4792_v43 }
  0xed   : > { %v6527_v7 = vld [vmem:[#allocation2 + $0x20] sm:$0xff]  ;;  %v6060_v9 = vpack.i.bf16 %v6525_v5, %v6499_v45 }
  0xee   : > { %v665_v8 = vmax.f32 %v601_v1, 0.0  ;;  %4750 = vmatmul.msk.bf16.gmra.mxu0 %vm517_vm0, %v5798_v60  ;;  %v6085_v10 = vpack.i.bf16 %v6527_v7, %v1746_v6  ;;  %v1332_v60 = vmax.f32 %v746_v27, %v4790_v40  ;;  %v6550_v30 = vld [vmem:[#allocation2 + $0x21] sm:$0xff] }
  0xef   : > { %6061 = vrot.lane.b32.xlu0 %v6060_v9, %s6270_s16 }
  0xf0   : > { %v749_v16 = vrot.slane %v665_v8, 2  ;;  %v750_v17 = vrot.slane %v665_v8, 4  ;;  %v751_v18 = vrot.slane %v665_v8, 6  ;;  %v4793_v19 = vrot.slane %v665_v8, 9  ;;  %6086 = vrot.lane.b32.xlu2 %v6085_v10, %s6271_s22 }
  0xf2   : > { %v4794_v22 = vrot.slane %v749_v16, 9  ;;  %v4795_v45 = vrot.slane %v750_v17, 9  ;;  %v4796_v23 = vrot.slane %v751_v18, 9  ;;  %v1335_v24 = vmax.f32 %v665_v8, %v4793_v19 }
  0xf3   : > { %v602_v29 = vpop.f32.mrf.mxu0 }
  0xf4   : > { %v1336_v31 = vmax.f32 %v749_v16, %v4794_v22  ;;  %v1337_v32 = vmax.f32 %v750_v17, %v4795_v45  ;;  %v1439_v33 = vmax.f32 %v1327_v21, %v1335_v24  ;;  %v603_v34 = vadd.f32 %v6414_v12, %v602_v29  ;;  %v5800_v24 = vld [vmem:[%s6391_s24 + $0x78] sm:$0xff] }
  0xf5   : > { %v1338_v35 = vmax.f32 %v751_v18, %v4796_v23 }
  0xf6   : > { %v1440_v36 = vmax.f32 %v1328_v25, %v1336_v31  ;;  %v1441_v37 = vmax.f32 %v1329_v26, %v1337_v32  ;;  %v666_v41 = vmax.f32 %v603_v34, 0.0  ;;  %v1594_v44 = vperm.slane %v1439_v33, 0 }
  0xf7   : > { %v1442_v51 = vmax.f32 %v1330_v38, %v1338_v35 }
  0xf8   : > { %v1595_v46 = vperm.slane %v1440_v36, 0  ;;  %v752_v47 = vrot.slane %v666_v41, 2  ;;  %v753_v48 = vrot.slane %v666_v41, 4  ;;  %v754_v49 = vrot.slane %v666_v41, 6 }
  0xf9   : > { %v4797_v50 = vrot.slane %v666_v41, 9  ;;  %v1596_v52 = vperm.slane %v1441_v37, 0  ;;  %v1597_v6 = vperm.slane %v1442_v51, 0 }
  0xfa   : > { %v1663_v54 = vsel %vm1642_vm3, %v1595_v46, %v1594_v44  ;;  %v4798_v55 = vrot.slane %v752_v47, 9  ;;  %v4799_v56 = vrot.slane %v753_v48, 9  ;;  %v4800_v57 = vrot.slane %v754_v49, 9 }
  0xfb   : > { %v605_v58 = vpop.f32.mrf.mxu0  ;;  %v1339_v62 = vmax.f32 %v666_v41, %v4797_v50  ;;  %v1664_v3 = vsel %vm1644_vm4, %v1596_v52, %v1663_v54 }
  0xfc   : > { %v1340_v0 = vmax.f32 %v752_v47, %v4798_v55  ;;  %v1341_v1 = vmax.f32 %v753_v48, %v4799_v56  ;;  %v1342_v2 = vmax.f32 %v754_v49, %v4800_v57  ;;  %v1665_v13 = vsel %vm1646_vm5, %v1597_v6, %v1664_v3 }
  0xfd   : > { %v1443_v4 = vmax.f32 %v1331_v59, %v1339_v62  ;;  %v606_v20 = vadd.f32 %v6414_v12, %v605_v58  ;;  %v1730_v59 = vld [vmem:[#allocation2 + $0x1] sm:$0xff] }
  0xfe   : > { %4751 = vmatmul.msk.bf16.gmra.mxu0 %vm517_vm0, %v5799_v53  ;;  %v1444_v8 = vmax.f32 %v1332_v60, %v1340_v0  ;;  %v1445_v9 = vmax.f32 %v1333_v61, %v1341_v1  ;;  %v1446_v10 = vmax.f32 %v1334_v63, %v1342_v2  ;;  %v6570_v60 = vld [vmem:[#allocation2 + $0x11] sm:$0xff] }
  0xff   : > { %v1598_v11 = vperm.slane %v1443_v4, 0  ;;  %v667_v23 = vmax.f32 %v606_v20, 0.0  ;;  %v6075_v6 = vpack.i.bf16 %v6570_v60, %v1730_v59 }
 0x100   : > { %v1599_v14 = vperm.slane %v1444_v8, 0  ;;  %v1600_v16 = vperm.slane %v1445_v9, 0  ;;  %v1601_v18 = vperm.slane %v1446_v10, 0 }
 0x101   : > { %v1666_v17 = vsel %vm1648_vm6, %v1598_v11, %v1665_v13  ;;  %v755_v25 = vrot.slane %v667_v23, 2  ;;  %v756_v26 = vrot.slane %v667_v23, 4  ;;  %v757_v31 = vrot.slane %v667_v23, 6 }
 0x102   : > { %v1667_v19 = vsel %vm1650_vm7, %v1599_v14, %v1666_v17  ;;  %v4801_v32 = vrot.slane %v667_v23, 9 }
 0x103   : > { %v607_v21 = vpop.f32.mrf.mxu0  ;;  %v1668_v22 = vsel %vm1652_vm8, %v1600_v16, %v1667_v19  ;;  %v4802_v40 = vrot.slane %v755_v25, 9  ;;  %v4803_v41 = vrot.slane %v756_v26, 9  ;;  %v4804_v49 = vrot.slane %v757_v31, 9 }
 0x104   : > { %v1669_v45 = vsel %vm1654_vm9, %v1601_v18, %v1668_v22  ;;  %v608_v27 = vadd.f32 %v6414_v12, %v607_v21  ;;  %v1343_v50 = vmax.f32 %v667_v23, %v4801_v32 }
 0x105   : > { %1716 = vst.msk [vmem:[#allocation2 + $0x31] sm:$0xff] %vm517_vm0, %v1669_v45  ;;  %v1344_v54 = vmax.f32 %v755_v25, %v4802_v40  ;;  %v1345_v55 = vmax.f32 %v756_v26, %v4803_v41  ;;  %v1346_v8 = vmax.f32 %v757_v31, %v4804_v49 }
 0x106   : > { %v668_v42 = vmax.f32 %v608_v27, 0.0 }
 0x108   : > { %v758_v56 = vrot.slane %v668_v42, 2  ;;  %v759_v57 = vrot.slane %v668_v42, 4  ;;  %v760_v61 = vrot.slane %v668_v42, 6  ;;  %v4805_v9 = vrot.slane %v668_v42, 9 }
 0x10a   : > { %v4806_v10 = vrot.slane %v758_v56, 9  ;;  %v4807_v13 = vrot.slane %v759_v57, 9  ;;  %v4808_v14 = vrot.slane %v760_v61, 9 }
 0x10b   : > { %v610_v28 = vpop.f32.mrf.mxu0 }
 0x10c   : > { %v611_v29 = vadd.f32 %v6414_v12, %v610_v28  ;;  %v6552_v33 = vld [vmem:[#allocation2 + $0x32] sm:$0xff]  ;;  %v1347_v28 = vmax.f32 %v668_v42, %v4805_v9  ;;  %v1349_v31 = vmax.f32 %v759_v57, %v4807_v13 }
 0x10d   : > { %v1780_v34 = vld [vmem:[#allocation2 + $0x31] sm:$0xff]  ;;  %v2039_v37 = vpack.c.bf16 %v6552_v33, %v6525_v5  ;;  %v6105_v43 = vpack.i.bf16 %v6552_v33, %v6525_v5 }
 0x10e   : > { %v6554_v35 = vld [vmem:[#allocation2 + $0x30] sm:$0xff]  ;;  %v669_v36 = vmax.f32 %v611_v29, 0.0  ;;  %4752 = vmatmul.msk.bf16.gmra.mxu0 %vm517_vm0, %v5800_v24  ;;  %v6560_v38 = vpack.i.bf16 %v1780_v34, %v6550_v30  ;;  %v1348_v29 = vmax.f32 %v758_v56, %v4806_v10  ;;  %v1350_v34 = vmax.f32 %v760_v61, %v4808_v14 }
 0x10f   : > { %v6065_v39 = vpack.i.bf16 %v6554_v35, %v6527_v7  ;;  %4953 = vmatmul.msk.bf16.vlgmr.msra.gmra.mxu3 %vm517_vm0, %v2039_v37 }
 0x110   : > { %v761_v44 = vrot.slane %v669_v36, 2  ;;  %v762_v46 = vrot.slane %v669_v36, 4  ;;  %v763_v47 = vrot.slane %v669_v36, 6  ;;  %v4809_v48 = vrot.slane %v669_v36, 9  ;;  %6071 = vrot.lane.b32.xlu1 %v6560_v38, %s6271_s22 }
 0x111   : > { %6066 = vrot.lane.b32.xlu0 %v6065_v39, %s6269_s30 }
 0x112   : > { %v4810_v7 = vrot.slane %v761_v44, 9  ;;  %v4811_v51 = vrot.slane %v762_v46, 9  ;;  %v4812_v52 = vrot.slane %v763_v47, 9  ;;  %v1351_v53 = vmax.f32 %v669_v36, %v4809_v48 }
 0x113   : > { %v612_v58 = vpop.f32.mrf.mxu0 }
 0x114   : > { %v1352_v62 = vmax.f32 %v761_v44, %v4810_v7  ;;  %v1353_v63 = vmax.f32 %v762_v46, %v4811_v51  ;;  %v1447_v0 = vmax.f32 %v1343_v50, %v1351_v53  ;;  %v613_v1 = vadd.f32 %v6414_v12, %v612_v58 }
 0x115   : > { %v1354_v2 = vmax.f32 %v763_v47, %v4812_v52 }
 0x116   : > { %v1448_v3 = vmax.f32 %v1344_v54, %v1352_v62  ;;  %v1449_v4 = vmax.f32 %v1345_v55, %v1353_v63  ;;  %v670_v11 = vmax.f32 %v613_v1, 0.0  ;;  %v1602_v16 = vperm.slane %v1447_v0, 0 }
 0x117   : > { %v1450_v22 = vmax.f32 %v1346_v8, %v1354_v2 }
 0x118   : > { %v1603_v17 = vperm.slane %v1448_v3, 0  ;;  %6076 = vrot.lane.b32.xlu1 %v6075_v6, %s6270_s16  ;;  %v764_v18 = vrot.slane %v670_v11, 2  ;;  %v765_v19 = vrot.slane %v670_v11, 4  ;;  %v766_v20 = vrot.slane %v670_v11, 6 }
 0x119   : > { %v4813_v21 = vrot.slane %v670_v11, 9  ;;  %v1604_v45 = vperm.slane %v1449_v4, 0  ;;  %v1605_v44 = vperm.slane %v1450_v22, 0 }
 0x11a   : > { %v1670_v23 = vsel %vm1642_vm3, %v1603_v17, %v1602_v16  ;;  %v4814_v24 = vrot.slane %v764_v18, 9  ;;  %v4815_v25 = vrot.slane %v765_v19, 9  ;;  %v4816_v26 = vrot.slane %v766_v20, 9 }
 0x11b   : > { %v615_v27 = vpop.f32.mrf.mxu0  ;;  %v1355_v32 = vmax.f32 %v670_v11, %v4813_v21  ;;  %v1671_v40 = vsel %vm1644_vm4, %v1604_v45, %v1670_v23 }
 0x11c   : > { %v1356_v36 = vmax.f32 %v764_v18, %v4814_v24  ;;  %v1357_v37 = vmax.f32 %v765_v19, %v4815_v25  ;;  %v1358_v39 = vmax.f32 %v766_v20, %v4816_v26  ;;  %v1672_v50 = vsel %vm1646_vm5, %v1605_v44, %v1671_v40 }
 0x11d   : > { %v1451_v41 = vmax.f32 %v1347_v28, %v1355_v32  ;;  %v616_v54 = vadd.f32 %v6414_v12, %v615_v27 }
 0x11e   : > { %v1452_v46 = vmax.f32 %v1348_v29, %v1356_v36  ;;  %v1453_v47 = vmax.f32 %v1349_v31, %v1357_v37  ;;  %v1454_v48 = vmax.f32 %v1350_v34, %v1358_v39 }
 0x11f   : > { %v1606_v49 = vperm.slane %v1451_v41, 0  ;;  %v671_v58 = vmax.f32 %v616_v54, 0.0 }
 0x120   : > { %v1607_v7 = vperm.slane %v1452_v46, 0  ;;  %v1608_v51 = vperm.slane %v1453_v47, 0  ;;  %v1609_v52 = vperm.slane %v1454_v48, 0 }
 0x121   : > { %v1673_v42 = vsel %vm1648_vm6, %v1606_v49, %v1672_v50  ;;  %v767_v59 = vrot.slane %v671_v58, 2  ;;  %v768_v61 = vrot.slane %v671_v58, 4  ;;  %v769_v1 = vrot.slane %v671_v58, 6 }
 0x122   : > { %v1674_v53 = vsel %vm1650_vm7, %v1607_v7, %v1673_v42  ;;  %v4817_v2 = vrot.slane %v671_v58, 9 }
 0x123   : > { %v617_v55 = vpop.f32.mrf.mxu0  ;;  %v1675_v56 = vsel %vm1652_vm8, %v1608_v51, %v1674_v53  ;;  %v4818_v8 = vrot.slane %v767_v59, 9  ;;  %v4819_v9 = vrot.slane %v768_v61, 9  ;;  %v4820_v17 = vrot.slane %v769_v1, 9 }
 0x124   : > { %v1676_v57 = vsel %vm1654_vm9, %v1609_v52, %v1675_v56  ;;  %v618_v62 = vadd.f32 %v6414_v12, %v617_v55  ;;  %v1359_v18 = vmax.f32 %v671_v58, %v4817_v2 }
 0x125   : > { %1717 = vst.msk [vmem:[#allocation2 + $0x41] sm:$0xff] %vm517_vm0, %v1676_v57  ;;  %v1360_v45 = vmax.f32 %v767_v59, %v4818_v8  ;;  %v1361_v23 = vmax.f32 %v768_v61, %v4819_v9  ;;  %v1362_v39 = vmax.f32 %v769_v1, %v4820_v17 }
 0x126   : > { %v672_v10 = vmax.f32 %v618_v62, 0.0 }
 0x128   : > { %v770_v24 = vrot.slane %v672_v10, 2  ;;  %v771_v25 = vrot.slane %v672_v10, 4  ;;  %v772_v27 = vrot.slane %v672_v10, 6  ;;  %v4821_v40 = vrot.slane %v672_v10, 9 }
 0x12a   : > { %v4822_v41 = vrot.slane %v770_v24, 9  ;;  %v4823_v46 = vrot.slane %v771_v25, 9  ;;  %v4824_v47 = vrot.slane %v772_v27, 9  ;;  %v1363_v59 = vmax.f32 %v672_v10, %v4821_v40 }
 0x12b   : > { %v620_v63 = vpop.f32.mrf.mxu0 }
 0x12c   : > { %v621_v0 = vadd.f32 %v6414_v12, %v620_v63  ;;  %v6586_v3 = vld [vmem:[#allocation2 + $0x42] sm:$0xff]  ;;  %v1364_v61 = vmax.f32 %v770_v24, %v4822_v41  ;;  %v1365_v62 = vmax.f32 %v771_v25, %v4823_v46  ;;  %v5818_v25 = vld [vmem:[%s8060_s3 + $0x78] sm:$0xff] }
 0x12d   : > { %v6090_v6 = vpack.i.bf16 %v6586_v3, %v6552_v33  ;;  %2238 = vmatpush.bf16.msra.mxu2 %v5818_v25 }
 0x12e   : > { %v673_v4 = vmax.f32 %v621_v0, 0.0  ;;  %v1366_v0 = vmax.f32 %v772_v27, %v4824_v47 }
 0x12f   : > { %6091 = vrot.lane.b32.xlu0 %v6090_v6, %s6270_s16 }
 0x130   : > { %v773_v11 = vrot.slane %v673_v4, 2  ;;  %v774_v13 = vrot.slane %v673_v4, 4  ;;  %v775_v14 = vrot.slane %v673_v4, 6  ;;  %v4825_v16 = vrot.slane %v673_v4, 9 }
 0x132   : > { %v4826_v19 = vrot.slane %v773_v11, 9  ;;  %v4827_v20 = vrot.slane %v774_v13, 9  ;;  %v4828_v21 = vrot.slane %v775_v14, 9  ;;  %v1367_v22 = vmax.f32 %v673_v4, %v4825_v16 }
 0x133   : > { %v622_v26 = vpop.f32.mrf.mxu0 }
 0x134   : > { %v1368_v28 = vmax.f32 %v773_v11, %v4826_v19  ;;  %v1369_v29 = vmax.f32 %v774_v13, %v4827_v20  ;;  %v1455_v31 = vmax.f32 %v1359_v18, %v1367_v22  ;;  %v623_v32 = vadd.f32 %v6414_v12, %v622_v26 }
 0x135   : > { %v1370_v34 = vmax.f32 %v775_v14, %v4828_v21 }
 0x136   : > { %v1456_v36 = vmax.f32 %v1360_v45, %v1368_v28  ;;  %v1457_v37 = vmax.f32 %v1361_v23, %v1369_v29  ;;  %v674_v44 = vmax.f32 %v623_v32, 0.0  ;;  %v1610_v48 = vperm.slane %v1455_v31, 0  ;;  %v6608_v32 = vld [vmem:[#allocation2 + $0x41] sm:$0xff] }
 0x137   : > { %6096 = vrot.lane.b32.xlu0 %v6560_v38, %s6270_s16  ;;  %v1458_v52 = vmax.f32 %v1362_v39, %v1370_v34  ;;  %v6610_v34 = vld [vmem:[#allocation2 + $0x40] sm:$0xff] }
 0x138   : > { %v1611_v49 = vperm.slane %v1456_v36, 0  ;;  %v776_v50 = vrot.slane %v674_v44, 2  ;;  %v777_v7 = vrot.slane %v674_v44, 4  ;;  %v778_v51 = vrot.slane %v674_v44, 6 }
 0x139   : > { %v4829_v42 = vrot.slane %v674_v44, 9  ;;  %v1612_v53 = vperm.slane %v1457_v37, 0  ;;  %v1613_v8 = vperm.slane %v1458_v52, 0 }
 0x13a   : > { %v1677_v54 = vsel %vm1642_vm3, %v1611_v49, %v1610_v48  ;;  %v4830_v55 = vrot.slane %v776_v50, 9  ;;  %v4831_v56 = vrot.slane %v777_v7, 9  ;;  %v4832_v57 = vrot.slane %v778_v51, 9  ;;  %v5817_v48 = vld [vmem:[%s8060_s3 + $0x70] sm:$0xff] }
 0x13b   : > { %v625_v58 = vpop.f32.mrf.mxu0  ;;  %v1371_v63 = vmax.f32 %v674_v44, %v4829_v42  ;;  %v1678_v4 = vsel %vm1644_vm4, %v1612_v53, %v1677_v54  ;;  %2239 = vmatpush.bf16.msra.mxu2 %v5817_v48 }
 0x13c   : > { %v1372_v1 = vmax.f32 %v776_v50, %v4830_v55  ;;  %v1373_v2 = vmax.f32 %v777_v7, %v4831_v56  ;;  %v1374_v38 = vmax.f32 %v778_v51, %v4832_v57  ;;  %v1679_v16 = vsel %vm1646_vm5, %v1613_v8, %v1678_v4  ;;  %v5816_v57 = vld [vmem:[%s8060_s3 + $0x68] sm:$0xff] }
 0x13d   : > { %v1459_v6 = vmax.f32 %v1363_v59, %v1371_v63  ;;  %v626_v21 = vadd.f32 %v6414_v12, %v625_v58  ;;  %v5810_v63 = vld [vmem:[%s8060_s3 + $0x38] sm:$0xff] }
 0x13e   : > { %v1460_v9 = vmax.f32 %v1364_v61, %v1372_v1  ;;  %v1461_v11 = vmax.f32 %v1365_v62, %v1373_v2  ;;  %v1462_v13 = vmax.f32 %v1366_v0, %v1374_v38  ;;  %2209 = vmatpush.bf16.msra.mxu1 %v5810_v63 }
 0x13f   : > { %v1614_v14 = vperm.slane %v1459_v6, 0  ;;  %v675_v24 = vmax.f32 %v626_v21, 0.0  ;;  %2240 = vmatpush.bf16.msra.mxu2 %v5816_v57  ;;  %v5813_v57 = vld [vmem:[%s8060_s3 + $0x50] sm:$0xff] }
 0x140   : > { %v1615_v17 = vperm.slane %v1460_v9, 0  ;;  %v1616_v18 = vperm.slane %v1461_v11, 0  ;;  %v1617_v19 = vperm.slane %v1462_v13, 0  ;;  %v6649_v13 = vld [vmem:[%s8059_s2] ss:$0 sm:$0xff] }
 0x141   : > { %v1680_v10 = vsel %vm1648_vm6, %v1614_v14, %v1679_v16  ;;  %v779_v26 = vrot.slane %v675_v24, 2  ;;  %v780_v27 = vrot.slane %v675_v24, 4  ;;  %v781_v36 = vrot.slane %v675_v24, 6  ;;  %v5815_v16 = vld [vmem:[%s8060_s3 + $0x60] sm:$0xff] }
 0x142   : > { %v1681_v20 = vsel %vm1650_vm7, %v1615_v17, %v1680_v10  ;;  %v4833_v37 = vrot.slane %v675_v24, 9 }
 0x143   : > { %v627_v22 = vpop.f32.mrf.mxu0  ;;  %v1682_v45 = vsel %vm1652_vm8, %v1616_v18, %v1681_v20  ;;  %v4834_v49 = vrot.slane %v779_v26, 9  ;;  %v4835_v50 = vrot.slane %v780_v27, 9  ;;  %v4836_v55 = vrot.slane %v781_v36, 9  ;;  %v5809_v20 = vld [vmem:[%s8060_s3 + $0x30] sm:$0xff]  ;;  %2241 = vmatpush.bf16.msra.mxu2 %v5815_v16 }
 0x144   : > { %v1683_v23 = vsel %vm1654_vm9, %v1617_v19, %v1682_v45  ;;  %v628_v28 = vadd.f32 %v6414_v12, %v627_v22  ;;  %v1375_v56 = vmax.f32 %v675_v24, %v4833_v37  ;;  %v6115_v19 = vpack.i.bf16 %v6610_v34, %v6554_v35  ;;  %2210 = vmatpush.bf16.msra.mxu1 %v5809_v20 }
 0x145   : > { %1718 = vst.msk [vmem:[#allocation2 + $0x51] sm:$0xff] %vm517_vm0, %v1683_v23  ;;  %v1376_v0 = vmax.f32 %v779_v26, %v4834_v49  ;;  %v1377_v1 = vmax.f32 %v780_v27, %v4835_v50  ;;  %v1378_v21 = vmax.f32 %v781_v36, %v4836_v55  ;;  %v5814_v36 = vld [vmem:[%s8060_s3 + $0x58] sm:$0xff] }
 0x146   : > { %v6629_v7 = vmax.f32 %v628_v28, 0.0 }
 0x147   : > { %2242 = vmatpush.bf16.msra.mxu2 %v5814_v36 }
 0x148   : > { %v782_v2 = vrot.slane %v6629_v7, 2  ;;  %v783_v38 = vrot.slane %v6629_v7, 4  ;;  %v784_v6 = vrot.slane %v6629_v7, 6  ;;  %v4837_v22 = vrot.slane %v6629_v7, 9 }
 0x14a   : > { %v4838_v45 = vrot.slane %v782_v2, 9  ;;  %v4839_v24 = vrot.slane %v783_v38, 9  ;;  %v4840_v25 = vrot.slane %v784_v6, 9  ;;  %v1379_v5 = vmax.f32 %v6629_v7, %v4837_v22  ;;  %v5807_v7 = vld [vmem:[%s8060_s3 + $0x20] sm:$0xff] }
 0x14b   : > { %v630_v29 = vpop.f32.mrf.mxu0  ;;  %2243 = vmatpush.bf16.msra.mxu2 %v5813_v57 }
 0x14c   : > { %v631_v31 = vadd.f32 %v6414_v12, %v630_v29  ;;  %v6612_v39 = vld [vmem:[#allocation2 + $0x52] sm:$0xff]  ;;  %v1380_v33 = vmax.f32 %v782_v2, %v4838_v45 }
 0x14d   : > { %v6614_v40 = vld [vmem:[#allocation2 + $0x51] sm:$0xff]  ;;  %v2042_v46 = vpack.c.bf16 %v6612_v39, %v6586_v3  ;;  %v6135_v51 = vpack.i.bf16 %v6612_v39, %v6586_v3 }
 0x14e   : > { %v6616_v41 = vld [vmem:[#allocation2 + $0x50] sm:$0xff]  ;;  %v677_v44 = vmax.f32 %v631_v31, 0.0  ;;  %v6622_v47 = vpack.i.bf16 %v6614_v40, %v6608_v32 }
 0x14f   : > { %v6100_v12 = vpack.i.bf16 %v6616_v41, %v6610_v34  ;;  %4954 = vmatmul.msk.bf16.gmra.mxu3 %vm517_vm0, %v2042_v46  ;;  %v5808_v46 = vld [vmem:[%s8060_s3 + $0x28] sm:$0xff] }
 0x150   : > { %v785_v42 = vrot.slane %v677_v44, 2  ;;  %v786_v52 = vrot.slane %v677_v44, 4  ;;  %v787_v53 = vrot.slane %v677_v44, 6  ;;  %v4841_v54 = vrot.slane %v677_v44, 9  ;;  %6111 = vrot.lane.b32.xlu2 %v6622_v47, %s6271_s22  ;;  %2211 = vmatpush.bf16.msra.mxu1 %v5808_v46 }
 0x151   : > { %6101 = vrot.lane.b32.xlu1 %v6100_v12, %s6269_s30 }
 0x152   : > { %v4842_v58 = vrot.slane %v785_v42, 9  ;;  %v4843_v59 = vrot.slane %v786_v52, 9  ;;  %v4844_v61 = vrot.slane %v787_v53, 9  ;;  %v1383_v62 = vmax.f32 %v677_v44, %v4841_v54 }
 0x153   : > { %v632_v4 = vpop.f32.mrf.mxu0 }
 0x154   : > { %v1384_v8 = vmax.f32 %v785_v42, %v4842_v58  ;;  %v1385_v9 = vmax.f32 %v786_v52, %v4843_v59  ;;  %v1463_v11 = vmax.f32 %v1375_v56, %v1383_v62  ;;  %v633_v14 = vadd.f32 %v6649_v13, %v632_v4  ;;  %2212 = vmatpush.bf16.msra.mxu1 %v5807_v7 }
 0x155   : > { %v1386_v17 = vmax.f32 %v787_v53, %v4844_v61  ;;  %v1382_v53 = vmax.f32 %v784_v6, %v4840_v25  ;;  %v5812_v6 = vld [vmem:[%s8060_s3 + $0x48] sm:$0xff] }
 0x156   : > { %v1464_v18 = vmax.f32 %v1376_v0, %v1384_v8  ;;  %v1465_v10 = vmax.f32 %v1377_v1, %v1385_v9  ;;  %v678_v23 = vmax.f32 %v633_v14, 0.0  ;;  %v1618_v26 = vperm.slane %v1463_v11, 0  ;;  %2244 = vmatpush.bf16.msra.mxu2 %v5812_v6 }
 0x157   : > { %v1466_v37 = vmax.f32 %v1378_v21, %v1386_v17  ;;  %v5806_v17 = vld [vmem:[%s8060_s3 + $0x18] sm:$0xff]  ;;  %v5805_v21 = vld [vmem:[%s8060_s3 + $0x10] sm:$0xff] }
 0x158   : > { %v1619_v27 = vperm.slane %v1464_v18, 0  ;;  %6116 = vrot.lane.b32.xlu2 %v6115_v19, %s6271_s22  ;;  %v788_v28 = vrot.slane %v678_v23, 2  ;;  %v789_v29 = vrot.slane %v678_v23, 4  ;;  %v790_v31 = vrot.slane %v678_v23, 6  ;;  %2213 = vmatpush.bf16.msra.mxu1 %v5806_v17  ;;  %v5811_v19 = vld [vmem:[%s8060_s3 + $0x40] sm:$0xff] }
 0x159   : > { %v4845_v35 = vrot.slane %v678_v23, 9  ;;  %6106 = vrot.lane.b32.xlu1 %v6105_v43, %s6269_s30  ;;  %v1620_v44 = vperm.slane %v1465_v10, 0  ;;  %v1381_v43 = vmax.f32 %v783_v38, %v4839_v24  ;;  %v1621_v61 = vperm.slane %v1466_v37, 0 }
 0x15a   : > { %v1684_v12 = vsel %vm1642_vm3, %v1619_v27, %v1618_v26  ;;  %v4846_v48 = vrot.slane %v788_v28, 9  ;;  %v4847_v49 = vrot.slane %v789_v29, 9  ;;  %v4848_v50 = vrot.slane %v790_v31, 9  ;;  %2245 = vmatpush.bf16.msra.mxu2 %v5811_v19  ;;  %v5804_v26 = vld [vmem:[%s8060_s3 + $0x8] sm:$0xff] }
 0x15b   : > { %v635_v42 = vpop.f32.mrf.mxu0  ;;  %v1387_v52 = vmax.f32 %v678_v23, %v4845_v35  ;;  %v1685_v58 = vsel %vm1644_vm4, %v1620_v44, %v1684_v12 }
 0x15c   : > { %v1388_v54 = vmax.f32 %v788_v28, %v4846_v48  ;;  %v1389_v55 = vmax.f32 %v789_v29, %v4847_v49  ;;  %v1390_v56 = vmax.f32 %v790_v31, %v4848_v50  ;;  %v1686_v2 = vsel %vm1646_vm5, %v1621_v61, %v1685_v58  ;;  %2214 = vmatpush.bf16.msra.mxu1 %v5805_v21  ;;  %v5803_v50 = vld [vmem:[%s8060_s3] sm:$0xff] }
 0x15d   : > { %v1467_v59 = vmax.f32 %v1379_v5, %v1387_v52  ;;  %v636_v14 = vadd.f32 %v6649_v13, %v635_v42 }
 0x15e   : > { %v1468_v62 = vmax.f32 %v1380_v33, %v1388_v54  ;;  %v1469_v63 = vmax.f32 %v1381_v43, %v1389_v55  ;;  %v1470_v0 = vmax.f32 %v1382_v53, %v1390_v56 }
 0x15f   : > { %v1622_v1 = vperm.slane %v1467_v59, 0  ;;  %v679_v20 = vmax.f32 %v636_v14, 0.0 }
 0x160   : > { %v1623_v38 = vperm.slane %v1468_v62, 0  ;;  %v1624_v4 = vperm.slane %v1469_v63, 0  ;;  %v1625_v9 = vperm.slane %v1470_v0, 0  ;;  %2215 = vmatpush.bf16.msra.mxu1 %v5804_v26 }
 0x161   : > { %v1687_v8 = vsel %vm1648_vm6, %v1622_v1, %v1686_v2  ;;  %v791_v22 = vrot.slane %v679_v20, 2  ;;  %v792_v45 = vrot.slane %v679_v20, 4  ;;  %v793_v27 = vrot.slane %v679_v20, 6 }
 0x162   : > { %v1688_v11 = vsel %vm1650_vm7, %v1623_v38, %v1687_v8  ;;  %v4849_v28 = vrot.slane %v679_v20, 9 }
 0x163   : > { %v637_v16 = vpop.f32.mrf.mxu0  ;;  %v1689_v18 = vsel %vm1652_vm8, %v1624_v4, %v1688_v11  ;;  %v4850_v36 = vrot.slane %v791_v22, 9  ;;  %v4851_v37 = vrot.slane %v792_v45, 9  ;;  %v4852_v42 = vrot.slane %v793_v27, 9 }
 0x164   : > { %v1690_v10 = vsel %vm1654_vm9, %v1625_v9, %v1689_v18  ;;  %v638_v23 = vadd.f32 %v6649_v13, %v637_v16  ;;  %v1391_v5 = vmax.f32 %v679_v20, %v4849_v28  ;;  %2216 = vmatpush.bf16.msra.mxu1 %v5803_v50 }
 0x165   : > { %1719 = vst.msk [vmem:[#allocation2 + $0x61] sm:$0xff] %vm517_vm0, %v1690_v10  ;;  %v1392_v54 = vmax.f32 %v791_v22, %v4850_v36  ;;  %v1393_v55 = vmax.f32 %v792_v45, %v4851_v37  ;;  %v1394_v38 = vmax.f32 %v793_v27, %v4852_v42  ;;  %v6062_v22 = vpop.permute.xlu0 %6061 }
 0x166   : > { %v680_v44 = vmax.f32 %v638_v23, 0.0 }
 0x168   : > { %v794_v56 = vrot.slane %v680_v44, 2  ;;  %v795_v57 = vrot.slane %v680_v44, 4  ;;  %v796_v59 = vrot.slane %v680_v44, 6  ;;  %v4853_v4 = vrot.slane %v680_v44, 9 }
 0x16a   : > { %v4854_v6 = vrot.slane %v794_v56, 9  ;;  %v4855_v9 = vrot.slane %v795_v57, 9  ;;  %v4856_v11 = vrot.slane %v796_v59, 9  ;;  %v1395_v27 = vmax.f32 %v680_v44, %v4853_v4 }
 0x16b   : > { %v640_v24 = vpop.f32.mrf.mxu0 }
 0x16c   : > { %v641_v25 = vadd.f32 %v6649_v13, %v640_v24  ;;  %v6705_v29 = vld [vmem:[#allocation2 + $0x62] sm:$0xff]  ;;  %v1396_v28 = vmax.f32 %v794_v56, %v4854_v6  ;;  %v1398_v36 = vmax.f32 %v796_v59, %v4856_v11  ;;  %v6063_v56 = vunpack.i.l.bf16 %v6062_v22 }
 0x16d   : > { %v6120_v35 = vpack.i.bf16 %v6705_v29, %v6612_v39 }
 0x16e   : > { %v681_v31 = vmax.f32 %v641_v25, 0.0 }
 0x16f   : > { %6121 = vrot.lane.b32.xlu0 %v6120_v35, %s6270_s16 }
 0x170   : > { %v797_v46 = vrot.slane %v681_v31, 2  ;;  %v798_v12 = vrot.slane %v681_v31, 4  ;;  %v799_v48 = vrot.slane %v681_v31, 6  ;;  %v4857_v49 = vrot.slane %v681_v31, 9 }
 0x172   : > { %v4858_v33 = vrot.slane %v797_v46, 9  ;;  %v4859_v43 = vrot.slane %v798_v12, 9  ;;  %v4860_v52 = vrot.slane %v799_v48, 9  ;;  %v1399_v53 = vmax.f32 %v681_v31, %v4857_v49 }
 0x173   : > { %v642_v58 = vpop.f32.mrf.mxu0  ;;  %v1397_v31 = vmax.f32 %v795_v57, %v4855_v9  ;;  %v2013_v9 = vsel %vm517_vm0, %v6570_v60, %v6063_v56 }
 0x174   : > { %v1400_v7 = vmax.f32 %v797_v46, %v4858_v33  ;;  %v1401_v61 = vmax.f32 %v798_v12, %v4859_v43  ;;  %v1471_v62 = vmax.f32 %v1391_v5, %v1399_v53  ;;  %v643_v63 = vadd.f32 %v6649_v13, %v642_v58  ;;  %v6718_v33 = vpop.permute.xlu2 %6081 }
 0x175   : > { %v1402_v0 = vmax.f32 %v799_v48, %v4860_v52 }
 0x176   : > { %v1472_v1 = vmax.f32 %v1392_v54, %v1400_v7  ;;  %v1473_v2 = vmax.f32 %v1393_v55, %v1401_v61  ;;  %v682_v8 = vmax.f32 %v643_v63, 0.0  ;;  %v1626_v14 = vperm.slane %v1471_v62, 0 }
 0x177   : > { %6126 = vrot.lane.b32.xlu0 %v6622_v47, %s6270_s16  ;;  %v1474_v20 = vmax.f32 %v1394_v38, %v1402_v0  ;;  %v6064_v55 = vunpack.i.h.bf16 %v6062_v22  ;;  %v6084_v22 = vunpack.i.h.bf16 %v6718_v33 }
 0x178   : > { %v1627_v16 = vperm.slane %v1472_v1, 0  ;;  %v800_v17 = vrot.slane %v682_v8, 2  ;;  %v801_v18 = vrot.slane %v682_v8, 4  ;;  %v802_v10 = vrot.slane %v682_v8, 6 }
 0x179   : > { %v4861_v19 = vrot.slane %v682_v8, 9  ;;  %v1628_v21 = vperm.slane %v1473_v2, 0  ;;  %v1629_v49 = vperm.slane %v1474_v20, 0 }
 0x17a   : > { %v1691_v45 = vsel %vm1642_vm3, %v1627_v16, %v1626_v14  ;;  %v4862_v23 = vrot.slane %v800_v17, 9  ;;  %v4863_v24 = vrot.slane %v801_v18, 9  ;;  %v4864_v25 = vrot.slane %v802_v10, 9 }
 0x17b   : > { %v645_v26 = vpop.f32.mrf.mxu0  ;;  %v1403_v35 = vmax.f32 %v682_v8, %v4861_v19  ;;  %v1692_v12 = vsel %vm1644_vm4, %v1628_v21, %v1691_v45  ;;  %v2014_v8 = vsel %vm517_vm0, %v6550_v30, %v6064_v55  ;;  %v6083_v45 = vunpack.i.l.bf16 %v6718_v33 }
 0x17c   : > { %v1404_v37 = vmax.f32 %v800_v17, %v4862_v23  ;;  %v1405_v47 = vmax.f32 %v801_v18, %v4863_v24  ;;  %v1406_v46 = vmax.f32 %v802_v10, %v4864_v25  ;;  %v1693_v52 = vsel %vm1646_vm5, %v1629_v49, %v1692_v12  ;;  %v6087_v16 = vpop.permute.xlu2 %6086  ;;  %v1722_v25 = vld [vmem:[#allocation2] sm:$0xff] }
 0x17d   : > { %v1475_v48 = vmax.f32 %v1395_v27, %v1403_v35  ;;  %v646_v54 = vadd.f32 %v6649_v13, %v645_v26  ;;  %v6089_v23 = vunpack.i.h.bf16 %v6087_v16  ;;  %v6088_v24 = vunpack.i.l.bf16 %v6087_v16  ;;  %v1723_v35 = vld [vmem:[#allocation2 + $0x10] sm:$0xff] }
 0x17e   : > { %v1476_v50 = vmax.f32 %v1396_v28, %v1404_v37  ;;  %v1477_v42 = vmax.f32 %v1397_v31, %v1405_v47  ;;  %v1478_v5 = vmax.f32 %v1398_v36, %v1406_v46 }
 0x17f   : > { %v1630_v43 = vperm.slane %v1475_v48, 0  ;;  %v6726_v38 = vmax.f32 %v646_v54, 0.0 }
 0x180   : > { %v1631_v44 = vperm.slane %v1476_v50, 0  ;;  %v1632_v53 = vperm.slane %v1477_v42, 0  ;;  %v1633_v59 = vperm.slane %v1478_v5, 0 }
 0x181   : > { %v1694_v57 = vsel %vm1648_vm6, %v1630_v43, %v1693_v52  ;;  %v803_v10 = vrot.slane %v6726_v38, 2  ;;  %v804_v19 = vrot.slane %v6726_v38, 4  ;;  %v4865_v30 = vrot.slane %v6726_v38, 9  ;;  %v6758_v52 = vld [vmem:[#allocation2 + $0x61] sm:$0xff] }
 0x182   : > { %v6072_v58 = vpop.permute.xlu1 %6071  ;;  %v1695_v7 = vsel %vm1650_vm7, %v1631_v44, %v1694_v57  ;;  %v805_v27 = vrot.slane %v6726_v38, 6  ;;  %v6760_v44 = vld [vmem:[#allocation2 + $0x60] sm:$0xff] }
 0x183   : > { %v6067_v61 = vpop.permute.xlu0 %6066  ;;  %v647_v62 = vpop.f32.mrf.mxu0  ;;  %v1696_v63 = vsel %vm1652_vm8, %v1632_v53, %v1695_v7  ;;  %v6074_v0 = vunpack.i.h.bf16 %v6072_v58  ;;  %v6073_v1 = vunpack.i.l.bf16 %v6072_v58  ;;  %v4866_v37 = vrot.slane %v803_v10, 9 }
 0x184   : > { %v1697_v2 = vsel %vm1654_vm9, %v1633_v59, %v1696_v63  ;;  %v6069_v4 = vunpack.i.h.bf16 %v6067_v61  ;;  %v6068_v6 = vunpack.i.l.bf16 %v6067_v61  ;;  %v648_v20 = vadd.f32 %v6649_v13, %v647_v62 }
 0x185   : > { %1720 = vst.msk [vmem:[#allocation2 + $0x71] sm:$0xff] %vm517_vm0, %v1697_v2  ;;  %v4867_v47 = vrot.slane %v804_v19, 9  ;;  %v1407_v46 = vmax.f32 %v6726_v38, %v4865_v30  ;;  %v4868_v61 = vrot.slane %v805_v27, 9  ;;  %v1408_v62 = vmax.f32 %v803_v10, %v4866_v37 }
 0x186   : > { %v2021_v11 = vsel %vm1995_vm10, %v2013_v9, %v6068_v6  ;;  %v2022_v14 = vsel %vm1995_vm10, %v2014_v8, %v6069_v4  ;;  %v6746_v12 = vmax.f32 %v648_v20, 0.0 }
 0x187   : > { %v2029_v17 = vsel %vm2004_vm11, %v2021_v11, %v6073_v1  ;;  %v2030_v18 = vsel %vm2004_vm11, %v2022_v14, %v6074_v0  ;;  %v1409_v6 = vmax.f32 %v804_v19, %v4867_v47  ;;  %v6145_v19 = vpack.i.bf16 %v6760_v44, %v6616_v41 }
 0x188   : > { %v2038_v60 = vpack.c.bf16 %v2030_v18, %v2029_v17  ;;  %v806_v8 = vrot.slane %v6746_v12, 2  ;;  %v807_v9 = vrot.slane %v6746_v12, 4  ;;  %v808_v16 = vrot.slane %v6746_v12, 6 }
 0x18a   : > { %v6077_v21 = vpop.permute.xlu1 %6076  ;;  %2246 = vmatmul.bf16.vlgmr.msra.gmra.mxu2 %v2038_v60 }
 0x18b   : > { %v650_v26 = vpop.f32.mrf.mxu0  ;;  %v6079_v28 = vunpack.i.h.bf16 %v6077_v21  ;;  %v6078_v31 = vunpack.i.l.bf16 %v6077_v21 }
 0x18c   : > { %v651_v36 = vadd.f32 %v6649_v13, %v650_v26  ;;  %v6748_v48 = vld [vmem:[#allocation2 + $0x72] sm:$0xff]  ;;  %v4872_v26 = vrot.slane %v808_v16, 9 }
 0x18d   : > { %v6750_v49 = vld [vmem:[#allocation2 + $0x71] sm:$0xff]  ;;  %v1987_v42 = vsel %vm517_vm0, %v1722_v25, %v6078_v31  ;;  %v1988_v5 = vsel %vm517_vm0, %v1723_v35, %v6079_v28  ;;  %v2045_v43 = vpack.c.bf16 %v6748_v48, %v6705_v29  ;;  %v4871_v25 = vrot.slane %v807_v9, 9 }
 0x18e   : > { %v6752_v50 = vld [vmem:[#allocation2 + $0x70] sm:$0xff]  ;;  %v685_v33 = vmax.f32 %v651_v36, 0.0  ;;  %v6764_v53 = vpack.i.bf16 %v6750_v49, %v6758_v52  ;;  %v1996_v55 = vsel %vm1995_vm10, %v1987_v42, %v6083_v45  ;;  %v1997_v56 = vsel %vm1995_vm10, %v1988_v5, %v6084_v22 }
 0x18f   : > { %v6130_v54 = vpack.i.bf16 %v6752_v50, %v6760_v44  ;;  %4955 = vmatmul.msk.bf16.gmra.mxu3 %vm517_vm0, %v2045_v43  ;;  %v2005_v63 = vsel %vm2004_vm11, %v1996_v55, %v6088_v24  ;;  %v2006_v0 = vsel %vm2004_vm11, %v1997_v56, %v6089_v23  ;;  %v1410_v22 = vmax.f32 %v805_v27, %v4868_v61 }
 0x190   : > { %v809_v57 = vrot.slane %v685_v33, 2  ;;  %v810_v58 = vrot.slane %v685_v33, 4  ;;  %v811_v59 = vrot.slane %v685_v33, 6  ;;  %v4873_v7 = vrot.slane %v685_v33, 9  ;;  %6141 = vrot.lane.b32.xlu2 %v6764_v53, %s6271_s22 }
 0x191   : > { %6131 = vrot.lane.b32.xlu1 %v6130_v54, %s6269_s30  ;;  %v2037_v11 = vpack.c.bf16 %v2006_v0, %v2005_v63  ;;  %v4869_v45 = vrot.slane %v6746_v12, 9  ;;  %v4870_v23 = vrot.slane %v806_v8, 9  ;;  %v1413_v55 = vmax.f32 %v807_v9, %v4871_v25 }
 0x192   : > { %v4874_v1 = vrot.slane %v809_v57, 9  ;;  %v4875_v2 = vrot.slane %v810_v58, 9  ;;  %v4876_v38 = vrot.slane %v811_v59, 9  ;;  %v1415_v4 = vmax.f32 %v685_v33, %v4873_v7 }
 0x193   : > { %v652_v14 = vpop.f32.mrf.mxu0  ;;  %2217 = vmatmul.bf16.vlgmr.msra.gmra.mxu1 %v2037_v11  ;;  %v1411_v43 = vmax.f32 %v6746_v12, %v4869_v45  ;;  %v1412_v54 = vmax.f32 %v806_v8, %v4870_v23  ;;  %v1794_v11 = vld [vmem:[#allocation2 + $0x92] sm:$0xff] }
 0x194   : > { %v1416_v17 = vmax.f32 %v809_v57, %v4874_v1  ;;  %v1417_v18 = vmax.f32 %v810_v58, %v4875_v2  ;;  %v1479_v10 = vmax.f32 %v1407_v46, %v1415_v4  ;;  %v653_v30 = vadd.f32 %v6649_v13, %v652_v14  ;;  %v1786_v14 = vld [vmem:[#allocation2 + $0x91] sm:$0xff] }
 0x195   : > { %v1418_v20 = vmax.f32 %v811_v59, %v4876_v38  ;;  %v1414_v57 = vmax.f32 %v808_v16, %v4872_v26  ;;  %v1778_v16 = vld [vmem:[#allocation2 + $0x90] sm:$0xff] }
 0x196   : > { %v1480_v60 = vmax.f32 %v1408_v62, %v1416_v17  ;;  %v1481_v21 = vmax.f32 %v1409_v6, %v1417_v18  ;;  %v686_v24 = vmax.f32 %v653_v30, 0.0  ;;  %v1634_v28 = vperm.slane %v1479_v10, 0 }
 0x197   : > { %v1482_v13 = vmax.f32 %v1410_v22, %v1418_v20  ;;  %v6165_v22 = vpack.i.bf16 %v6748_v48, %v6705_v29 }
 0x198   : > { %v1635_v31 = vperm.slane %v1480_v60, 0  ;;  %v812_v35 = vrot.slane %v686_v24, 2  ;;  %v813_v36 = vrot.slane %v686_v24, 4  ;;  %v814_v37 = vrot.slane %v686_v24, 6  ;;  %6146 = vrot.lane.b32.xlu2 %v6145_v19, %s6271_s22 }
 0x199   : > { %v4877_v47 = vrot.slane %v686_v24, 9  ;;  %6136 = vrot.lane.b32.xlu1 %v6135_v51, %s6269_s30  ;;  %v1636_v27 = vperm.slane %v1481_v21, 0  ;;  %v1637_v39 = vperm.slane %v1482_v13, 0 }
 0x19a   : > { %v1698_v46 = vsel %vm1642_vm3, %v1635_v31, %v1634_v28  ;;  %v4878_v42 = vrot.slane %v812_v35, 9  ;;  %v4879_v5 = vrot.slane %v813_v36, 9  ;;  %v4880_v33 = vrot.slane %v814_v37, 9  ;;  %v1756_v28 = vld [vmem:[#allocation2 + $0x31] sm:$0xff] }
 0x19b   : > { %v1419_v56 = vmax.f32 %v686_v24, %v4877_v47  ;;  %v1699_v61 = vsel %vm1644_vm4, %v1636_v27, %v1698_v46 }
 0x19c   : > { %v1420_v58 = vmax.f32 %v812_v35, %v4878_v42  ;;  %v1421_v59 = vmax.f32 %v813_v36, %v4879_v5  ;;  %v1422_v7 = vmax.f32 %v814_v37, %v4880_v33  ;;  %v1700_v1 = vsel %vm1646_vm5, %v1637_v39, %v1699_v61 }
 0x19d   : > { %v1483_v3 = vmax.f32 %v1411_v43, %v1419_v56 }
 0x19e   : > { %v1484_v51 = vmax.f32 %v1412_v54, %v1420_v58  ;;  %v1485_v62 = vmax.f32 %v1413_v55, %v1421_v59  ;;  %v1486_v63 = vmax.f32 %v1414_v57, %v1422_v7  ;;  %v1725_v55 = vld [vmem:[#allocation2 + $0x30] sm:$0xff] }
 0x19f   : > { %v1638_v0 = vperm.slane %v1483_v3, 0 }
 0x1a0   : > { %v1639_v2 = vperm.slane %v1484_v51, 0  ;;  %v1640_v38 = vperm.slane %v1485_v62, 0  ;;  %v1641_v4 = vperm.slane %v1486_v63, 0 }
 0x1a1   : > { %v1701_v12 = vsel %vm1648_vm6, %v1638_v0, %v1700_v1  ;;  %v6092_v45 = vpop.permute.xlu0 %6091 }
 0x1a2   : > { %v1702_v6 = vsel %vm1650_vm7, %v1639_v2, %v1701_v12  ;;  %v6094_v24 = vunpack.i.h.bf16 %v6092_v45  ;;  %v6093_v25 = vunpack.i.l.bf16 %v6092_v45 }
 0x1a3   : > { %v1703_v8 = vsel %vm1652_vm8, %v1640_v38, %v1702_v6 }
 0x1a4   : > { %v1704_v9 = vsel %vm1654_vm9, %v1641_v4, %v1703_v8  ;;  %v2016_v36 = vsel %vm517_vm0, %v6608_v32, %v6094_v24  ;;  %v2015_v29 = vsel %vm517_vm0, %v1756_v28, %v6093_v25  ;;  %v1724_v32 = vld [vmem:[#allocation2 + $0x20] sm:$0xff] }
 0x1a5   : > { %1721 = vst.msk [vmem:[#allocation2 + $0x81] sm:$0xff] %vm517_vm0, %v1704_v9 }
 0x1aa   : > { %v6112_v23 = vpop.permute.xlu2 %6111 }
 0x1ab   : > { %v6113_v37 = vunpack.i.l.bf16 %v6112_v23 }
 0x1ac   : > { %v1793_v17 = vld [vmem:[#allocation2 + $0x82] sm:$0xff] }
 0x1ad   : > { %v6797_v18 = vld [vmem:[#allocation2 + $0x81] sm:$0xff]  ;;  %v2048_v30 = vpack.c.bf16 %v1794_v11, %v1793_v17  ;;  %v6150_v20 = vpack.i.bf16 %v1793_v17, %v6748_v48  ;;  %v6114_v48 = vunpack.i.h.bf16 %v6112_v23 }
 0x1ae   : > { %v1777_v10 = vld [vmem:[#allocation2 + $0x80] sm:$0xff]  ;;  %v6170_v60 = vpack.i.bf16 %v1786_v14, %v6797_v18 }
 0x1af   : > { %v6160_v21 = vpack.i.bf16 %v1778_v16, %v1777_v10  ;;  %4956 = vmatmul.msk.bf16.gmra.mxu3 %vm517_vm0, %v2048_v30  ;;  %6151 = vrot.lane.b32.xlu0 %v6150_v20, %s6270_s16  ;;  %v6175_v19 = vpack.i.bf16 %v1777_v10, %v6752_v50 }
 0x1b0   : > { %6171 = vrot.lane.b32.xlu2 %v6170_v60, %s6271_s22 }
 0x1b1   : > { %6161 = vrot.lane.b32.xlu1 %v6160_v21, %s6269_s30 }
 0x1b2   : > { %v6117_v43 = vpop.permute.xlu2 %6116 }
 0x1b3   : > { %v6119_v7 = vunpack.i.h.bf16 %v6117_v43  ;;  %v6118_v61 = vunpack.i.l.bf16 %v6117_v43 }
 0x1b7   : > { %6156 = vrot.lane.b32.xlu0 %v6764_v53, %s6270_s16  ;;  %v6097_v53 = vpop.permute.xlu0 %6096  ;;  %s4592_s16 = scalar_lea.sflag [#allocation6], %s377_s15 }
 0x1b8   : > { %6176 = vrot.lane.b32.xlu2 %v6175_v19, %s6271_s22  ;;  %v6099_v5 = vunpack.i.h.bf16 %v6097_v53  ;;  %v6098_v33 = vunpack.i.l.bf16 %v6097_v53  ;;  %v2575_v53 = vld [vmem:[#allocation3] sm:$0xf] }
 0x1b9   : > { %6166 = vrot.lane.b32.xlu1 %v6165_v22, %s6269_s30  ;;  %2616 = vst [vmem:[#allocation1] ss:$2 sm:$0xff] %v2575_v53 }
 0x1ba   : > { %v1990_v58 = vsel %vm517_vm0, %v1725_v55, %v6099_v5  ;;  %v1989_v59 = vsel %vm517_vm0, %v1724_v32, %v6098_v33 }
 0x1c3   : > { %v6102_v26 = vpop.permute.xlu1 %6101 }
 0x1c4   : > { %v6104_v31 = vunpack.i.h.bf16 %v6102_v26  ;;  %v6103_v35 = vunpack.i.l.bf16 %v6102_v26 }
 0x1c6   : > { %v2023_v47 = vsel %vm1995_vm10, %v2015_v29, %v6103_v35  ;;  %v2024_v13 = vsel %vm1995_vm10, %v2016_v36, %v6104_v31  ;;  %v6848_v35 = vld [vmem:[%s8061_s4] ss:$0 sm:$0xff] }
 0x1c7   : > { %v2031_v27 = vsel %vm2004_vm11, %v2023_v47, %v6113_v37  ;;  %v2032_v46 = vsel %vm2004_vm11, %v2024_v13, %v6114_v48  ;;  %v2276_v47 = vpop.f32.mrf.mxu3 }
 0x1c8   : > { %v2041_v42 = vpack.c.bf16 %v2032_v46, %v2031_v27 }
 0x1ca   : > { %2251 = vmatmul.bf16.gmra.mxu2 %v2041_v42 }
 0x1cb   : > { %v6107_v54 = vpop.permute.xlu1 %6106 }
 0x1cc   : > { %v6109_v56 = vunpack.i.h.bf16 %v6107_v54  ;;  %v6108_v57 = vunpack.i.l.bf16 %v6107_v54 }
 0x1ce   : > { %v1998_v3 = vsel %vm1995_vm10, %v1989_v59, %v6108_v57  ;;  %v1999_v39 = vsel %vm1995_vm10, %v1990_v58, %v6109_v56 }
 0x1cf   : > { %v2007_v51 = vsel %vm2004_vm11, %v1998_v3, %v6118_v61  ;;  %v2008_v62 = vsel %vm2004_vm11, %v1999_v39, %v6119_v7  ;;  %v2278_v57 = vpop.f32.mrf.mxu3 }
 0x1d0   : > { %v2040_v63 = vpack.c.bf16 %v2008_v62, %v2007_v51 }
 0x1d2   : > { %2222 = vmatmul.bf16.gmra.mxu1 %v2040_v63 }
 0x1e1   : > { %v6122_v0 = vpop.permute.xlu0 %6121 }
 0x1e2   : > { %v6124_v2 = vunpack.i.h.bf16 %v6122_v0  ;;  %v6123_v38 = vunpack.i.l.bf16 %v6122_v0 }
 0x1e4   : > { %v2018_v8 = vsel %vm517_vm0, %v6758_v52, %v6124_v2  ;;  %v2017_v9 = vsel %vm517_vm0, %v6614_v40, %v6123_v38 }
 0x1e9   : > { %v6127_v16 = vpop.permute.xlu0 %6126 }
 0x1ea   : > { %v6142_v1 = vpop.permute.xlu2 %6141  ;;  %v6129_v21 = vunpack.i.h.bf16 %v6127_v16  ;;  %v6128_v19 = vunpack.i.l.bf16 %v6127_v16 }
 0x1eb   : > { %v6144_v11 = vunpack.i.h.bf16 %v6142_v1  ;;  %v6143_v14 = vunpack.i.l.bf16 %v6142_v1 }
 0x1ec   : > { %v1992_v23 = vsel %vm517_vm0, %v6616_v41, %v6129_v21  ;;  %v1991_v24 = vsel %vm517_vm0, %v6610_v34, %v6128_v19 }
 0x1f2   : > { %v6147_v22 = vpop.permute.xlu2 %6146 }
 0x1f3   : > { %v6149_v25 = vunpack.i.h.bf16 %v6147_v22  ;;  %v6148_v26 = vunpack.i.l.bf16 %v6147_v22 }
 0x203   : > { %v6132_v12 = vpop.permute.xlu1 %6131 }
 0x204   : > { %v6134_v4 = vunpack.i.h.bf16 %v6132_v12  ;;  %v6133_v6 = vunpack.i.l.bf16 %v6132_v12 }
 0x206   : > { %v2025_v17 = vsel %vm1995_vm10, %v2017_v9, %v6133_v6  ;;  %v2026_v10 = vsel %vm1995_vm10, %v2018_v8, %v6134_v4 }
 0x207   : > { %v2033_v30 = vsel %vm2004_vm11, %v2025_v17, %v6143_v14  ;;  %v2034_v20 = vsel %vm2004_vm11, %v2026_v10, %v6144_v11 }
 0x208   : > { %v2044_v60 = vpack.c.bf16 %v2034_v20, %v2033_v30 }
 0x20a   : > { %2256 = vmatmul.bf16.gmra.mxu2 %v2044_v60  ;;  %v6172_v54 = vpop.permute.xlu2 %6171 }
 0x20b   : > { %v6137_v52 = vpop.permute.xlu1 %6136  ;;  %v6174_v61 = vunpack.i.h.bf16 %v6172_v54  ;;  %v6173_v3 = vunpack.i.l.bf16 %v6172_v54 }
 0x20c   : > { %v6139_v40 = vunpack.i.h.bf16 %v6137_v52  ;;  %v6138_v45 = vunpack.i.l.bf16 %v6137_v52 }
 0x20d   : > { %v2247_v48 = vpop.f32.mrf.mxu2 }
 0x20e   : > { %v2000_v28 = vsel %vm1995_vm10, %v1991_v24, %v6138_v45  ;;  %v2001_v31 = vsel %vm1995_vm10, %v1992_v23, %v6139_v40 }
 0x20f   : > { %v2009_v41 = vsel %vm2004_vm11, %v2000_v28, %v6148_v26  ;;  %v2010_v34 = vsel %vm2004_vm11, %v2001_v31, %v6149_v25 }
 0x210   : > { %v2043_v36 = vpack.c.bf16 %v2010_v34, %v2009_v41  ;;  %v2218_v29 = vpop.f32.mrf.mxu1 }
 0x211   : > { %v2219_v37 = vadd.f32 %v6848_v35, %v2218_v29 }
 0x212   : > { %2227 = vmatmul.bf16.gmra.mxu1 %v2043_v36  ;;  %v6177_v24 = vpop.permute.xlu2 %6176 }
 0x213   : > { %v2248_v13 = vadd.f32 %v2247_v48, %v2219_v37 }
 0x215   : > { %v2277_v27 = vadd.f32 %v2276_v47, %v2248_v13  ;;  %v2249_v43 = vpop.f32.mrf.mxu2  ;;  %v6179_v13 = vunpack.i.h.bf16 %v6177_v24 }
 0x217   : > { %v2296_v46 = vmax.f32 %v2277_v27, 0.0 }
 0x218   : > { %v2220_v42 = vpop.f32.mrf.mxu1 }
 0x219   : > { %v2312_v5 = vrot.slane %v2296_v46, 2  ;;  %v2221_v33 = vadd.f32 %v6848_v35, %v2220_v42  ;;  %v2313_v32 = vrot.slane %v2296_v46, 4  ;;  %v2314_v55 = vrot.slane %v2296_v46, 6 }
 0x21a   : > { %v4957_v58 = vrot.slane %v2296_v46, 9 }
 0x21b   : > { %v2250_v56 = vadd.f32 %v2249_v43, %v2221_v33  ;;  %v4958_v59 = vrot.slane %v2312_v5, 9  ;;  %v4959_v39 = vrot.slane %v2313_v32, 9  ;;  %v4960_v51 = vrot.slane %v2314_v55, 9 }
 0x21c   : > { %v2456_v15 = vmax.f32 %v2296_v46, %v4957_v58 }
 0x21d   : > { %v2279_v7 = vadd.f32 %v2278_v57, %v2250_v56  ;;  %v2457_v0 = vmax.f32 %v2312_v5, %v4958_v59  ;;  %v2458_v60 = vmax.f32 %v2313_v32, %v4959_v39  ;;  %v2459_v21 = vmax.f32 %v2314_v55, %v4960_v51  ;;  %v2579_v59 = vld [vmem:[#allocation3 + $0x1] sm:$0xf] }
 0x21e   : > { %v6178_v5 = vunpack.i.l.bf16 %v6177_v24 }
 0x21f   : > { %v2297_v62 = vmax.f32 %v2279_v7, 0.0 }
 0x221   : > { %v6152_v63 = vpop.permute.xlu0 %6151  ;;  %v2315_v12 = vrot.slane %v2297_v62, 2  ;;  %v2316_v4 = vrot.slane %v2297_v62, 4  ;;  %v2317_v6 = vrot.slane %v2297_v62, 6  ;;  %v4961_v8 = vrot.slane %v2297_v62, 9 }
 0x222   : > { %v6154_v1 = vunpack.i.h.bf16 %v6152_v63  ;;  %v6153_v2 = vunpack.i.l.bf16 %v6152_v63 }
 0x223   : > { %v6162_v38 = vpop.permute.xlu1 %6161  ;;  %v4962_v17 = vrot.slane %v2315_v12, 9  ;;  %v4963_v10 = vrot.slane %v2316_v4, 9  ;;  %v4964_v30 = vrot.slane %v2317_v6, 9  ;;  %v2460_v20 = vmax.f32 %v2297_v62, %v4961_v8 }
 0x224   : > { %v2020_v9 = vsel %vm517_vm0, %v6797_v18, %v6154_v1  ;;  %v2019_v11 = vsel %vm517_vm0, %v6750_v49, %v6153_v2  ;;  %v6164_v14 = vunpack.i.h.bf16 %v6162_v38  ;;  %v6163_v16 = vunpack.i.l.bf16 %v6162_v38 }
 0x225   : > { %v2461_v52 = vmax.f32 %v2315_v12, %v4962_v17  ;;  %v2462_v40 = vmax.f32 %v2316_v4, %v4963_v10  ;;  %v2463_v45 = vmax.f32 %v2317_v6, %v4964_v30  ;;  %v2488_v23 = vmax.f32 %v2456_v15, %v2460_v20 }
 0x226   : > { %v2027_v19 = vsel %vm1995_vm10, %v2019_v11, %v6163_v16  ;;  %v2028_v22 = vsel %vm1995_vm10, %v2020_v9, %v6164_v14 }
 0x227   : > { %v2035_v18 = vsel %vm2004_vm11, %v2027_v19, %v6173_v3  ;;  %v2036_v49 = vsel %vm2004_vm11, %v2028_v22, %v6174_v61  ;;  %v2489_v25 = vmax.f32 %v2457_v0, %v2461_v52  ;;  %v2490_v26 = vmax.f32 %v2458_v60, %v2462_v40  ;;  %v2583_v3 = vld [vmem:[#allocation3 + $0x2] sm:$0xf]  ;;  %v2281_v0 = vpop.f32.mrf.mxu3 }
 0x228   : > { %v2491_v28 = vmax.f32 %v2459_v21, %v2463_v45  ;;  %v2047_v29 = vpack.c.bf16 %v2036_v49, %v2035_v18  ;;  %v2537_v48 = vperm.slane %v2488_v23, 0 }
 0x229   : > { %v6157_v31 = vpop.permute.xlu0 %6156  ;;  %v2538_v37 = vperm.slane %v2489_v25, 0  ;;  %v2539_v53 = vperm.slane %v2490_v26, 0 }
 0x22a   : > { %v6159_v41 = vunpack.i.h.bf16 %v6157_v31  ;;  %v6158_v34 = vunpack.i.l.bf16 %v6157_v31  ;;  %2261 = vmatmul.bf16.gmra.mxu2 %v2047_v29  ;;  %v2540_v33 = vperm.slane %v2491_v28, 0 }
 0x22b   : > { %v6167_v36 = vpop.permute.xlu1 %6166  ;;  %v2553_v43 = vsel %vm1642_vm3, %v2538_v37, %v2537_v48 }
 0x22c   : > { %v6169_v47 = vunpack.i.h.bf16 %v6167_v36  ;;  %v1994_v27 = vsel %vm517_vm0, %v6752_v50, %v6159_v41  ;;  %v1993_v46 = vsel %vm517_vm0, %v6760_v44, %v6158_v34  ;;  %v6168_v42 = vunpack.i.l.bf16 %v6167_v36 }
 0x22d   : > { %v2554_v32 = vsel %vm1644_vm4, %v2539_v53, %v2553_v43 }
 0x22e   : > { %v2003_v54 = vsel %vm1995_vm10, %v1994_v27, %v6169_v47  ;;  %v2002_v55 = vsel %vm1995_vm10, %v1993_v46, %v6168_v42  ;;  %v2555_v57 = vsel %vm1646_vm5, %v2540_v33, %v2554_v32 }
 0x22f   : > { %v2012_v56 = vsel %vm2004_vm11, %v2003_v54, %v6179_v13  ;;  %v2011_v50 = vsel %vm2004_vm11, %v2002_v55, %v6178_v5  ;;  %2571 = vst.msk [vmem:[#allocation3 + $0x9] sm:$0xf] %vm2570_vm14, %v2555_v57  ;;  %v2283_v14 = vpop.f32.mrf.mxu3 }
 0x230   : > { %v2046_v44 = vpack.c.bf16 %v2012_v56, %v2011_v50 }
 0x232   : > { %2232 = vmatmul.bf16.gmra.mxu1 %v2046_v44 }
 0x236   : > { %v2576_v58 = vld [vmem:[#allocation3 + $0x8] sm:$0xf] }
 0x237   : > { %2618 = vst [vmem:[#allocation1 + $0x1] ss:$2 sm:$0xff] %v2576_v58  ;;  %v2580_v61 = vld [vmem:[#allocation3 + $0x9] sm:$0xf] }
 0x238   : > { %v2584_v51 = vld [vmem:[#allocation3 + $0xa] sm:$0xf] }
 0x239   : > { %v2587_v2 = vld [vmem:[#allocation3 + $0x8] sm:$0xf] }
 0x23a   : > { %v2591_v55 = vld [vmem:[#allocation3 + $0x9] sm:$0xf] }
 0x23b   : > { %v2595_v50 = vld [vmem:[#allocation3 + $0xa] sm:$0xf] }
 0x23e   : > { %v6894_v7 = vld.sshfl [vmem:[#allocation1] sm:$0xff pattern:$0x75316420] }
 0x23f   : > { %2631 = vst [vmem:[#allocation1] ss:$2 sm:$0xff] %v2579_v59 }
 0x240   : > { %2633 = vst [vmem:[#allocation1 + $0x1] ss:$2 sm:$0xff] %v2580_v61 }
 0x247   : > { %v6896_v39 = vld.sshfl [vmem:[#allocation1] sm:$0xff pattern:$0x75316420] }
 0x248   : > { %2650 = vst [vmem:[#allocation1] ss:$2 sm:$0xff] %v2583_v3 }
 0x249   : > { %2652 = vst [vmem:[#allocation1 + $0x1] ss:$2 sm:$0xff] %v2584_v51  ;;  %v2286_v51 = vpop.f32.mrf.mxu3 }
 0x24d   : > { %v2252_v63 = vpop.f32.mrf.mxu2 }
 0x24f   : > { %v2223_v62 = vpop.f32.mrf.mxu1 }
 0x250   : > { %v2224_v15 = vadd.f32 %v6848_v35, %v2223_v62  ;;  %v6899_v38 = vld.sshfl [vmem:[#allocation1] sm:$0xff pattern:$0x75316420] }
 0x251   : > { %2665 = vst [vmem:[#allocation1] ss:$2 sm:$0xff] %v2587_v2 }
 0x252   : > { %v2253_v1 = vadd.f32 %v2252_v63, %v2224_v15 }
 0x254   : > { %v2282_v12 = vadd.f32 %v2281_v0, %v2253_v1 }
 0x255   : > { %v2254_v9 = vpop.f32.mrf.mxu2 }
 0x256   : > { %v2298_v6 = vmax.f32 %v2282_v12, 0.0 }
 0x257   : > { %v2225_v4 = vpop.f32.mrf.mxu1 }
 0x258   : > { %v2226_v8 = vadd.f32 %v6848_v35, %v2225_v4  ;;  %v2318_v16 = vrot.slane %v2298_v6, 2  ;;  %v2319_v17 = vrot.slane %v2298_v6, 4  ;;  %v2320_v10 = vrot.slane %v2298_v6, 6 }
 0x259   : > { %v4965_v20 = vrot.slane %v2298_v6, 9 }
 0x25a   : > { %v2255_v11 = vadd.f32 %v2254_v9, %v2226_v8  ;;  %v4966_v21 = vrot.slane %v2318_v16, 9  ;;  %v4967_v19 = vrot.slane %v2319_v17, 9  ;;  %v4968_v22 = vrot.slane %v2320_v10, 9  ;;  %v2288_v8 = vpop.f32.mrf.mxu3 }
 0x25b   : > { %v2464_v18 = vmax.f32 %v2298_v6, %v4965_v20 }
 0x25c   : > { %v2284_v30 = vadd.f32 %v2283_v14, %v2255_v11  ;;  %v2465_v28 = vmax.f32 %v2318_v16, %v4966_v21  ;;  %v2466_v31 = vmax.f32 %v2319_v17, %v4967_v19  ;;  %v2467_v41 = vmax.f32 %v2320_v10, %v4968_v22 }
 0x25e   : > { %v2299_v60 = vmax.f32 %v2284_v30, 0.0 }
 0x260   : > { %v2321_v52 = vrot.slane %v2299_v60, 2  ;;  %v2322_v40 = vrot.slane %v2299_v60, 4  ;;  %v2323_v45 = vrot.slane %v2299_v60, 6  ;;  %v4969_v23 = vrot.slane %v2299_v60, 9 }
 0x262   : > { %v4970_v49 = vrot.slane %v2321_v52, 9  ;;  %v4971_v24 = vrot.slane %v2322_v40, 9  ;;  %v4972_v25 = vrot.slane %v2323_v45, 9  ;;  %v2468_v26 = vmax.f32 %v2299_v60, %v4969_v23 }
 0x264   : > { %v2469_v34 = vmax.f32 %v2321_v52, %v4970_v49  ;;  %v2470_v36 = vmax.f32 %v2322_v40, %v4971_v24  ;;  %v2471_v29 = vmax.f32 %v2323_v45, %v4972_v25  ;;  %v2492_v48 = vmax.f32 %v2464_v18, %v2468_v26 }
 0x266   : > { %v2493_v37 = vmax.f32 %v2465_v28, %v2469_v34  ;;  %v2494_v53 = vmax.f32 %v2466_v31, %v2470_v36  ;;  %v2495_v47 = vmax.f32 %v2467_v41, %v2471_v29  ;;  %v2541_v13 = vperm.slane %v2492_v48, 0 }
 0x268   : > { %v2542_v27 = vperm.slane %v2493_v37, 0  ;;  %v2543_v46 = vperm.slane %v2494_v53, 0  ;;  %v2544_v42 = vperm.slane %v2495_v47, 0 }
 0x26a   : > { %v2556_v5 = vsel %vm1642_vm3, %v2542_v27, %v2541_v13 }
 0x26b   : > { %v2557_v33 = vsel %vm1644_vm4, %v2543_v46, %v2556_v5 }
 0x26c   : > { %v2558_v43 = vsel %vm1646_vm5, %v2544_v42, %v2557_v33 }
 0x26d   : > { %2572 = vst.msk [vmem:[#allocation3 + $0x11] sm:$0xf] %vm2570_vm14, %v2558_v43 }
 0x274   : > { %v2577_v54 = vld [vmem:[#allocation3 + $0x10] sm:$0xf] }
 0x275   : > { %v2588_v32 = vld [vmem:[#allocation3 + $0x10] sm:$0xf]  ;;  %2620 = vst [vmem:[#allocation1 + $0x10] ss:$2 sm:$0xff] %v2577_v54  ;;  %v2291_v54 = vpop.f32.mrf.mxu3 }
 0x276   : > { %2667 = vst [vmem:[#allocation1 + $0x1] ss:$2 sm:$0xff] %v2588_v32  ;;  %v2592_v57 = vld [vmem:[#allocation3 + $0x11] sm:$0xf] }
 0x277   : > { %v2596_v58 = vld [vmem:[#allocation3 + $0x12] sm:$0xf] }
 0x278   : > { %v2600_v62 = vld [vmem:[#allocation3 + $0x10] sm:$0xf] }
 0x27d   : > { %v6906_v56 = vld.sshfl [vmem:[#allocation1] sm:$0xff pattern:$0x75316420] }
 0x27e   : > { %2684 = vst [vmem:[#allocation1] ss:$2 sm:$0xff] %v2591_v55 }
 0x27f   : > { %2686 = vst [vmem:[#allocation1 + $0x1] ss:$2 sm:$0xff] %v2592_v57 }
 0x286   : > { %v6908_v44 = vld.sshfl [vmem:[#allocation1] sm:$0xff pattern:$0x75316420] }
 0x287   : > { %2699 = vst [vmem:[#allocation1] ss:$2 sm:$0xff] %v2595_v50 }
 0x288   : > { %2701 = vst [vmem:[#allocation1 + $0x1] ss:$2 sm:$0xff] %v2596_v58 }
 0x28d   : > { %v2257_v61 = vpop.f32.mrf.mxu2 }
 0x28f   : > { %v2228_v59 = vpop.f32.mrf.mxu1  ;;  %v6911_v63 = vld.sshfl [vmem:[#allocation1] sm:$0xff pattern:$0x75316420] }
 0x290   : > { %v2229_v3 = vadd.f32 %v6848_v35, %v2228_v59  ;;  %2718 = vst [vmem:[#allocation1] ss:$2 sm:$0xff] %v2600_v62 }
 0x292   : > { %v2258_v15 = vadd.f32 %v2257_v61, %v2229_v3 }
 0x294   : > { %v2287_v0 = vadd.f32 %v2286_v51, %v2258_v15 }
 0x295   : > { %v2259_v4 = vpop.f32.mrf.mxu2 }
 0x296   : > { %v2300_v2 = vmax.f32 %v2287_v0, 0.0  ;;  %v2293_v0 = vpop.f32.mrf.mxu3 }
 0x297   : > { %v2230_v1 = vpop.f32.mrf.mxu1 }
 0x298   : > { %v2231_v12 = vadd.f32 %v6848_v35, %v2230_v1  ;;  %v2324_v9 = vrot.slane %v2300_v2, 2  ;;  %v2325_v11 = vrot.slane %v2300_v2, 4  ;;  %v2326_v14 = vrot.slane %v2300_v2, 6 }
 0x299   : > { %v4973_v17 = vrot.slane %v2300_v2, 9 }
 0x29a   : > { %v2260_v6 = vadd.f32 %v2259_v4, %v2231_v12  ;;  %v4974_v30 = vrot.slane %v2324_v9, 9  ;;  %v4975_v20 = vrot.slane %v2325_v11, 9  ;;  %v4976_v60 = vrot.slane %v2326_v14, 9  ;;  %v2581_v12 = vld [vmem:[#allocation3 + $0x11] sm:$0xf] }
 0x29b   : > { %v2472_v40 = vmax.f32 %v2300_v2, %v4973_v17 }
 0x29c   : > { %v2289_v16 = vadd.f32 %v2288_v8, %v2260_v6  ;;  %v2473_v24 = vmax.f32 %v2324_v9, %v4974_v30  ;;  %v2474_v25 = vmax.f32 %v2325_v11, %v4975_v20  ;;  %v2475_v26 = vmax.f32 %v2326_v14, %v4976_v60  ;;  %v2604_v8 = vld [vmem:[#allocation3 + $0x11] sm:$0xf] }
 0x29e   : > { %v2301_v10 = vmax.f32 %v2289_v16, 0.0 }
 0x2a0   : > { %v2327_v21 = vrot.slane %v2301_v10, 2  ;;  %v2328_v19 = vrot.slane %v2301_v10, 4  ;;  %v2329_v22 = vrot.slane %v2301_v10, 6  ;;  %v4977_v52 = vrot.slane %v2301_v10, 9 }
 0x2a2   : > { %v4978_v45 = vrot.slane %v2327_v21, 9  ;;  %v4979_v23 = vrot.slane %v2328_v19, 9  ;;  %v4980_v18 = vrot.slane %v2329_v22, 9  ;;  %v2476_v49 = vmax.f32 %v2301_v10, %v4977_v52 }
 0x2a4   : > { %v2477_v28 = vmax.f32 %v2327_v21, %v4978_v45  ;;  %v2478_v31 = vmax.f32 %v2328_v19, %v4979_v23  ;;  %v2479_v41 = vmax.f32 %v2329_v22, %v4980_v18  ;;  %v2496_v34 = vmax.f32 %v2472_v40, %v2476_v49 }
 0x2a6   : > { %v2497_v36 = vmax.f32 %v2473_v24, %v2477_v28  ;;  %v2498_v29 = vmax.f32 %v2474_v25, %v2478_v31  ;;  %v2499_v48 = vmax.f32 %v2475_v26, %v2479_v41  ;;  %v2545_v37 = vperm.slane %v2496_v34, 0  ;;  %v2585_v31 = vld [vmem:[#allocation3 + $0x12] sm:$0xf] }
 0x2a8   : > { %v2546_v53 = vperm.slane %v2497_v36, 0  ;;  %v2547_v47 = vperm.slane %v2498_v29, 0  ;;  %v2548_v13 = vperm.slane %v2499_v48, 0 }
 0x2aa   : > { %v2559_v27 = vsel %vm1642_vm3, %v2546_v53, %v2545_v37 }
 0x2ab   : > { %v2560_v46 = vsel %vm1644_vm4, %v2547_v47, %v2559_v27 }
 0x2ac   : > { %v2561_v42 = vsel %vm1646_vm5, %v2548_v13, %v2560_v46 }
 0x2ad   : > { %2573 = vst.msk [vmem:[#allocation3 + $0x19] sm:$0xf] %vm2570_vm14, %v2561_v42  ;;  %v2262_v5 = vpop.f32.mrf.mxu2  ;;  %v2608_v42 = vld [vmem:[#allocation3 + $0x12] sm:$0xf] }
 0x2af   : > { %v2233_v33 = vpop.f32.mrf.mxu1 }
 0x2b0   : > { %v2234_v43 = vadd.f32 %v6848_v35, %v2233_v33 }
 0x2b2   : > { %v2263_v32 = vadd.f32 %v2262_v5, %v2234_v43 }
 0x2b4   : > { %v2578_v55 = vld [vmem:[#allocation3 + $0x18] sm:$0xf]  ;;  %v2292_v57 = vadd.f32 %v2291_v54, %v2263_v32 }
 0x2b5   : > { %v2601_v50 = vld [vmem:[#allocation3 + $0x18] sm:$0xf]  ;;  %2622 = vst [vmem:[#allocation1 + $0x11] ss:$2 sm:$0xff] %v2578_v55  ;;  %v2264_v3 = vpop.f32.mrf.mxu2 }
 0x2b6   : > { %v2302_v58 = vmax.f32 %v2292_v57, 0.0  ;;  %2720 = vst [vmem:[#allocation1 + $0x1] ss:$2 sm:$0xff] %v2601_v50  ;;  %v2582_v4 = vld [vmem:[#allocation3 + $0x19] sm:$0xf] }
 0x2b7   : > { %v2235_v59 = vpop.f32.mrf.mxu1  ;;  %v2605_v21 = vld [vmem:[#allocation3 + $0x19] sm:$0xf] }
 0x2b8   : > { %v2236_v61 = vadd.f32 %v6848_v35, %v2235_v59  ;;  %v2330_v51 = vrot.slane %v2302_v58, 2  ;;  %v2331_v62 = vrot.slane %v2302_v58, 4  ;;  %v2332_v1 = vrot.slane %v2302_v58, 6  ;;  %v2586_v41 = vld [vmem:[#allocation3 + $0x1a] sm:$0xf] }
 0x2b9   : > { %v4981_v6 = vrot.slane %v2302_v58, 9  ;;  %v2609_v48 = vld [vmem:[#allocation3 + $0x1a] sm:$0xf] }
 0x2ba   : > { %v2265_v15 = vadd.f32 %v2264_v3, %v2236_v61  ;;  %v4982_v11 = vrot.slane %v2330_v51, 9  ;;  %v4983_v14 = vrot.slane %v2331_v62, 9  ;;  %v4984_v35 = vrot.slane %v2332_v1, 9  ;;  %v2589_v32 = vld [vmem:[#allocation3 + $0x18] sm:$0xf]  ;;  %v5828_v61 = vld [vmem:[%s8062_s5 + $0x38] sm:$0xff] }
 0x2bb   : > { %v2480_v19 = vmax.f32 %v2302_v58, %v4981_v6  ;;  %v2593_v57 = vld [vmem:[#allocation3 + $0x19] sm:$0xf]  ;;  %v5844_v3 = vld [vmem:[%s8062_s5 + $0xb8] sm:$0xff]  ;;  %3071 = vmatpush.bf16.msrb.mxu3 %v5828_v61 }
 0x2bc   : > { %v2294_v2 = vadd.f32 %v2293_v0, %v2265_v15  ;;  %v6920_v9 = vld.sshfl [vmem:[#allocation1 + $0x10] sm:$0xff pattern:$0x75316420]  ;;  %v2481_v23 = vmax.f32 %v2330_v51, %v4982_v11  ;;  %v2482_v18 = vmax.f32 %v2331_v62, %v4983_v14  ;;  %v2483_v49 = vmax.f32 %v2332_v1, %v4984_v35  ;;  %v2597_v51 = vld [vmem:[#allocation3 + $0x1a] sm:$0xf]  ;;  %3099 = vmatpush.bf16.msrb.mxu2 %v5844_v3  ;;  %v5836_v1 = vld [vmem:[%s8062_s5 + $0x78] sm:$0xff] }
 0x2bd   : > { %2635 = vst [vmem:[#allocation1 + $0x10] ss:$2 sm:$0xff] %v2581_v12  ;;  %v6922_v17 = vld.sshfl [vmem:[#allocation1] sm:$0xff pattern:$0x75316420]  ;;  %v5827_v15 = vld [vmem:[%s8062_s5 + $0x30] sm:$0xff]  ;;  %3085 = vmatpush.bf16.msrb.mxu1 %v5836_v1 }
 0x2be   : > { %v2303_v16 = vmax.f32 %v2294_v2, 0.0  ;;  %2637 = vst [vmem:[#allocation1 + $0x11] ss:$2 sm:$0xff] %v2582_v4  ;;  %v5843_v0 = vld [vmem:[%s8062_s5 + $0xb0] sm:$0xff]  ;;  %v5826_v2 = vld [vmem:[%s8062_s5 + $0x28] sm:$0xff]  ;;  %v5825_v6 = vld [vmem:[%s8062_s5 + $0x20] sm:$0xff] }
 0x2bf   : > { %2733 = vst [vmem:[#allocation1] ss:$2 sm:$0xff] %v2604_v8  ;;  %3072 = vmatpush.bf16.msrb.mxu3 %v5827_v15  ;;  %v5842_v12 = vld [vmem:[%s8062_s5 + $0xa8] sm:$0xff]  ;;  %v2603_v4 = vld [vmem:[#allocation3 + $0x28] sm:$0xf] }
 0x2c0   : > { %v2333_v10 = vrot.slane %v2303_v16, 2  ;;  %v2334_v30 = vrot.slane %v2303_v16, 4  ;;  %v2335_v20 = vrot.slane %v2303_v16, 6  ;;  %v4985_v60 = vrot.slane %v2303_v16, 9  ;;  %2735 = vst [vmem:[#allocation1 + $0x1] ss:$2 sm:$0xff] %v2605_v21  ;;  %3100 = vmatpush.bf16.msrb.mxu2 %v5843_v0 }
 0x2c1   : > { %v5823_v35 = vld [vmem:[%s8062_s5 + $0x10] sm:$0xff] }
 0x2c2   : > { %v4986_v22 = vrot.slane %v2333_v10, 9  ;;  %v4987_v52 = vrot.slane %v2334_v30, 9  ;;  %v4988_v40 = vrot.slane %v2335_v20, 9  ;;  %v2484_v45 = vmax.f32 %v2303_v16, %v4985_v60  ;;  %v5824_v16 = vld [vmem:[%s8062_s5 + $0x18] sm:$0xff]  ;;  %v2611_v60 = vld [vmem:[#allocation3 + $0x2a] sm:$0xf] }
 0x2c3   : > { %3073 = vmatpush.bf16.msrb.mxu3 %v5826_v2  ;;  %v5935_v1 = vld [vmem:[%s8064_s7 + $0x274] sm:$0xf]  ;;  %v5458_v2 = vld [vmem:[%s8064_s7 + $0x278] sm:$0xf0] }
 0x2c4   : > { %v2485_v24 = vmax.f32 %v2333_v10, %v4986_v22  ;;  %v2486_v25 = vmax.f32 %v2334_v30, %v4987_v52  ;;  %v2487_v26 = vmax.f32 %v2335_v20, %v4988_v40  ;;  %v2500_v28 = vmax.f32 %v2480_v19, %v2484_v45  ;;  %3101 = vmatpush.bf16.msrb.mxu2 %v5842_v12  ;;  %v2607_v10 = vld [vmem:[#allocation3 + $0x29] sm:$0xf]  ;;  %v5821_v52 = vld [vmem:[%s8062_s5] sm:$0xff]  ;;  %v5450_v12 = vld [vmem:[%s8064_s7 + $0x268] sm:$0xf0] }
 0x2c5   : > { %v2639_v37 = vld.sshfl [vmem:[#allocation1 + $0x10] sm:$0xff pattern:$0x75316420]  ;;  %v5841_v45 = vld [vmem:[%s8062_s5 + $0xa0] sm:$0xff] }
 0x2c6   : > { %v2501_v34 = vmax.f32 %v2481_v23, %v2485_v24  ;;  %v2502_v36 = vmax.f32 %v2482_v18, %v2486_v25  ;;  %v2503_v29 = vmax.f32 %v2483_v49, %v2487_v26  ;;  %2654 = vst [vmem:[#allocation1 + $0x10] ss:$2 sm:$0xff] %v2585_v31  ;;  %v2549_v53 = vperm.slane %v2500_v28, 0  ;;  %v5835_v40 = vld [vmem:[%s8062_s5 + $0x70] sm:$0xff]  ;;  %v5834_v23 = vld [vmem:[%s8062_s5 + $0x68] sm:$0xff]  ;;  %v5840_v18 = vld [vmem:[%s8062_s5 + $0x98] sm:$0xff] }
 0x2c7   : > { %v6180_v27 = vpack.i.bf16 %v2639_v37, %v6896_v39  ;;  %2656 = vst [vmem:[#allocation1 + $0x11] ss:$2 sm:$0xff] %v2586_v41  ;;  %v6925_v46 = vld.sshfl [vmem:[#allocation1] sm:$0xff pattern:$0x75316420]  ;;  %3074 = vmatpush.bf16.msrb.mxu3 %v5825_v6  ;;  %3086 = vmatpush.bf16.msrb.mxu1 %v5835_v40  ;;  %v5839_v24 = vld [vmem:[%s8062_s5 + $0x90] sm:$0xff] }
 0x2c8   : > { %v2550_v47 = vperm.slane %v2501_v34, 0  ;;  %v2551_v13 = vperm.slane %v2502_v36, 0  ;;  %2754 = vst [vmem:[#allocation1 + $0x1] ss:$2 sm:$0xff] %v2609_v48  ;;  %v2552_v5 = vperm.slane %v2503_v29, 0  ;;  %3102 = vmatpush.bf16.msrb.mxu2 %v5841_v45  ;;  %v5833_v49 = vld [vmem:[%s8062_s5 + $0x60] sm:$0xff] }
 0x2c9   : > { %6181 = vrot.lane.b32.xlu0 %v6180_v27, %s6269_s30  ;;  %2752 = vst [vmem:[#allocation1] ss:$2 sm:$0xff] %v2608_v42  ;;  %v5832_v25 = vld [vmem:[%s8062_s5 + $0x58] sm:$0xff]  ;;  %v5838_v26 = vld [vmem:[%s8062_s5 + $0x88] sm:$0xff]  ;;  %v5831_v28 = vld [vmem:[%s8062_s5 + $0x50] sm:$0xff] }
 0x2ca   : > { %v2562_v33 = vsel %vm1642_vm3, %v2550_v47, %v2549_v53  ;;  %v5837_v31 = vld [vmem:[%s8062_s5 + $0x80] sm:$0xff]  ;;  %v5830_v41 = vld [vmem:[%s8062_s5 + $0x48] sm:$0xff]  ;;  %v5852_v36 = vld [vmem:[%s8062_s5 + $0xf8] sm:$0xff] }
 0x2cb   : > { %v2563_v43 = vsel %vm1644_vm4, %v2551_v13, %v2562_v33  ;;  %3075 = vmatpush.bf16.msrb.mxu3 %v5824_v16  ;;  %3087 = vmatpush.bf16.msrb.mxu1 %v5834_v23  ;;  %v5829_v34 = vld [vmem:[%s8062_s5 + $0x40] sm:$0xff]  ;;  %v5856_v29 = vld [vmem:[%s8062_s5 + $0x118] sm:$0xff]  ;;  %v5851_v48 = vld [vmem:[%s8062_s5 + $0xf0] sm:$0xff] }
 0x2cc   : > { %v2564_v54 = vsel %vm1646_vm5, %v2552_v5, %v2563_v43  ;;  %3103 = vmatpush.bf16.msrb.mxu2 %v5840_v18  ;;  %v5855_v37 = vld [vmem:[%s8062_s5 + $0x110] sm:$0xff]  ;;  %v5854_v27 = vld [vmem:[%s8062_s5 + $0x108] sm:$0xff]  ;;  %v5853_v43 = vld [vmem:[%s8062_s5 + $0x100] sm:$0xff] }
 0x2cd   : > { %2574 = vst.msk [vmem:[#allocation3 + $0x21] sm:$0xf] %vm2570_vm14, %v2564_v54  ;;  %v5850_v5 = vld [vmem:[%s8062_s5 + $0xe8] sm:$0xff]  ;;  %v5849_v54 = vld [vmem:[%s8062_s5 + $0xe0] sm:$0xff]  ;;  %v5184_v23 = vld [vmem:[%s8064_s7 + $0x50] sm:$0xf] }
 0x2ce   : > { %v6932_v55 = vld.sshfl [vmem:[#allocation1 + $0x10] sm:$0xff pattern:$0x75316420]  ;;  %v5870_v40 = vld [vmem:[%s8064_s7 + $0x64] sm:$0xf0] }
 0x2cf   : > { %2669 = vst [vmem:[#allocation1 + $0x10] ss:$2 sm:$0xff] %v2589_v32  ;;  %3076 = vmatpush.bf16.msrb.mxu3 %v5823_v35  ;;  %3088 = vmatpush.bf16.msrb.mxu1 %v5833_v49  ;;  %v5868_v18 = vld [vmem:[%s8064_s7 + $0x54] sm:$0xf0]  ;;  %v5264_v49 = vld [vmem:[%s8064_s7 + $0xf0] sm:$0xf] }
 0x2d0   : > { %3104 = vmatpush.bf16.msrb.mxu2 %v5839_v24  ;;  %v5185_v24 = vor.u32 %v5868_v18, %v5184_v23  ;;  %v5208_v18 = vld [vmem:[%s8064_s7 + $0x80] sm:$0xf] }
 0x2d3   : > { %3089 = vmatpush.bf16.msrb.mxu1 %v5832_v25  ;;  %v5888_v25 = vld [vmem:[%s8064_s7 + $0xf4] sm:$0xf0] }
 0x2d4   : > { %v2590_v39 = vld [vmem:[#allocation3 + $0x20] sm:$0xf]  ;;  %3105 = vmatpush.bf16.msrb.mxu2 %v5838_v26  ;;  %v5929_v26 = vld [vmem:[%s8064_s7 + $0x244] sm:$0xf] }
 0x2d5   : > { %2671 = vst [vmem:[#allocation1 + $0x11] ss:$2 sm:$0xff] %v2590_v39  ;;  %v2594_v58 = vld [vmem:[#allocation3 + $0x21] sm:$0xf] }
 0x2d6   : > { %v2602_v8 = vld [vmem:[#allocation3 + $0x20] sm:$0xf] }
 0x2d7   : > { %v2606_v30 = vld [vmem:[#allocation3 + $0x21] sm:$0xf]  ;;  %3090 = vmatpush.bf16.msrb.mxu1 %v5831_v28 }
 0x2d8   : > { %v2610_v21 = vld [vmem:[#allocation3 + $0x22] sm:$0xf]  ;;  %3106 = vmatpush.bf16.msrb.mxu2 %v5837_v31  ;;  %v5265_v31 = vor.u32 %v5888_v25, %v5264_v49 }
 0x2d9   : > { %v5434_v28 = vld [vmem:[%s8064_s7 + $0x248] sm:$0xf0]  ;;  %v5874_v49 = vld [vmem:[%s8064_s7 + $0x84] sm:$0xf0] }
 0x2da   : > { %v5209_v25 = vor.u32 %v5874_v49, %v5208_v18  ;;  %v5336_v18 = vld [vmem:[%s8064_s7 + $0x180] sm:$0xf]  ;;  %v5906_v49 = vld [vmem:[%s8064_s7 + $0x184] sm:$0xf0] }
 0x2db   : > { %3091 = vmatpush.bf16.msrb.mxu1 %v5830_v41  ;;  %v5437_v41 = vor.u32 %v5929_v26, %v5434_v28  ;;  %v5894_v26 = vld [vmem:[%s8064_s7 + $0x124] sm:$0xf0]  ;;  %v5376_v28 = vld [vmem:[%s8064_s7 + $0x1d0] sm:$0xf] }
 0x2dc   : > { %v2673_v50 = vld.sshfl [vmem:[#allocation1 + $0x10] sm:$0xff pattern:$0x75316420] }
 0x2dd   : > { %2688 = vst [vmem:[#allocation1 + $0x10] ss:$2 sm:$0xff] %v2593_v57  ;;  %v6185_v59 = vpack.i.bf16 %v2673_v50, %v6906_v56  ;;  %v2598_v56 = vld [vmem:[#allocation3 + $0x22] sm:$0xf] }
 0x2de   : > { %2690 = vst [vmem:[#allocation1 + $0x11] ss:$2 sm:$0xff] %v2594_v58 }
 0x2df   : > { %6186 = vrot.lane.b32.xlu1 %v6185_v59, %s6269_s30  ;;  %3092 = vmatpush.bf16.msrb.mxu1 %v5829_v34  ;;  %v5846_v59 = vld [vmem:[%s8062_s5 + $0xc8] sm:$0xff]  ;;  %v5176_v34 = vld [vmem:[%s8064_s7 + $0x40] sm:$0xf] }
 0x2e3   : > { %3131 = vmatpush.bf16.msra.mxu1 %v5856_v29  ;;  %v5256_v29 = vld [vmem:[%s8064_s7 + $0xe0] sm:$0xf] }
 0x2e5   : > { %v6942_v62 = vld.sshfl [vmem:[#allocation1 + $0x10] sm:$0xff pattern:$0x75316420] }
 0x2e6   : > { %2703 = vst [vmem:[#allocation1 + $0x10] ss:$2 sm:$0xff] %v2597_v51 }
 0x2e7   : > { %2705 = vst [vmem:[#allocation1 + $0x11] ss:$2 sm:$0xff] %v2598_v56  ;;  %3132 = vmatpush.bf16.msra.mxu1 %v5855_v37  ;;  %v5886_v37 = vld [vmem:[%s8064_s7 + $0xe4] sm:$0xf0] }
 0x2eb   : > { %3133 = vmatpush.bf16.msra.mxu1 %v5854_v27  ;;  %v5328_v27 = vld [vmem:[%s8064_s7 + $0x170] sm:$0xf] }
 0x2ee   : > { %v2707_v11 = vld.sshfl [vmem:[#allocation1 + $0x10] sm:$0xff pattern:$0x75316420] }
 0x2ef   : > { %2722 = vst [vmem:[#allocation1 + $0x10] ss:$2 sm:$0xff] %v2602_v8  ;;  %v6190_v14 = vpack.i.bf16 %v2707_v11, %v6911_v63  ;;  %v5822_v63 = vld [vmem:[%s8062_s5 + $0x8] sm:$0xff]  ;;  %3134 = vmatpush.bf16.msra.mxu1 %v5853_v43  ;;  %v2759_v8 = vld.sshfl [vmem:[#allocation1] sm:$0xff pattern:$0x75316420] }
 0x2f0   : > { %2724 = vst [vmem:[#allocation1 + $0x11] ss:$2 sm:$0xff] %v2603_v4  ;;  %3077 = vmatpush.bf16.msrb.mxu3 %v5822_v63  ;;  %v5320_v43 = vld [vmem:[%s8064_s7 + $0x160] sm:$0xf] }
 0x2f1   : > { %6191 = vrot.lane.b32.xlu2 %v6190_v14, %s6269_s30 }
 0x2f4   : > { %3078 = vmatpush.bf16.msrb.mxu3 %v5821_v52 }
 0x2f7   : > { %v6970_v20 = vld.sshfl [vmem:[#allocation1 + $0x10] sm:$0xff pattern:$0x75316420] }
 0x2f8   : > { %2737 = vst [vmem:[#allocation1 + $0x10] ss:$2 sm:$0xff] %v2606_v30  ;;  %3113 = vmatpush.bf16.msra.mxu3 %v5852_v36  ;;  %v5866_v36 = vld [vmem:[%s8064_s7 + $0x44] sm:$0xf0] }
 0x2f9   : > { %2739 = vst [vmem:[#allocation1 + $0x11] ss:$2 sm:$0xff] %v2607_v10 }
 0x2fc   : > { %3114 = vmatpush.bf16.msra.mxu3 %v5851_v48  ;;  %v5177_v48 = vor.u32 %v5866_v36, %v5176_v34  ;;  %v5456_v36 = vld [vmem:[%s8064_s7 + $0x270] sm:$0xf] }
 0x300   : > { %v2741_v19 = vld.sshfl [vmem:[#allocation1 + $0x10] sm:$0xff pattern:$0x75316420]  ;;  %3115 = vmatpush.bf16.msra.mxu3 %v5850_v5  ;;  %v5904_v5 = vld [vmem:[%s8064_s7 + $0x174] sm:$0xf0] }
 0x301   : > { %2756 = vst [vmem:[#allocation1 + $0x10] ss:$2 sm:$0xff] %v2610_v21  ;;  %v6195_v22 = vpack.i.bf16 %v2741_v19, %v6925_v46  ;;  %v5442_v21 = vld [vmem:[%s8064_s7 + $0x258] sm:$0xf0] }
 0x302   : > { %2758 = vst [vmem:[#allocation1 + $0x11] ss:$2 sm:$0xff] %v2611_v60  ;;  %v5931_v60 = vld [vmem:[%s8064_s7 + $0x254] sm:$0xf] }
 0x303   : > { %6196 = vrot.lane.b32.xlu0 %v6195_v22, %s6269_s30  ;;  %v5445_v19 = vor.u32 %v5931_v60, %v5442_v21  ;;  %v5200_v22 = vld [vmem:[%s8064_s7 + $0x70] sm:$0xf]  ;;  %v5876_v60 = vld [vmem:[%s8064_s7 + $0x94] sm:$0xf0]  ;;  %s4600_s30 = scalar_lea.hbm %s8068_s11, %s6353_s21 }
 0x304   : > { %3116 = vmatpush.bf16.msra.mxu3 %v5849_v54  ;;  %v5296_v21 = vld [vmem:[%s8064_s7 + $0x130] sm:$0xf]  ;;  %s4604_s14 = sshll.u32 %s4600_s30, 4  ;;  %s4605_s14 = int_to_ptr.hbm [resolvable:$true] %s4604_s14 }
 0x305   : > { %s6218_s1 = sshra.s32 %s4605_s14, 4  ;;  %s6219_s1 = int_to_ptr.hbm [resolvable:$true] %s6218_s1 }
 0x306   : > { %s6220_s22 = scalar_lea.hbm %s6219_s1, 1  ;;  %p6225_p0 = scmp.lt.s32.totalorder %s6219_s1, %s8068_s11 }
 0x307   : > { %p6221_p11 = scmp.ne.s32.totalorder %s6219_s1, %s6220_s22  ;;  %p6226_p1 = scmp.lt.s32.totalorder %s6224_s25, %s6220_s22 }
 0x309   : > { %v2760_v6 = vld.sshfl [vmem:[#allocation1 + $0x10] sm:$0xff pattern:$0x75316420]  ;;  %p6222_p12 = pnand %p6221_p11, %p6370_p5  ;;  %p6227_p2 = por %p6226_p1, %p6225_p0 }
 0x30a   : > { %v2775_v11 = vpack.c.bf16 %v2760_v6, %v2759_v8  ;;  %v5878_v6 = vld [vmem:[%s8064_s7 + $0xa4] sm:$0xf0]  ;;  %v5304_v8 = vld [vmem:[%s8064_s7 + $0x140] sm:$0xf] }
 0x30b   : > { %p6223_p13 = pneg %p6222_p12 }
 0x30d   : > { %p6228_p3 = pnand %p6227_p2, %p6223_p13 }
 0x33b   : > { %v6182_v53 = vpop.permute.xlu0 %6181 }
 0x33c   : > { %v6184_v47 = vunpack.i.h.bf16 %v6182_v53  ;;  %v6183_v13 = vunpack.i.l.bf16 %v6182_v53  ;;  %v5257_v53 = vor.u32 %v5886_v37, %v5256_v29  ;;  %v5936_v29 = vld [vmem:[%s8064_s7 + $0x274] sm:$0xf0]  ;;  %v5280_v37 = vld [vmem:[%s8064_s7 + $0x110] sm:$0xf] }
 0x33e   : > { %v2763_v46 = vsel %vm1995_vm10, %v6894_v7, %v6183_v13  ;;  %v2764_v42 = vsel %vm1995_vm10, %v6920_v9, %v6184_v47  ;;  %v5848_v7 = vld [vmem:[%s8062_s5 + $0xd8] sm:$0xff]  ;;  %v5847_v9 = vld [vmem:[%s8062_s5 + $0xd0] sm:$0xff] }
 0x33f   : > { %v2771_v33 = vpack.c.bf16 %v2764_v42, %v2763_v46  ;;  %3117 = vmatpush.bf16.msra.mxu3 %v5848_v7  ;;  %v5168_v47 = vld [vmem:[%s8064_s7 + $0x30] sm:$0xf]  ;;  %v5864_v13 = vld [vmem:[%s8064_s7 + $0x34] sm:$0xf0]  ;;  %v5902_v7 = vld [vmem:[%s8064_s7 + $0x164] sm:$0xf0] }
 0x340   : > { %v5248_v46 = vld [vmem:[%s8064_s7 + $0xd0] sm:$0xf]  ;;  %v5884_v42 = vld [vmem:[%s8064_s7 + $0xd4] sm:$0xf0]  ;;  %v5169_v54 = vor.u32 %v5864_v13, %v5168_v47  ;;  %v5368_v13 = vld [vmem:[%s8064_s7 + $0x1c0] sm:$0xf] }
 0x341   : > { %3079 = vmatmul.bf16.vlgmr.msrb.gmra.mxu3 %v2771_v33  ;;  %v5329_v33 = vor.u32 %v5904_v5, %v5328_v27  ;;  %v5914_v27 = vld [vmem:[%s8064_s7 + $0x1c4] sm:$0xf0] }
 0x342   : > { %v5934_v5 = vld [vmem:[%s8064_s7 + $0x264] sm:$0xf0] }
 0x343   : > { %3118 = vmatpush.bf16.msra.mxu3 %v5847_v9  ;;  %v5249_v9 = vor.u32 %v5884_v42, %v5248_v46  ;;  %v5448_v46 = vld [vmem:[%s8064_s7 + $0x260] sm:$0xf]  ;;  %v5369_v42 = vor.u32 %v5914_v27, %v5368_v13 }
 0x347   : > { %3119 = vmatpush.bf16.msra.mxu3 %v5846_v59 }
 0x34b   : > { %v6192_v32 = vpop.permute.xlu2 %6191 }
 0x34c   : > { %v6194_v39 = vunpack.i.h.bf16 %v6192_v32  ;;  %v6193_v57 = vunpack.i.l.bf16 %v6192_v32  ;;  %v5160_v32 = vld [vmem:[%s8064_s7 + $0x20] sm:$0xf] }
 0x34e   : > { %v2767_v50 = vsel %vm1995_vm10, %v6908_v44, %v6193_v57  ;;  %v2768_v58 = vsel %vm1995_vm10, %v6942_v62, %v6194_v39  ;;  %v5845_v62 = vld [vmem:[%s8062_s5 + $0xc0] sm:$0xff]  ;;  %v5862_v39 = vld [vmem:[%s8064_s7 + $0x24] sm:$0xf0]  ;;  %v5321_v57 = vor.u32 %v5902_v7, %v5320_v43  ;;  %v5449_v43 = vor.u32 %v5934_v5, %v5448_v46 }
 0x34f   : > { %v2773_v61 = vpack.c.bf16 %v2768_v58, %v2767_v50  ;;  %3120 = vmatpush.bf16.msra.mxu3 %v5845_v62  ;;  %v5240_v50 = vld [vmem:[%s8064_s7 + $0xc0] sm:$0xf]  ;;  %v5882_v58 = vld [vmem:[%s8064_s7 + $0xc4] sm:$0xf0]  ;;  %v5161_v59 = vor.u32 %v5862_v39, %v5160_v32  ;;  %v5900_v62 = vld [vmem:[%s8064_s7 + $0x154] sm:$0xf0] }
 0x350   : > { %v5890_v7 = vld [vmem:[%s8064_s7 + $0x104] sm:$0xf0]  ;;  %v5360_v39 = vld [vmem:[%s8064_s7 + $0x1b0] sm:$0xf] }
 0x351   : > { %3107 = vmatmul.bf16.vlgmr.msrb.gmra.mxu2 %v2773_v61  ;;  %v6187_v3 = vpop.permute.xlu1 %6186  ;;  %v5241_v61 = vor.u32 %v5882_v58, %v5240_v50  ;;  %v5440_v50 = vld [vmem:[%s8064_s7 + $0x250] sm:$0xf] }
 0x352   : > { %v6189_v51 = vunpack.i.h.bf16 %v6187_v3  ;;  %v6188_v15 = vunpack.i.l.bf16 %v6187_v3  ;;  %v5152_v3 = vld [vmem:[%s8064_s7 + $0x10] sm:$0xf] }
 0x353   : > { %4193 = vmatpush.bf16.msrb.mxu3 %v5265_v31  ;;  %v5916_v31 = vld [vmem:[%s8064_s7 + $0x1d4] sm:$0xf0] }
 0x354   : > { %v2765_v56 = vsel %vm1995_vm10, %v6899_v38, %v6188_v15  ;;  %v2766_v44 = vsel %vm1995_vm10, %v6932_v55, %v6189_v51  ;;  %v5933_v38 = vld [vmem:[%s8064_s7 + $0x264] sm:$0xf]  ;;  %v5461_v55 = vor.u32 %v5935_v1, %v5458_v2  ;;  %v5860_v51 = vld [vmem:[%s8064_s7 + $0x14] sm:$0xf0]  ;;  %v5232_v15 = vld [vmem:[%s8064_s7 + $0xb0] sm:$0xf]  ;;  %v5377_v34 = vor.u32 %v5916_v31, %v5376_v28 }
 0x355   : > { %v2772_v0 = vpack.c.bf16 %v2766_v44, %v2765_v56  ;;  %v5453_v4 = vor.u32 %v5933_v38, %v5450_v12  ;;  %v5153_v56 = vor.u32 %v5860_v51, %v5152_v3  ;;  %v5880_v44 = vld [vmem:[%s8064_s7 + $0xb4] sm:$0xf0]  ;;  %v5144_v38 = vld [vmem:[%s8064_s7] sm:$0xf]  ;;  %v5520_v3 = vld [vmem:[%s8064_s7 + $0x2f0] sm:$0xf]  ;;  %v5337_v31 = vor.u32 %v5906_v49, %v5336_v18 }
 0x356   : > { %4349 = vmatpush.bf16.msrb.mxu0 %v5461_v55  ;;  %v5233_v1 = vor.u32 %v5880_v44, %v5232_v15  ;;  %v5858_v55 = vld [vmem:[%s8064_s7 + $0x4] sm:$0xf0]  ;;  %v5224_v12 = vld [vmem:[%s8064_s7 + $0xa0] sm:$0xf]  ;;  %v5952_v51 = vld [vmem:[%s8064_s7 + $0x2f4] sm:$0xf0] }
 0x357   : > { %3093 = vmatmul.bf16.vlgmr.msrb.gmra.mxu1 %v2772_v0  ;;  %4194 = vmatpush.bf16.msrb.mxu3 %v5257_v53  ;;  %v5312_v0 = vld [vmem:[%s8064_s7 + $0x150] sm:$0xf]  ;;  %v5892_v53 = vld [vmem:[%s8064_s7 + $0x114] sm:$0xf0]  ;;  %v5521_v44 = vor.u32 %v5952_v51, %v5520_v3  ;;  %v5426_v28 = vld [vmem:[%s8064_s7 + $0x238] sm:$0xf0] }
 0x358   : > { %4206 = vmatpush.bf16.msrb.mxu1 %v5329_v33  ;;  %v5313_v2 = vor.u32 %v5900_v62, %v5312_v0  ;;  %v5281_v47 = vor.u32 %v5892_v53, %v5280_v37  ;;  %v6202_v33 = vld [vmem:[%s8063_s6] ss:$0 sm:$0xff]  ;;  %v5946_v37 = vld [vmem:[%s8064_s7 + $0x2c4] sm:$0xf0]  ;;  %v5418_v18 = vld [vmem:[%s8064_s7 + $0x228] sm:$0xf0] }
 0x359   : > { %v5352_v62 = vld [vmem:[%s8064_s7 + $0x1a0] sm:$0xf]  ;;  %v5922_v51 = vld [vmem:[%s8064_s7 + $0x204] sm:$0xf0] }
 0x35a   : > { %4350 = vmatpush.bf16.msrb.mxu0 %v5453_v4  ;;  %v5145_v4 = vor.u32 %v5858_v55, %v5144_v38  ;;  %v5930_v55 = vld [vmem:[%s8064_s7 + $0x244] sm:$0xf0]  ;;  %v5400_v3 = vld [vmem:[%s8064_s7 + $0x200] sm:$0xf] }
 0x35b   : > { %4195 = vmatpush.bf16.msrb.mxu3 %v5249_v9  ;;  %v5464_v49 = vld [vmem:[%s8064_s7 + $0x280] sm:$0xf] }
 0x35c   : > { %4207 = vmatpush.bf16.msrb.mxu1 %v5321_v57  ;;  %v5912_v57 = vld [vmem:[%s8064_s7 + $0x1b4] sm:$0xf0] }
 0x35e   : > { %4351 = vmatpush.bf16.msrb.mxu0 %v5445_v19 }
 0x35f   : > { %4196 = vmatpush.bf16.msrb.mxu3 %v5241_v61  ;;  %v5932_v61 = vld [vmem:[%s8064_s7 + $0x254] sm:$0xf0] }
 0x360   : > { %4208 = vmatpush.bf16.msrb.mxu1 %v5313_v2  ;;  %v5432_v2 = vld [vmem:[%s8064_s7 + $0x240] sm:$0xf] }
 0x362   : > { %4352 = vmatpush.bf16.msrb.mxu0 %v5437_v41 }
 0x363   : > { %4197 = vmatpush.bf16.msrb.mxu3 %v5233_v1  ;;  %v5910_v1 = vld [vmem:[%s8064_s7 + $0x1a4] sm:$0xf0] }
 0x364   : > { %v5353_v38 = vor.u32 %v5910_v1, %v5352_v62  ;;  %v5401_v1 = vor.u32 %v5922_v51, %v5400_v3  ;;  %v5962_v51 = vld [vmem:[%s8064_s7 + $0x344] sm:$0xf0] }
 0x367   : > { %5133 = vmatmul.msk.bf16.vlgmr.msra.gmra.mxu1 %vm1995_vm10, %v2775_v11  ;;  %v5898_v11 = vld [vmem:[%s8064_s7 + $0x144] sm:$0xf0] }
 0x375   : > { %v6197_v14 = vpop.permute.xlu0 %6196 }
 0x376   : > { %v6199_v16 = vunpack.i.h.bf16 %v6197_v14  ;;  %v6198_v35 = vunpack.i.l.bf16 %v6197_v14  ;;  %v5225_v14 = vor.u32 %v5878_v6, %v5224_v12  ;;  %v5512_v12 = vld [vmem:[%s8064_s7 + $0x2e0] sm:$0xf] }
 0x378   : > { %v2770_v10 = vsel %vm1995_vm10, %v6970_v20, %v6199_v16  ;;  %v2769_v30 = vsel %vm1995_vm10, %v6922_v17, %v6198_v35  ;;  %v5872_v17 = vld [vmem:[%s8064_s7 + $0x74] sm:$0xf0]  ;;  %v5192_v20 = vld [vmem:[%s8064_s7 + $0x60] sm:$0xf]  ;;  %v5305_v16 = vor.u32 %v5898_v11, %v5304_v8  ;;  %v5392_v35 = vld [vmem:[%s8064_s7 + $0x1f0] sm:$0xf]  ;;  %4198 = vmatpush.bf16.msrb.mxu3 %v5225_v14  ;;  %v5433_v8 = vor.u32 %v5930_v55, %v5432_v2 }
 0x379   : > { %v2774_v63 = vpack.c.bf16 %v2770_v10, %v2769_v30  ;;  %v5201_v52 = vor.u32 %v5872_v17, %v5200_v22  ;;  %v5193_v45 = vor.u32 %v5870_v40, %v5192_v20  ;;  %v5920_v10 = vld [vmem:[%s8064_s7 + $0x1f4] sm:$0xf0]  ;;  %v5384_v17 = vld [vmem:[%s8064_s7 + $0x1e0] sm:$0xf]  ;;  %v5918_v20 = vld [vmem:[%s8064_s7 + $0x1e4] sm:$0xf0] }
 0x37a   : > { %v5393_v30 = vor.u32 %v5920_v10, %v5392_v35  ;;  %4209 = vmatpush.bf16.msrb.mxu1 %v5305_v16  ;;  %v5896_v22 = vld [vmem:[%s8064_s7 + $0x134] sm:$0xf0]  ;;  %v5385_v40 = vor.u32 %v5918_v20, %v5384_v17  ;;  %v5344_v35 = vld [vmem:[%s8064_s7 + $0x190] sm:$0xf]  ;;  %v5942_v2 = vld [vmem:[%s8064_s7 + $0x2a4] sm:$0xf0] }
 0x37b   : > { %3121 = vmatmul.bf16.vlgmr.msra.gmra.mxu3 %v2774_v63  ;;  %4180 = vmatpush.bf16.msra.mxu2 %v5201_v52  ;;  %v5216_v63 = vld [vmem:[%s8064_s7 + $0x90] sm:$0xf]  ;;  %v5297_v52 = vor.u32 %v5896_v22, %v5296_v21  ;;  %v3219_v14 = vld [vmem:[#allocation4] sm:$0x3] }
 0x37c   : > { %v5217_v19 = vor.u32 %v5876_v60, %v5216_v63  ;;  %3240 = vst [vmem:[#allocation1] ss:$4 sm:$0xff] %v3219_v14  ;;  %v5908_v10 = vld [vmem:[%s8064_s7 + $0x194] sm:$0xf0] }
 0x37d   : > { %v5345_v60 = vor.u32 %v5908_v10, %v5344_v35  ;;  %v5928_v21 = vld [vmem:[%s8064_s7 + $0x234] sm:$0xf0] }
 0x37e   : > { %4199 = vmatpush.bf16.msrb.mxu3 %v5217_v19  ;;  %4210 = vmatpush.bf16.msrb.mxu1 %v5297_v52  ;;  %v5504_v19 = vld [vmem:[%s8064_s7 + $0x2d0] sm:$0xf]  ;;  %v5948_v22 = vld [vmem:[%s8064_s7 + $0x2d4] sm:$0xf0] }
 0x37f   : > { %4181 = vmatpush.bf16.msra.mxu2 %v5193_v45 }
 0x382   : > { %4200 = vmatpush.bf16.msrb.mxu3 %v5209_v25 }
 0x383   : > { %4182 = vmatpush.bf16.msra.mxu2 %v5185_v24  ;;  %v5288_v24 = vld [vmem:[%s8064_s7 + $0x120] sm:$0xf] }
 0x384   : > { %v5289_v41 = vor.u32 %v5894_v26, %v5288_v24  ;;  %v5416_v24 = vld [vmem:[%s8064_s7 + $0x220] sm:$0xf]  ;;  %v5927_v26 = vld [vmem:[%s8064_s7 + $0x234] sm:$0xf] }
 0x386   : > { %4211 = vmatpush.bf16.msrb.mxu1 %v5289_v41  ;;  %v5926_v41 = vld [vmem:[%s8064_s7 + $0x224] sm:$0xf0] }
 0x387   : > { %4183 = vmatpush.bf16.msra.mxu2 %v5177_v48  ;;  %v5457_v48 = vor.u32 %v5936_v29, %v5456_v36  ;;  %v5429_v36 = vor.u32 %v5927_v26, %v5426_v28  ;;  %v5417_v29 = vor.u32 %v5926_v41, %v5416_v24  ;;  %v5938_v28 = vld [vmem:[%s8064_s7 + $0x284] sm:$0xf0] }
 0x389   : > { %4232 = vmatpush.bf16.msra.mxu3 %v5457_v48  ;;  %v5496_v48 = vld [vmem:[%s8064_s7 + $0x2c0] sm:$0xf]  ;;  %4353 = vmatpush.bf16.msrb.mxu0 %v5429_v36 }
 0x38a   : > { %4212 = vmatpush.bf16.msrb.mxu1 %v5281_v47  ;;  %v5497_v53 = vor.u32 %v5946_v37, %v5496_v48  ;;  %v5408_v47 = vld [vmem:[%s8064_s7 + $0x210] sm:$0xf]  ;;  %v5968_v37 = vld [vmem:[%s8064_s7 + $0x374] sm:$0xf0] }
 0x38b   : > { %4184 = vmatpush.bf16.msra.mxu2 %v5169_v54  ;;  %v5272_v54 = vld [vmem:[%s8064_s7 + $0x100] sm:$0xf]  ;;  %v5584_v48 = vld [vmem:[%s8064_s7 + $0x370] sm:$0xf] }
 0x38c   : > { %v5273_v32 = vor.u32 %v5890_v7, %v5272_v54 }
 0x38d   : > { %4233 = vmatpush.bf16.msra.mxu3 %v5449_v43 }
 0x38e   : > { %4213 = vmatpush.bf16.msrb.mxu1 %v5273_v32  ;;  %v5944_v32 = vld [vmem:[%s8064_s7 + $0x2b4] sm:$0xf0] }
 0x38f   : > { %4185 = vmatpush.bf16.msra.mxu2 %v5161_v59  ;;  %v5361_v59 = vor.u32 %v5912_v57, %v5360_v39 }
 0x392   : > { %4245 = vmatpush.bf16.msra.mxu1 %v5521_v44 }
 0x393   : > { %4186 = vmatpush.bf16.msra.mxu2 %v5153_v56  ;;  %v5441_v56 = vor.u32 %v5932_v61, %v5440_v50 }
 0x395   : > { %4234 = vmatpush.bf16.msra.mxu3 %v5441_v56 }
 0x397   : > { %4187 = vmatpush.bf16.msra.mxu2 %v5145_v4  ;;  %v5950_v4 = vld [vmem:[%s8064_s7 + $0x2e4] sm:$0xf0] }
 0x398   : > { %v5513_v11 = vor.u32 %v5950_v4, %v5512_v12 }
 0x399   : > { %4235 = vmatpush.bf16.msra.mxu3 %v5433_v8 }
 0x39a   : > { %4246 = vmatpush.bf16.msra.mxu1 %v5513_v11 }
 0x39b   : > { %4219 = vmatpush.bf16.msrb.mxu2 %v5393_v30  ;;  %v5424_v30 = vld [vmem:[%s8064_s7 + $0x230] sm:$0xf] }
 0x39c   : > { %v5425_v52 = vor.u32 %v5928_v21, %v5424_v30 }
 0x39e   : > { %4236 = vmatpush.bf16.msra.mxu3 %v5425_v52 }
 0x39f   : > { %4220 = vmatpush.bf16.msrb.mxu2 %v5385_v40  ;;  %v5505_v40 = vor.u32 %v5948_v22, %v5504_v19 }
 0x3a1   : > { %4247 = vmatpush.bf16.msra.mxu1 %v5505_v40 }
 0x3a2   : > { %4237 = vmatpush.bf16.msra.mxu3 %v5417_v29 }
 0x3a3   : > { %4221 = vmatpush.bf16.msrb.mxu2 %v5377_v34 }
 0x3a5   : > { %4248 = vmatpush.bf16.msra.mxu1 %v5497_v53 }
 0x3a7   : > { %4222 = vmatpush.bf16.msrb.mxu2 %v5369_v42 }
 0x3ab   : > { %4223 = vmatpush.bf16.msrb.mxu2 %v5361_v59 }
 0x3af   : > { %4224 = vmatpush.bf16.msrb.mxu2 %v5353_v38 }
 0x3b3   : > { %4225 = vmatpush.bf16.msrb.mxu2 %v5345_v60  ;;  %v5940_v60 = vld [vmem:[%s8064_s7 + $0x294] sm:$0xf0] }
 0x3b7   : > { %4226 = vmatpush.bf16.msrb.mxu2 %v5337_v31  ;;  %v5465_v31 = vor.u32 %v5938_v28, %v5464_v49  ;;  %v5704_v49 = vld [vmem:[%s8064_s7 + $0x460] sm:$0xf] }
 0x3c4   : > { %v3080_v23 = vpop.f32.mrf.mxu3 }
 0x3c5   : > { %v3081_v15 = vadd.f32 %v6202_v33, %v3080_v23 }
 0x3cc   : > { %v3082_v58 = vpop.f32.mrf.mxu3 }
 0x3d4   : > { %v3094_v45 = vpop.f32.mrf.mxu1  ;;  %v3108_v6 = vpop.f32.mrf.mxu2 }
 0x3d5   : > { %v3095_v0 = vadd.f32 %v3094_v45, %v3081_v15  ;;  %v3083_v45 = vadd.f32 %v6202_v33, %v3082_v58  ;;  %v5924_v33 = vld [vmem:[%s8064_s7 + $0x214] sm:$0xf0]  ;;  %v5480_v15 = vld [vmem:[%s8064_s7 + $0x2a0] sm:$0xf] }
 0x3d6   : > { %v5409_v7 = vor.u32 %v5924_v33, %v5408_v47  ;;  %v5481_v55 = vor.u32 %v5942_v2, %v5480_v15  ;;  %v5585_v47 = vor.u32 %v5968_v37, %v5584_v48  ;;  %v5999_v15 = vld [vmem:[%s8064_s7 + $0x474] sm:$0xf]  ;;  %v5993_v48 = vld [vmem:[%s8064_s7 + $0x444] sm:$0xf]  ;;  %v5690_v37 = vld [vmem:[%s8064_s7 + $0x448] sm:$0xf0] }
 0x3d7   : > { %v3109_v16 = vadd.f32 %v3108_v6, %v3095_v0 }
 0x3d8   : > { %4238 = vmatpush.bf16.msra.mxu3 %v5409_v7 }
 0x3dc   : > { %v3096_v9 = vpop.f32.mrf.mxu1  ;;  %v3110_v13 = vpop.f32.mrf.mxu2  ;;  %4239 = vmatpush.bf16.msra.mxu3 %v5401_v1 }
 0x3dd   : > { %v3097_v25 = vadd.f32 %v3096_v9, %v3083_v45  ;;  %v5488_v9 = vld [vmem:[%s8064_s7 + $0x2b0] sm:$0xf] }
 0x3de   : > { %v5489_v61 = vor.u32 %v5944_v32, %v5488_v9  ;;  %v5568_v9 = vld [vmem:[%s8064_s7 + $0x350] sm:$0xf]  ;;  %v5964_v32 = vld [vmem:[%s8064_s7 + $0x354] sm:$0xf0] }
 0x3df   : > { %v3111_v43 = vadd.f32 %v3110_v13, %v3097_v25  ;;  %v5576_v13 = vld [vmem:[%s8064_s7 + $0x360] sm:$0xf] }
 0x3e0   : > { %4249 = vmatpush.bf16.msra.mxu1 %v5489_v61  ;;  %v5560_v61 = vld [vmem:[%s8064_s7 + $0x340] sm:$0xf] }
 0x3e4   : > { %v3136_v17 = vpop.f32.mrf.mxu1  ;;  %4250 = vmatpush.bf16.msra.mxu1 %v5481_v55  ;;  %v5561_v55 = vor.u32 %v5962_v51, %v5560_v61  ;;  %v5608_v61 = vld [vmem:[%s8064_s7 + $0x3a0] sm:$0xf] }
 0x3e5   : > { %v5688_v51 = vld [vmem:[%s8064_s7 + $0x440] sm:$0xf] }
 0x3ec   : > { %v3138_v56 = vpop.f32.mrf.mxu1 }
 0x3fe   : > { %v3122_v63 = vpop.f32.mrf.mxu3 }
 0x3ff   : > { %v3123_v20 = vadd.f32 %v3122_v63, %v3109_v16  ;;  %v5472_v63 = vld [vmem:[%s8064_s7 + $0x290] sm:$0xf] }
 0x401   : > { %v3137_v23 = vadd.f32 %v3136_v17, %v3123_v20  ;;  %v5473_v17 = vor.u32 %v5940_v60, %v5472_v63  ;;  %v5712_v60 = vld [vmem:[%s8064_s7 + $0x470] sm:$0xf] }
 0x403   : > { %v3141_v34 = vmax.f32 %v3137_v23, 0.0  ;;  %4251 = vmatpush.bf16.msra.mxu1 %v5473_v17  ;;  %v5925_v23 = vld [vmem:[%s8064_s7 + $0x224] sm:$0xf]  ;;  %v5995_v17 = vld [vmem:[%s8064_s7 + $0x454] sm:$0xf] }
 0x404   : > { %v5421_v26 = vor.u32 %v5925_v23, %v5418_v18  ;;  %v5978_v18 = vld [vmem:[%s8064_s7 + $0x3c4] sm:$0xf0] }
 0x405   : > { %v3145_v27 = vrot.slane %v3141_v34, 2  ;;  %v3146_v46 = vrot.slane %v3141_v34, 4  ;;  %v3147_v42 = vrot.slane %v3141_v34, 6  ;;  %v5134_v5 = vrot.slane %v3141_v34, 9 }
 0x406   : > { %v3124_v54 = vpop.f32.mrf.mxu3  ;;  %4354 = vmatpush.bf16.msrb.mxu0 %v5421_v26 }
 0x407   : > { %v5135_v39 = vrot.slane %v3145_v27, 9  ;;  %v5136_v57 = vrot.slane %v3146_v46, 9  ;;  %v5137_v50 = vrot.slane %v3147_v42, 9  ;;  %v3181_v58 = vmax.f32 %v3141_v34, %v5134_v5  ;;  %4252 = vmatpush.bf16.msra.mxu1 %v5465_v31  ;;  %v5923_v5 = vld [vmem:[%s8064_s7 + $0x214] sm:$0xf] }
 0x408   : > { %v3125_v59 = vadd.f32 %v3124_v54, %v3111_v43  ;;  %v5410_v43 = vld [vmem:[%s8064_s7 + $0x218] sm:$0xf0]  ;;  %v5536_v31 = vld [vmem:[%s8064_s7 + $0x310] sm:$0xf] }
 0x409   : > { %v3182_v44 = vmax.f32 %v3145_v27, %v5135_v39  ;;  %v3183_v0 = vmax.f32 %v3146_v46, %v5136_v57  ;;  %v3184_v62 = vmax.f32 %v3147_v42, %v5137_v50  ;;  %v5966_v46 = vld [vmem:[%s8064_s7 + $0x364] sm:$0xf0]  ;;  %v3221_v42 = vld [vmem:[#allocation4 + $0x1] sm:$0x3]  ;;  %v5413_v7 = vor.u32 %v5923_v5, %v5410_v43  ;;  %v5921_v39 = vld [vmem:[%s8064_s7 + $0x204] sm:$0xf] }
 0x40a   : > { %v3139_v38 = vadd.f32 %v3138_v56, %v3125_v59  ;;  %v5577_v54 = vor.u32 %v5966_v46, %v5576_v13  ;;  %v5402_v57 = vld [vmem:[%s8064_s7 + $0x208] sm:$0xf0]  ;;  %v5569_v50 = vor.u32 %v5964_v32, %v5568_v9  ;;  %v5984_v59 = vld [vmem:[%s8064_s7 + $0x3f4] sm:$0xf0]  ;;  %v5714_v56 = vld [vmem:[%s8064_s7 + $0x478] sm:$0xf0] }
 0x40b   : > { %v3189_v12 = vmax.f32 %v3181_v58, %v3183_v0  ;;  %v3190_v4 = vmax.f32 %v3182_v44, %v3184_v62  ;;  %4355 = vmatpush.bf16.msrb.mxu0 %v5413_v7  ;;  %v5648_v58 = vld [vmem:[%s8064_s7 + $0x3f0] sm:$0xf]  ;;  %v5405_v3 = vor.u32 %v5921_v39, %v5402_v57  ;;  %v3223_v44 = vld [vmem:[#allocation4 + $0x2] sm:$0x3]  ;;  %v5717_v0 = vor.u32 %v5999_v15, %v5714_v56  ;;  %v5528_v43 = vld [vmem:[%s8064_s7 + $0x300] sm:$0xf] }
 0x40c   : > { %v3142_v6 = vmax.f32 %v3139_v38, 0.0  ;;  %v5649_v2 = vor.u32 %v5984_v59, %v5648_v58  ;;  %v5616_v13 = vld [vmem:[%s8064_s7 + $0x3b0] sm:$0xf]  ;;  %v5976_v46 = vld [vmem:[%s8064_s7 + $0x3b4] sm:$0xf0] }
 0x40d   : > { %v3208_v8 = vperm.slane %v3189_v12, 0  ;;  %v3209_v11 = vperm.slane %v3190_v4, 0  ;;  %v5640_v12 = vld [vmem:[%s8064_s7 + $0x3e0] sm:$0xf]  ;;  %v5982_v4 = vld [vmem:[%s8064_s7 + $0x3e4] sm:$0xf0]  ;;  %v5617_v32 = vor.u32 %v5976_v46, %v5616_v13 }
 0x40e   : > { %v3148_v14 = vrot.slane %v3142_v6, 2  ;;  %v3149_v16 = vrot.slane %v3142_v6, 4  ;;  %v3150_v35 = vrot.slane %v3142_v6, 6  ;;  %v5138_v10 = vrot.slane %v3142_v6, 9  ;;  %v5696_v5 = vld [vmem:[%s8064_s7 + $0x450] sm:$0xf] }
 0x40f   : > { %v3212_v30 = vsel %vm1642_vm3, %v3209_v11, %v3208_v8  ;;  %4356 = vmatpush.bf16.msrb.mxu0 %v5405_v3  ;;  %v5960_v8 = vld [vmem:[%s8064_s7 + $0x334] sm:$0xf0]  ;;  %v5997_v11 = vld [vmem:[%s8064_s7 + $0x464] sm:$0xf]  ;;  %v5871_v7 = vld [vmem:[%s8064_s7 + $0x74] sm:$0xf] }
 0x410   : > { %3217 = vst [vmem:[#allocation4 + $0x5] sm:$0x3] %v3212_v30  ;;  %v5139_v21 = vrot.slane %v3148_v14, 9  ;;  %v5140_v19 = vrot.slane %v3149_v16, 9  ;;  %v5141_v22 = vrot.slane %v3150_v35, 9  ;;  %v3185_v20 = vmax.f32 %v3142_v6, %v5138_v10 }
 0x411   : > { %v5552_v6 = vld [vmem:[%s8064_s7 + $0x330] sm:$0xf]  ;;  %v5980_v10 = vld [vmem:[%s8064_s7 + $0x3d4] sm:$0xf0]  ;;  %v5202_v39 = vld [vmem:[%s8064_s7 + $0x78] sm:$0xf0] }
 0x412   : > { %v3186_v52 = vmax.f32 %v3148_v14, %v5139_v21  ;;  %v3187_v40 = vmax.f32 %v3149_v16, %v5140_v19  ;;  %v3188_v45 = vmax.f32 %v3150_v35, %v5141_v22  ;;  %v5706_v14 = vld [vmem:[%s8064_s7 + $0x468] sm:$0xf0]  ;;  %v5641_v16 = vor.u32 %v5982_v4, %v5640_v12  ;;  %v5632_v35 = vld [vmem:[%s8064_s7 + $0x3d0] sm:$0xf]  ;;  %v6000_v21 = vld [vmem:[%s8064_s7 + $0x474] sm:$0xf0] }
 0x413   : > { %4401 = vmatpush.bf16.msra.mxu0 %v5717_v0  ;;  %v5709_v30 = vor.u32 %v5997_v11, %v5706_v14  ;;  %v5553_v63 = vor.u32 %v5960_v8, %v5552_v6  ;;  %v5544_v19 = vld [vmem:[%s8064_s7 + $0x320] sm:$0xf]  ;;  %v5958_v22 = vld [vmem:[%s8064_s7 + $0x324] sm:$0xf0]  ;;  %v5633_v23 = vor.u32 %v5980_v10, %v5632_v35  ;;  %v5713_v26 = vor.u32 %v6000_v21, %v5712_v60  ;;  %v5991_v57 = vld [vmem:[%s8064_s7 + $0x434] sm:$0xf] }
 0x414   : > { %v3191_v24 = vmax.f32 %v3185_v20, %v3187_v40  ;;  %v3192_v25 = vmax.f32 %v3186_v52, %v3188_v45  ;;  %v5698_v20 = vld [vmem:[%s8064_s7 + $0x458] sm:$0xf0]  ;;  %v5624_v40 = vld [vmem:[%s8064_s7 + $0x3c0] sm:$0xf]  ;;  %v5545_v28 = vor.u32 %v5958_v22, %v5544_v19  ;;  %v5974_v3 = vld [vmem:[%s8064_s7 + $0x3a4] sm:$0xf0] }
 0x415   : > { %v5701_v45 = vor.u32 %v5995_v17, %v5698_v20  ;;  %v5994_v0 = vld [vmem:[%s8064_s7 + $0x444] sm:$0xf0]  ;;  %v5609_v12 = vor.u32 %v5974_v3, %v5608_v61  ;;  %v5194_v4 = vld [vmem:[%s8064_s7 + $0x68] sm:$0xf0]  ;;  %v5600_v11 = vld [vmem:[%s8064_s7 + $0x390] sm:$0xf] }
 0x416   : > { %v3210_v41 = vperm.slane %v3191_v24, 0  ;;  %v3211_v34 = vperm.slane %v3192_v25, 0  ;;  %v5998_v24 = vld [vmem:[%s8064_s7 + $0x464] sm:$0xf0]  ;;  %v5674_v6 = vld [vmem:[%s8064_s7 + $0x428] sm:$0xf0]  ;;  %v5689_v8 = vor.u32 %v5994_v0, %v5688_v51 }
 0x417   : > { %v3220_v36 = vld [vmem:[#allocation4 + $0x4] sm:$0x3]  ;;  %v3224_v62 = vld [vmem:[#allocation4 + $0x6] sm:$0x3]  ;;  %4402 = vmatpush.bf16.msra.mxu0 %v5709_v30  ;;  %v5972_v14 = vld [vmem:[%s8064_s7 + $0x394] sm:$0xf0] }
 0x418   : > { %v3213_v29 = vsel %vm1642_vm3, %v3211_v34, %v3210_v41  ;;  %3242 = vst [vmem:[#allocation1 + $0x1] ss:$4 sm:$0xff] %v3220_v36  ;;  %v3222_v33 = vld [vmem:[#allocation4 + $0x5] sm:$0x3]  ;;  %v5956_v36 = vld [vmem:[%s8064_s7 + $0x314] sm:$0xf0]  ;;  %v5601_v60 = vor.u32 %v5972_v14, %v5600_v11 }
 0x419   : > { %3218 = vst [vmem:[#allocation4 + $0x9] sm:$0x3] %v3213_v29  ;;  %v3225_v52 = vld [vmem:[#allocation4 + $0x4] sm:$0x3]  ;;  %v5625_v29 = vor.u32 %v5978_v18, %v5624_v40  ;;  %v5680_v35 = vld [vmem:[%s8064_s7 + $0x430] sm:$0xf] }
 0x41a   : > { %v3227_v9 = vld [vmem:[#allocation4 + $0x5] sm:$0x3]  ;;  %v5992_v10 = vld [vmem:[%s8064_s7 + $0x434] sm:$0xf0]  ;;  %v5970_v21 = vld [vmem:[%s8064_s7 + $0x384] sm:$0xf0] }
 0x41b   : > { %4403 = vmatpush.bf16.msra.mxu0 %v5701_v45  ;;  %v5867_v19 = vld [vmem:[%s8064_s7 + $0x54] sm:$0xf]  ;;  %v5186_v22 = vld [vmem:[%s8064_s7 + $0x58] sm:$0xf0]  ;;  %v5681_v20 = vor.u32 %v5992_v10, %v5680_v35  ;;  %v5990_v18 = vld [vmem:[%s8064_s7 + $0x424] sm:$0xf0] }
 0x41c   : > { %v3229_v17 = vld [vmem:[#allocation4 + $0x6] sm:$0x3]  ;;  %v5987_v40 = vld [vmem:[%s8064_s7 + $0x414] sm:$0xf]  ;;  %v5658_v13 = vld [vmem:[%s8064_s7 + $0x408] sm:$0xf0] }
 0x41d   : > { %v5666_v45 = vld [vmem:[%s8064_s7 + $0x418] sm:$0xf0]  ;;  %v5988_v46 = vld [vmem:[%s8064_s7 + $0x414] sm:$0xf0]  ;;  %v5903_v51 = vld [vmem:[%s8064_s7 + $0x174] sm:$0xf] }
 0x41e   : > { %v5250_v61 = vld [vmem:[%s8064_s7 + $0xd8] sm:$0xf0]  ;;  %v5162_v0 = vld [vmem:[%s8064_s7 + $0x28] sm:$0xf0]  ;;  %v5901_v11 = vld [vmem:[%s8064_s7 + $0x164] sm:$0xf] }
 0x41f   : > { %v3243_v53 = vld.sshfl [vmem:[#allocation1] sm:$0xff pattern:$0x73625140]  ;;  %v5322_v14 = vld [vmem:[%s8064_s7 + $0x168] sm:$0xf0] }
 0x420   : > { %v7407_v27 = vpack.c.bf16 %v3243_v53, %v3243_v53  ;;  %3249 = vst [vmem:[#allocation1 + $0x1] ss:$4 sm:$0xff] %v3222_v33  ;;  %v3226_v41 = vld [vmem:[#allocation4 + $0x8] sm:$0x3]  ;;  %v5705_v53 = vor.u32 %v5998_v24, %v5704_v49  ;;  %v5996_v33 = vld [vmem:[%s8064_s7 + $0x454] sm:$0xf0] }
 0x421   : > { %3247 = vst [vmem:[#allocation1] ss:$4 sm:$0xff] %v3221_v42  ;;  %v5693_v42 = vor.u32 %v5993_v48, %v5690_v37  ;;  %v3228_v58 = vld [vmem:[#allocation4 + $0x9] sm:$0x3]  ;;  %v5697_v59 = vor.u32 %v5996_v33, %v5696_v5  ;;  %v5887_v49 = vld [vmem:[%s8064_s7 + $0xf4] sm:$0xf] }
 0x422   : > { %4188 = vmatmul.bf16.vlgmr.msra.gmra.mxu2 %v7407_v27  ;;  %v5266_v24 = vld [vmem:[%s8064_s7 + $0xf8] sm:$0xf0]  ;;  %v5985_v48 = vld [vmem:[%s8064_s7 + $0x404] sm:$0xf]  ;;  %v5258_v5 = vld [vmem:[%s8064_s7 + $0xe8] sm:$0xf0] }
 0x423   : > { %4258 = vmatpush.bf16.msra.mxu2 %v5585_v47  ;;  %v5537_v47 = vor.u32 %v5956_v36, %v5536_v31  ;;  %4404 = vmatpush.bf16.msra.mxu0 %v5693_v42  ;;  %v5865_v31 = vld [vmem:[%s8064_s7 + $0x44] sm:$0xf]  ;;  %v5661_v33 = vor.u32 %v5985_v48, %v5658_v13  ;;  %v5154_v35 = vld [vmem:[%s8064_s7 + $0x18] sm:$0xf0]  ;;  %v5875_v13 = vld [vmem:[%s8064_s7 + $0x94] sm:$0xf] }
 0x424   : > { %v5885_v42 = vld [vmem:[%s8064_s7 + $0xe4] sm:$0xf] }
 0x427   : > { %4259 = vmatpush.bf16.msra.mxu2 %v5577_v54  ;;  %v5954_v54 = vld [vmem:[%s8064_s7 + $0x304] sm:$0xf0] }
 0x428   : > { %v3250_v1 = vld.sshfl [vmem:[#allocation1] sm:$0xff pattern:$0x73625140] }
 0x429   : > { %v7449_v38 = vpack.c.bf16 %v3250_v1, %v3250_v1  ;;  %3256 = vst [vmem:[#allocation1 + $0x1] ss:$4 sm:$0xff] %v3224_v62  ;;  %v5205_v1 = vor.u32 %v5871_v7, %v5202_v39  ;;  %v5170_v7 = vld [vmem:[%s8064_s7 + $0x38] sm:$0xf0]  ;;  %v5656_v39 = vld [vmem:[%s8064_s7 + $0x400] sm:$0xf] }
 0x42a   : > { %3254 = vst [vmem:[#allocation1] ss:$4 sm:$0xff] %v3223_v44  ;;  %v5529_v44 = vor.u32 %v5954_v54, %v5528_v43  ;;  %v5863_v54 = vld [vmem:[%s8064_s7 + $0x34] sm:$0xf] }
 0x42b   : > { %4260 = vmatpush.bf16.msra.mxu2 %v5569_v50  ;;  %4201 = vmatmul.bf16.vlgmr.msrb.gmra.mxu3 %v7449_v38  ;;  %v5682_v50 = vld [vmem:[%s8064_s7 + $0x438] sm:$0xf0]  ;;  %v5173_v3 = vor.u32 %v5863_v54, %v5170_v7  ;;  %v3237_v54 = vld [vmem:[#allocation4 + $0xe] sm:$0x3] }
 0x42c   : > { %4271 = vmatpush.bf16.msrb.mxu3 %v5649_v2  ;;  %v5685_v15 = vor.u32 %v5991_v57, %v5682_v50  ;;  %v5869_v2 = vld [vmem:[%s8064_s7 + $0x64] sm:$0xf]  ;;  %v3232_v50 = vld [vmem:[#allocation4 + $0x8] sm:$0x3] }
 0x42d   : > { %v5197_v30 = vor.u32 %v5869_v2, %v5194_v4  ;;  %v3233_v57 = vld [vmem:[#allocation4 + $0xc] sm:$0x3] }
 0x42e   : > { %4405 = vmatpush.bf16.msra.mxu0 %v5685_v15  ;;  %v5330_v15 = vld [vmem:[%s8064_s7 + $0x178] sm:$0xf0]  ;;  %v5881_v4 = vld [vmem:[%s8064_s7 + $0xc4] sm:$0xf] }
 0x42f   : > { %4261 = vmatpush.bf16.msra.mxu2 %v5561_v55  ;;  %v5989_v55 = vld [vmem:[%s8064_s7 + $0x424] sm:$0xf] }
 0x430   : > { %4272 = vmatpush.bf16.msrb.mxu3 %v5641_v16  ;;  %v5677_v16 = vor.u32 %v5989_v55, %v5674_v6  ;;  %v5242_v6 = vld [vmem:[%s8064_s7 + $0xc8] sm:$0xf0]  ;;  %v5873_v7 = vld [vmem:[%s8064_s7 + $0x84] sm:$0xf] }
 0x431   : > { %v3257_v25 = vld.sshfl [vmem:[#allocation1] sm:$0xff pattern:$0x73625140]  ;;  %v5245_v10 = vor.u32 %v5881_v4, %v5242_v6  ;;  %v5891_v4 = vld [vmem:[%s8064_s7 + $0x114] sm:$0xf] }
 0x432   : > { %v7509_v34 = vpack.c.bf16 %v3257_v25, %v3257_v25  ;;  %3261 = vst [vmem:[#allocation1] ss:$4 sm:$0xff] %v3225_v52  ;;  %4406 = vmatpush.bf16.msra.mxu0 %v5677_v16  ;;  %v5672_v52 = vld [vmem:[%s8064_s7 + $0x420] sm:$0xf]  ;;  %v5669_v25 = vor.u32 %v5987_v40, %v5666_v45  ;;  %v5859_v16 = vld [vmem:[%s8064_s7 + $0x14] sm:$0xf] }
 0x433   : > { %4262 = vmatpush.bf16.msra.mxu2 %v5553_v63  ;;  %3263 = vst [vmem:[#allocation1 + $0x1] ss:$4 sm:$0xff] %v3226_v41  ;;  %v5592_v63 = vld [vmem:[%s8064_s7 + $0x380] sm:$0xf]  ;;  %v5673_v37 = vor.u32 %v5990_v18, %v5672_v52  ;;  %v5857_v52 = vld [vmem:[%s8064_s7 + $0x4] sm:$0xf] }
 0x434   : > { %4214 = vmatmul.bf16.vlgmr.msrb.gmra.mxu1 %v7509_v34  ;;  %4273 = vmatpush.bf16.msrb.mxu3 %v5633_v23  ;;  %v3230_v23 = vld [vmem:[#allocation4 + $0xa] sm:$0x3]  ;;  %v5593_v36 = vor.u32 %v5970_v21, %v5592_v63  ;;  %v5879_v63 = vld [vmem:[%s8064_s7 + $0xb4] sm:$0xf]  ;;  %v5146_v40 = vld [vmem:[%s8064_s7 + $0x8] sm:$0xf0] }
 0x435   : > { %4284 = vmatpush.bf16.msrb.mxu1 %v5713_v26  ;;  %v3234_v21 = vld [vmem:[#allocation4 + $0x9] sm:$0x3]  ;;  %v5919_v45 = vld [vmem:[%s8064_s7 + $0x1f4] sm:$0xf]  ;;  %v5282_v6 = vld [vmem:[%s8064_s7 + $0x118] sm:$0xf0] }
 0x436   : > { %4407 = vmatpush.bf16.msra.mxu0 %v5669_v25 }
 0x437   : > { %4263 = vmatpush.bf16.msra.mxu2 %v5545_v28  ;;  %v5189_v28 = vor.u32 %v5867_v19, %v5186_v22  ;;  %v5157_v19 = vor.u32 %v5859_v16, %v5154_v35  ;;  %v5899_v22 = vld [vmem:[%s8064_s7 + $0x154] sm:$0xf]  ;;  %v5362_v35 = vld [vmem:[%s8064_s7 + $0x1b8] sm:$0xf0] }
 0x438   : > { %4274 = vmatpush.bf16.msrb.mxu3 %v5625_v29  ;;  %v5178_v29 = vld [vmem:[%s8064_s7 + $0x48] sm:$0xf0]  ;;  %v5911_v16 = vld [vmem:[%s8064_s7 + $0x1b4] sm:$0xf] }
 0x439   : > { %4285 = vmatpush.bf16.msrb.mxu1 %v5705_v53  ;;  %v5269_v53 = vor.u32 %v5887_v49, %v5266_v24  ;;  %v5181_v43 = vor.u32 %v5865_v31, %v5178_v29  ;;  %v5394_v49 = vld [vmem:[%s8064_s7 + $0x1f8] sm:$0xf0]  ;;  %v5149_v31 = vor.u32 %v5857_v52, %v5146_v40  ;;  %v5967_v52 = vld [vmem:[%s8064_s7 + $0x374] sm:$0xf]  ;;  %v5909_v40 = vld [vmem:[%s8064_s7 + $0x1a4] sm:$0xf] }
 0x43a   : > { %v3264_v56 = vld.sshfl [vmem:[#allocation1] sm:$0xff pattern:$0x73625140]  ;;  %4408 = vmatpush.bf16.msra.mxu0 %v5661_v33  ;;  %v5397_v29 = vor.u32 %v5919_v45, %v5394_v49  ;;  %v5354_v45 = vld [vmem:[%s8064_s7 + $0x1a8] sm:$0xf0] }
 0x43b   : > { %4264 = vmatpush.bf16.msra.mxu2 %v5537_v47  ;;  %v7563_v62 = vpack.c.bf16 %v3264_v56, %v3264_v56  ;;  %3268 = vst [vmem:[#allocation1] ss:$4 sm:$0xff] %v3227_v9  ;;  %v5664_v47 = vld [vmem:[%s8064_s7 + $0x410] sm:$0xf]  ;;  %v5861_v56 = vld [vmem:[%s8064_s7 + $0x24] sm:$0xf] }
 0x43c   : > { %3270 = vst [vmem:[#allocation1 + $0x1] ss:$4 sm:$0xff] %v3228_v58  ;;  %4275 = vmatpush.bf16.msrb.mxu3 %v5617_v32  ;;  %v5665_v9 = vor.u32 %v5988_v46, %v5664_v47  ;;  %v5261_v32 = vor.u32 %v5885_v42, %v5258_v5  ;;  %v5986_v58 = vld [vmem:[%s8064_s7 + $0x404] sm:$0xf0]  ;;  %v5218_v46 = vld [vmem:[%s8064_s7 + $0x98] sm:$0xf0] }
 0x43d   : > { %4227 = vmatmul.bf16.vlgmr.msrb.gmra.mxu2 %v7563_v62  ;;  %4286 = vmatpush.bf16.msrb.mxu1 %v5697_v59  ;;  %v5883_v59 = vld [vmem:[%s8064_s7 + $0xd4] sm:$0xf]  ;;  %v5657_v2 = vor.u32 %v5986_v58, %v5656_v39  ;;  %v5298_v5 = vld [vmem:[%s8064_s7 + $0x138] sm:$0xf0]  ;;  %v3236_v33 = vld [vmem:[#allocation4 + $0xa] sm:$0x3] }
 0x43e   : > { %v5253_v55 = vor.u32 %v5883_v59, %v5250_v61  ;;  %v5895_v42 = vld [vmem:[%s8064_s7 + $0x134] sm:$0xf]  ;;  %v5210_v58 = vld [vmem:[%s8064_s7 + $0x88] sm:$0xf0]  ;;  %v5893_v61 = vld [vmem:[%s8064_s7 + $0x124] sm:$0xf] }
 0x43f   : > { %4265 = vmatpush.bf16.msra.mxu2 %v5529_v44 }
 0x440   : > { %4276 = vmatpush.bf16.msrb.mxu3 %v5609_v12  ;;  %v5333_v12 = vor.u32 %v5903_v51, %v5330_v15  ;;  %v5951_v15 = vld [vmem:[%s8064_s7 + $0x2f4] sm:$0xf] }
 0x441   : > { %4287 = vmatpush.bf16.msrb.mxu1 %v5689_v8  ;;  %v5165_v8 = vor.u32 %v5861_v56, %v5162_v0  ;;  %v5522_v56 = vld [vmem:[%s8064_s7 + $0x2f8] sm:$0xf0] }
 0x443   : > { %4297 = vmatpush.bf16.msrb.mxu2 %v5205_v1  ;;  %v3271_v26 = vld.sshfl [vmem:[#allocation1] sm:$0xff pattern:$0x73625140] }
 0x444   : > { %v3305_v41 = vpack.c.bf16 %v3271_v26, %v3271_v26  ;;  %3275 = vst [vmem:[#allocation1] ss:$4 sm:$0xff] %v3229_v17  ;;  %4277 = vmatpush.bf16.msrb.mxu3 %v5601_v60  ;;  %v5234_v60 = vld [vmem:[%s8064_s7 + $0xb8] sm:$0xf0]  ;;  %v5877_v26 = vld [vmem:[%s8064_s7 + $0xa4] sm:$0xf] }
 0x445   : > { %3277 = vst [vmem:[#allocation1 + $0x1] ss:$4 sm:$0xff] %v3230_v23  ;;  %4288 = vmatpush.bf16.msrb.mxu1 %v5681_v20  ;;  %v5314_v17 = vld [vmem:[%s8064_s7 + $0x158] sm:$0xf0]  ;;  %v3235_v20 = vld [vmem:[#allocation4 + $0xd] sm:$0x3]  ;;  %v5237_v18 = vor.u32 %v5879_v63, %v5234_v60 }
 0x446   : > { %4240 = vmatmul.bf16.vlgmr.msra.gmra.mxu3 %v3305_v41  ;;  %4357 = vmatmul.bf16.vlgmr.msrb.gmra.mxu0 %v3305_v41  ;;  %v5317_v25 = vor.u32 %v5899_v22, %v5314_v17  ;;  %v5897_v41 = vld [vmem:[%s8064_s7 + $0x144] sm:$0xf]  ;;  %v5947_v22 = vld [vmem:[%s8064_s7 + $0x2d4] sm:$0xf]  ;;  %v5506_v17 = vld [vmem:[%s8064_s7 + $0x2d8] sm:$0xf0] }
 0x447   : > { %4298 = vmatpush.bf16.msrb.mxu2 %v5197_v30  ;;  %v5325_v30 = vor.u32 %v5901_v11, %v5322_v14  ;;  %v5514_v11 = vld [vmem:[%s8064_s7 + $0x2e8] sm:$0xf0]  ;;  %v5889_v60 = vld [vmem:[%s8064_s7 + $0x104] sm:$0xf] }
 0x448   : > { %4278 = vmatpush.bf16.msrb.mxu3 %v5593_v36  ;;  %v5306_v36 = vld [vmem:[%s8064_s7 + $0x148] sm:$0xf0] }
 0x449   : > { %4289 = vmatpush.bf16.msrb.mxu1 %v5673_v37  ;;  %v5917_v37 = vld [vmem:[%s8064_s7 + $0x1e4] sm:$0xf]  ;;  %v5309_v47 = vor.u32 %v5897_v41, %v5306_v36  ;;  %v5578_v41 = vld [vmem:[%s8064_s7 + $0x368] sm:$0xf0]  ;;  %v5907_v36 = vld [vmem:[%s8064_s7 + $0x194] sm:$0xf] }
 0x44b   : > { %4299 = vmatpush.bf16.msrb.mxu2 %v5189_v28  ;;  %v5226_v28 = vld [vmem:[%s8064_s7 + $0xa8] sm:$0xf0] }
 0x44c   : > { %4310 = vmatpush.bf16.msra.mxu3 %v5269_v53  ;;  %v3278_v44 = vld.sshfl [vmem:[#allocation1] sm:$0xff pattern:$0x73625140]  ;;  %v5229_v48 = vor.u32 %v5877_v26, %v5226_v28  ;;  %v5386_v53 = vld [vmem:[%s8064_s7 + $0x1e8] sm:$0xf0]  ;;  %v5357_v28 = vor.u32 %v5909_v40, %v5354_v45 }
 0x44d   : > { %v7674_v1 = vpack.c.bf16 %v3278_v44, %v3278_v44  ;;  %3282 = vst [vmem:[#allocation1] ss:$4 sm:$0xff] %v3232_v50  ;;  %4290 = vmatpush.bf16.msrb.mxu1 %v5665_v9  ;;  %v5915_v9 = vld [vmem:[%s8064_s7 + $0x1d4] sm:$0xf]  ;;  %v5301_v50 = vor.u32 %v5895_v42, %v5298_v5  ;;  %v5213_v44 = vor.u32 %v5873_v7, %v5210_v58  ;;  %v5498_v26 = vld [vmem:[%s8064_s7 + $0x2c8] sm:$0xf0] }
 0x44e   : > { %3284 = vst [vmem:[#allocation1 + $0x1] ss:$4 sm:$0xff] %v3233_v57  ;;  %v5221_v57 = vor.u32 %v5875_v13, %v5218_v46  ;;  %v5963_v46 = vld [vmem:[%s8064_s7 + $0x354] sm:$0xf]  ;;  %v5570_v42 = vld [vmem:[%s8064_s7 + $0x358] sm:$0xf0] }
 0x44f   : > { %4300 = vmatpush.bf16.msrb.mxu2 %v5181_v43  ;;  %4253 = vmatmul.bf16.vlgmr.msra.gmra.mxu1 %v7674_v1  ;;  %v5389_v43 = vor.u32 %v5917_v37, %v5386_v53  ;;  %v5943_v53 = vld [vmem:[%s8064_s7 + $0x2b4] sm:$0xf]  ;;  %v5905_v5 = vld [vmem:[%s8064_s7 + $0x184] sm:$0xf]  ;;  %v5573_v7 = vor.u32 %v5963_v46, %v5570_v42 }
 0x450   : > { %4311 = vmatpush.bf16.msra.mxu3 %v5261_v32  ;;  %v5378_v32 = vld [vmem:[%s8064_s7 + $0x1d8] sm:$0xf0]  ;;  %v5973_v45 = vld [vmem:[%s8064_s7 + $0x3a4] sm:$0xf] }
 0x451   : > { %4291 = vmatpush.bf16.msrb.mxu1 %v5657_v2  ;;  %v5381_v51 = vor.u32 %v5915_v9, %v5378_v32  ;;  %v5913_v2 = vld [vmem:[%s8064_s7 + $0x1c4] sm:$0xf]  ;;  %v5482_v32 = vld [vmem:[%s8064_s7 + $0x2a8] sm:$0xf0] }
 0x452   : > { %v5941_v9 = vld [vmem:[%s8064_s7 + $0x2a4] sm:$0xf] }
 0x453   : > { %4301 = vmatpush.bf16.msrb.mxu2 %v5173_v3  ;;  %v5290_v3 = vld [vmem:[%s8064_s7 + $0x128] sm:$0xf0] }
 0x454   : > { %4312 = vmatpush.bf16.msra.mxu3 %v5253_v55  ;;  %v5293_v0 = vor.u32 %v5893_v61, %v5290_v3  ;;  %v5370_v55 = vld [vmem:[%s8064_s7 + $0x1c8] sm:$0xf0]  ;;  %v5485_v61 = vor.u32 %v5941_v9, %v5482_v32  ;;  %v5981_v3 = vld [vmem:[%s8064_s7 + $0x3e4] sm:$0xf]  ;;  %v6004_v9 = vld [vmem:[%s8066_s9 + $0x18] sm:$0xff] }
 0x455   : > { %4323 = vmatpush.bf16.msra.mxu1 %v5333_v12  ;;  %v3285_v23 = vld.sshfl [vmem:[#allocation1] sm:$0xff pattern:$0x73625140]  ;;  %v5525_v12 = vor.u32 %v5951_v15, %v5522_v56  ;;  %v5373_v14 = vor.u32 %v5913_v2, %v5370_v55  ;;  %v5939_v56 = vld [vmem:[%s8064_s7 + $0x294] sm:$0xf] }
 0x456   : > { %v7719_v24 = vpack.c.bf16 %v3285_v23, %v3285_v23  ;;  %3289 = vst [vmem:[#allocation1] ss:$4 sm:$0xff] %v3234_v21  ;;  %v5554_v2 = vld [vmem:[%s8064_s7 + $0x338] sm:$0xf0] }
 0x457   : > { %4302 = vmatpush.bf16.msrb.mxu2 %v5165_v8  ;;  %3291 = vst [vmem:[#allocation1 + $0x1] ss:$4 sm:$0xff] %v3235_v20  ;;  %v5949_v8 = vld [vmem:[%s8064_s7 + $0x2e4] sm:$0xf]  ;;  %v5365_v20 = vor.u32 %v5911_v16, %v5362_v35  ;;  %v5546_v16 = vld [vmem:[%s8064_s7 + $0x328] sm:$0xf0] }
 0x458   : > { %4313 = vmatpush.bf16.msra.mxu3 %v5245_v10  ;;  %4266 = vmatmul.bf16.vlgmr.msra.gmra.mxu2 %v7719_v24  ;;  %v5517_v63 = vor.u32 %v5949_v8, %v5514_v11  ;;  %v5466_v11 = vld [vmem:[%s8064_s7 + $0x288] sm:$0xf0] }
 0x459   : > { %4324 = vmatpush.bf16.msra.mxu1 %v5325_v30  ;;  %v5285_v30 = vor.u32 %v5891_v4, %v5282_v6  ;;  %v5979_v4 = vld [vmem:[%s8064_s7 + $0x3d4] sm:$0xf]  ;;  %v5634_v6 = vld [vmem:[%s8064_s7 + $0x3d8] sm:$0xf0] }
 0x45a   : > { %v5637_v35 = vor.u32 %v5979_v4, %v5634_v6 }
 0x45b   : > { %4303 = vmatpush.bf16.msrb.mxu2 %v5157_v19  ;;  %v5274_v19 = vld [vmem:[%s8064_s7 + $0x108] sm:$0xf0] }
 0x45c   : > { %4314 = vmatpush.bf16.msra.mxu3 %v5237_v18  ;;  %v5277_v23 = vor.u32 %v5889_v60, %v5274_v19  ;;  %v5509_v18 = vor.u32 %v5947_v22, %v5506_v17  ;;  %v5955_v60 = vld [vmem:[%s8064_s7 + $0x314] sm:$0xf]  ;;  %v5618_v17 = vld [vmem:[%s8064_s7 + $0x3b8] sm:$0xf0] }
 0x45d   : > { %4325 = vmatpush.bf16.msra.mxu1 %v5317_v25  ;;  %v5945_v25 = vld [vmem:[%s8064_s7 + $0x2c4] sm:$0xf]  ;;  %v5975_v22 = vld [vmem:[%s8064_s7 + $0x3b4] sm:$0xf] }
 0x45e   : > { %v3292_v39 = vld.sshfl [vmem:[#allocation1] sm:$0xff pattern:$0x73625140]  ;;  %v5621_v40 = vor.u32 %v5975_v22, %v5618_v17 }
 0x45f   : > { %4304 = vmatpush.bf16.msrb.mxu2 %v5149_v31  ;;  %v7764_v59 = vpack.c.bf16 %v3292_v39, %v3292_v39  ;;  %3296 = vst [vmem:[#allocation1] ss:$4 sm:$0xff] %v3236_v33  ;;  %v5965_v31 = vld [vmem:[%s8064_s7 + $0x364] sm:$0xf]  ;;  %v5338_v33 = vld [vmem:[%s8064_s7 + $0x188] sm:$0xf0] }
 0x460   : > { %4315 = vmatpush.bf16.msra.mxu3 %v5229_v48  ;;  %3298 = vst [vmem:[#allocation1 + $0x1] ss:$4 sm:$0xff] %v3237_v54  ;;  %v5501_v48 = vor.u32 %v5945_v25, %v5498_v26  ;;  %v5581_v37 = vor.u32 %v5965_v31, %v5578_v41  ;;  %v5650_v54 = vld [vmem:[%s8064_s7 + $0x3f8] sm:$0xf0]  ;;  %v5341_v39 = vor.u32 %v5905_v5, %v5338_v33  ;;  %v5971_v25 = vld [vmem:[%s8064_s7 + $0x394] sm:$0xf] }
 0x461   : > { %4326 = vmatpush.bf16.msra.mxu1 %v5309_v47  ;;  %4279 = vmatmul.bf16.vlgmr.msrb.gmra.mxu3 %v7764_v59  ;;  %v5490_v47 = vld [vmem:[%s8064_s7 + $0x2b8] sm:$0xf0]  ;;  %v5594_v31 = vld [vmem:[%s8064_s7 + $0x388] sm:$0xf0]  ;;  %v6005_v33 = vld [vmem:[%s8066_s9 + $0x20] sm:$0xff] }
 0x463   : > { %4336 = vmatpush.bf16.msra.mxu2 %v5397_v29  ;;  %v5346_v29 = vld [vmem:[%s8064_s7 + $0x198] sm:$0xf0] }
 0x464   : > { %4316 = vmatpush.bf16.msra.mxu3 %v5221_v57  ;;  %v5349_v13 = vor.u32 %v5907_v36, %v5346_v29  ;;  %v5961_v57 = vld [vmem:[%s8064_s7 + $0x344] sm:$0xf] }
 0x465   : > { %4327 = vmatpush.bf16.msra.mxu1 %v5301_v50  ;;  %v5562_v50 = vld [vmem:[%s8064_s7 + $0x348] sm:$0xf0] }
 0x466   : > { %v5565_v15 = vor.u32 %v5961_v57, %v5562_v50 }
 0x467   : > { %4337 = vmatpush.bf16.msra.mxu2 %v5389_v43  ;;  %v3299_v10 = vld.sshfl [vmem:[#allocation1] sm:$0xff pattern:$0x73625140]  ;;  %v5983_v43 = vld [vmem:[%s8064_s7 + $0x3f4] sm:$0xf] }
 0x468   : > { %4317 = vmatpush.bf16.msra.mxu3 %v5213_v44  ;;  %v3309_v21 = vpack.c.bf16 %v3299_v10, %v3299_v10  ;;  %4305 = vmatmul.bf16.vlgmr.msrb.gmra.mxu2 %v7407_v27  ;;  %v5586_v27 = vld [vmem:[%s8064_s7 + $0x378] sm:$0xf0]  ;;  %v5653_v58 = vor.u32 %v5983_v43, %v5650_v54  ;;  %v5977_v10 = vld [vmem:[%s8064_s7 + $0x3c4] sm:$0xf]  ;;  %v3454_v54 = vld [vmem:[%s8065_s8] sm:$0x3] }
 0x469   : > { %4328 = vmatpush.bf16.msra.mxu1 %v5293_v0  ;;  %v5589_v49 = vor.u32 %v5967_v52, %v5586_v27  ;;  %v5474_v44 = vld [vmem:[%s8064_s7 + $0x298] sm:$0xf0]  ;;  %v5959_v0 = vld [vmem:[%s8064_s7 + $0x334] sm:$0xf]  ;;  %v5953_v52 = vld [vmem:[%s8064_s7 + $0x304] sm:$0xf] }
 0x46a   : > { %4292 = vmatmul.bf16.vlgmr.msrb.gmra.mxu1 %v3309_v21  ;;  %4409 = vmatmul.bf16.vlgmr.msra.gmra.mxu0 %v3309_v21  ;;  %v5557_v8 = vor.u32 %v5959_v0, %v5554_v2  ;;  %v5538_v21 = vld [vmem:[%s8064_s7 + $0x318] sm:$0xf0]  ;;  %v5530_v27 = vld [vmem:[%s8064_s7 + $0x308] sm:$0xf0]  ;;  %v3456_v32 = vperm.slane %v3454_v54, 0 }
 0x46b   : > { %4338 = vmatpush.bf16.msra.mxu2 %v5381_v51  ;;  %v5642_v51 = vld [vmem:[%s8064_s7 + $0x3e8] sm:$0xf0] }
 0x46c   : > { %4362 = vmatpush.bf16.msrb.mxu3 %v5525_v12  ;;  %v5645_v55 = vor.u32 %v5981_v3, %v5642_v51  ;;  %v5477_v12 = vor.u32 %v5939_v56, %v5474_v44  ;;  %v6001_v51 = vld [vmem:[%s8066_s9] sm:$0xff] }
 0x46d   : > { %4329 = vmatpush.bf16.msra.mxu1 %v5285_v30  ;;  %v5626_v30 = vld [vmem:[%s8064_s7 + $0x3c8] sm:$0xf0] }
 0x46e   : > { %v5629_v19 = vor.u32 %v5977_v10, %v5626_v30 }
 0x46f   : > { %4339 = vmatpush.bf16.msra.mxu2 %v5373_v14  ;;  %v5957_v14 = vld [vmem:[%s8064_s7 + $0x324] sm:$0xf] }
 0x470   : > { %4363 = vmatpush.bf16.msrb.mxu3 %v5517_v63  ;;  %v5549_v63 = vor.u32 %v5957_v14, %v5546_v16 }
 0x471   : > { %4330 = vmatpush.bf16.msra.mxu1 %v5277_v23  ;;  %4318 = vmatmul.bf16.vlgmr.msra.gmra.mxu3 %v7449_v38  ;;  %v5493_v38 = vor.u32 %v5943_v53, %v5490_v47  ;;  %v5610_v23 = vld [vmem:[%s8064_s7 + $0x3a8] sm:$0xf0] }
 0x473   : > { %4340 = vmatpush.bf16.msra.mxu2 %v5365_v20  ;;  %v5541_v20 = vor.u32 %v5955_v60, %v5538_v21 }
 0x474   : > { %4364 = vmatpush.bf16.msrb.mxu3 %v5509_v18  ;;  %v5533_v18 = vor.u32 %v5953_v52, %v5530_v27  ;;  %v6015_v27 = vld [vmem:[%s8066_s9 + $0x70] sm:$0xff] }
 0x475   : > { %4375 = vmatpush.bf16.msrb.mxu1 %v5589_v49  ;;  %v5613_v49 = vor.u32 %v5973_v45, %v5610_v23 }
 0x477   : > { %4341 = vmatpush.bf16.msra.mxu2 %v5357_v28  ;;  %v5969_v28 = vld [vmem:[%s8064_s7 + $0x384] sm:$0xf] }
 0x478   : > { %4365 = vmatpush.bf16.msrb.mxu3 %v5501_v48  ;;  %v5597_v41 = vor.u32 %v5969_v28, %v5594_v31  ;;  %v3457_v28 = vperm.slane %v3454_v54, 1  ;;  %v6013_v31 = vld [vmem:[%s8066_s9 + $0x60] sm:$0xff] }
 0x479   : > { %4376 = vmatpush.bf16.msrb.mxu1 %v5581_v37 }
 0x47a   : > { %4331 = vmatmul.bf16.vlgmr.msra.gmra.mxu1 %v7509_v34  ;;  %v5937_v34 = vld [vmem:[%s8064_s7 + $0x284] sm:$0xf] }
 0x47b   : > { %4342 = vmatpush.bf16.msra.mxu2 %v5349_v13  ;;  %v6007_v13 = vld [vmem:[%s8066_s9 + $0x30] sm:$0xff] }
 0x47c   : > { %4366 = vmatpush.bf16.msrb.mxu3 %v5493_v38 }
 0x47d   : > { %4377 = vmatpush.bf16.msrb.mxu1 %v5573_v7 }
 0x47f   : > { %4343 = vmatpush.bf16.msra.mxu2 %v5341_v39  ;;  %v6003_v39 = vld [vmem:[%s8066_s9 + $0x10] sm:$0xff] }
 0x480   : > { %4367 = vmatpush.bf16.msrb.mxu3 %v5485_v61  ;;  %v6002_v61 = vld [vmem:[%s8066_s9 + $0x8] sm:$0xff] }
 0x481   : > { %4378 = vmatpush.bf16.msrb.mxu1 %v5565_v15 }
 0x482   : > { %4344 = vmatmul.bf16.vlgmr.msra.gmra.mxu2 %v7563_v62  ;;  %v5469_v62 = vor.u32 %v5937_v34, %v5466_v11 }
 0x483   : > { %4388 = vmatpush.bf16.msrb.mxu2 %v5653_v58 }
 0x484   : > { %4368 = vmatpush.bf16.msrb.mxu3 %v5477_v12 }
 0x485   : > { %4379 = vmatpush.bf16.msrb.mxu1 %v5557_v8 }
 0x487   : > { %4389 = vmatpush.bf16.msrb.mxu2 %v5645_v55 }
 0x488   : > { %4369 = vmatpush.bf16.msrb.mxu3 %v5469_v62 }
 0x489   : > { %4380 = vmatpush.bf16.msrb.mxu1 %v5549_v63 }
 0x48b   : > { %4390 = vmatpush.bf16.msrb.mxu2 %v5637_v35  ;;  %4370 = vmatmul.bf16.vlgmr.msrb.gmra.mxu3 %v7674_v1  ;;  %v5602_v1 = vld [vmem:[%s8064_s7 + $0x398] sm:$0xf0] }
 0x48c   : > { %v5605_v26 = vor.u32 %v5971_v25, %v5602_v1 }
 0x48d   : > { %4381 = vmatpush.bf16.msrb.mxu1 %v5541_v20  ;;  %v6016_v20 = vld [vmem:[%s8066_s9 + $0x78] sm:$0xff] }
 0x48f   : > { %4391 = vmatpush.bf16.msrb.mxu2 %v5629_v19 }
 0x491   : > { %4382 = vmatpush.bf16.msrb.mxu1 %v5533_v18 }
 0x493   : > { %4392 = vmatpush.bf16.msrb.mxu2 %v5621_v40 }
 0x494   : > { %4383 = vmatmul.bf16.vlgmr.msrb.gmra.mxu1 %v7719_v24  ;;  %v6008_v24 = vld [vmem:[%s8066_s9 + $0x38] sm:$0xff] }
 0x495   : > { %4564 = vmatpush.bf16.msra.mxu3 %v6008_v24  ;;  %4577 = vmatpush.bf16.msra.mxu1 %v6016_v20 }
 0x497   : > { %4393 = vmatpush.bf16.msrb.mxu2 %v5613_v49 }
 0x499   : > { %4565 = vmatpush.bf16.msra.mxu3 %v6007_v13  ;;  %4578 = vmatpush.bf16.msra.mxu1 %v6015_v27  ;;  %v6010_v13 = vld [vmem:[%s8066_s9 + $0x48] sm:$0xff] }
 0x49b   : > { %4394 = vmatpush.bf16.msrb.mxu2 %v5605_v26  ;;  %v6014_v26 = vld [vmem:[%s8066_s9 + $0x68] sm:$0xff] }
 0x49d   : > { %4579 = vmatpush.bf16.msra.mxu1 %v6014_v26 }
 0x49f   : > { %4395 = vmatpush.bf16.msrb.mxu2 %v5597_v41 }
 0x4a1   : > { %4580 = vmatpush.bf16.msra.mxu1 %v6013_v31 }
 0x4a2   : > { %4396 = vmatmul.bf16.vlgmr.msrb.gmra.mxu2 %v7764_v59  ;;  %v6006_v59 = vld [vmem:[%s8066_s9 + $0x28] sm:$0xff] }
 0x4a3   : > { %4566 = vmatpush.bf16.msra.mxu3 %v6006_v59 }
 0x4a5   : > { %v4189_v36 = vpop.f32.mrf.mxu2 }
 0x4a6   : > { %v4190_v50 = vadd.f32 %v4189_v36, %v3456_v32 }
 0x4a7   : > { %4567 = vmatpush.bf16.msra.mxu3 %v6005_v33  ;;  %v6009_v33 = vld [vmem:[%s8066_s9 + $0x40] sm:$0xff] }
 0x4ab   : > { %4568 = vmatpush.bf16.msra.mxu3 %v6004_v9 }
 0x4ad   : > { %v4191_v29 = vpop.f32.mrf.mxu2 }
 0x4ae   : > { %v4202_v48 = vpop.f32.mrf.mxu3 }
 0x4af   : > { %4569 = vmatpush.bf16.msra.mxu3 %v6003_v39  ;;  %v4203_v3 = vadd.f32 %v4202_v48, %v4190_v50  ;;  %v6012_v48 = vld [vmem:[%s8066_s9 + $0x58] sm:$0xff] }
 0x4b0   : > { %4581 = vmatpush.bf16.msra.mxu1 %v6012_v48 }
 0x4b1   : > { %v4215_v37 = vpop.f32.mrf.mxu1 }
 0x4b2   : > { %v4216_v15 = vadd.f32 %v4215_v37, %v4203_v3 }
 0x4b3   : > { %4570 = vmatpush.bf16.msra.mxu3 %v6002_v61 }
 0x4b6   : > { %v4204_v53 = vpop.f32.mrf.mxu3 }
 0x4b7   : > { %4571 = vmatpush.bf16.msra.mxu3 %v6001_v51 }
 0x4b9   : > { %v4217_v47 = vpop.f32.mrf.mxu1 }
 0x4ba   : > { %v6011_v47 = vld [vmem:[%s8066_s9 + $0x50] sm:$0xff] }
 0x4bb   : > { %4582 = vmatpush.bf16.msra.mxu1 %v6011_v47 }
 0x4bf   : > { %4583 = vmatpush.bf16.msra.mxu1 %v6010_v13 }
 0x4c0   : > { %v4228_v46 = vpop.f32.mrf.mxu2 }
 0x4c1   : > { %v4229_v56 = vadd.f32 %v4228_v46, %v4216_v15 }
 0x4c3   : > { %v7972_v42 = vpop.f32.mrf.mxu0  ;;  %4584 = vmatpush.bf16.msra.mxu1 %v6009_v33 }
 0x4c8   : > { %v4230_v5 = vpop.f32.mrf.mxu2 }
 0x4c9   : > { %v4241_v38 = vpop.f32.mrf.mxu3 }
 0x4ca   : > { %v4242_v0 = vadd.f32 %v4241_v38, %v4229_v56 }
 0x4cb   : > { %v4360_v43 = vpop.f32.mrf.mxu0 }
 0x4cc   : > { %v4254_v7 = vpop.f32.mrf.mxu1 }
 0x4cd   : > { %v4255_v2 = vadd.f32 %v4254_v7, %v4242_v0 }
 0x4d1   : > { %v4243_v57 = vpop.f32.mrf.mxu3 }
 0x4d4   : > { %v4256_v58 = vpop.f32.mrf.mxu1 }
 0x4db   : > { %v4267_v44 = vpop.f32.mrf.mxu2 }
 0x4dc   : > { %v4268_v55 = vadd.f32 %v4267_v44, %v4255_v2 }
 0x4e3   : > { %v4269_v12 = vpop.f32.mrf.mxu2 }
 0x4e4   : > { %v4280_v4 = vpop.f32.mrf.mxu3 }
 0x4e5   : > { %v4281_v6 = vadd.f32 %v4280_v4, %v4268_v55  ;;  %v4467_v55 = vld [vmem:[%s8067_s10] sm:$0x1] }
 0x4e7   : > { %v4293_v8 = vpop.f32.mrf.mxu1  ;;  %v4410_v34 = vpop.f32.mrf.mxu0 }
 0x4e8   : > { %v4294_v11 = vadd.f32 %v4293_v8, %v4281_v6 }
 0x4ea   : > { %v4414_v14 = vmax.f32 %v4294_v11, 0.0 }
 0x4eb   : > { %v4306_v16 = vpop.f32.mrf.mxu2 }
 0x4ec   : > { %v4417_v35 = vsel %vm4416_vm15, %v4414_v14, 0.0  ;;  %v4282_v62 = vpop.f32.mrf.mxu3  ;;  %v4307_v36 = vadd.f32 %v4306_v16, %v3457_v28 }
 0x4ed   : > { %v4418_v10 = vrot.slane %v4417_v35, 4 }
 0x4ef   : > { %v4419_v30 = vadd.f32 %v4418_v10, %v4417_v35  ;;  %v4295_v63 = vpop.f32.mrf.mxu1  ;;  %v4412_v60 = vpop.f32.mrf.mxu0 }
 0x4f1   : > { %v4420_v21 = vrot.slane %v4419_v30, 2 }
 0x4f3   : > { %v4421_v19 = vadd.f32 %v4420_v21, %v4419_v30  ;;  %v4308_v22 = vpop.f32.mrf.mxu2 }
 0x4f4   : > { %v4319_v17 = vpop.f32.mrf.mxu3 }
 0x4f5   : > { %v4422_v52 = vrot.slane %v4421_v19, 1  ;;  %v4320_v37 = vadd.f32 %v4319_v17, %v4307_v36 }
 0x4f7   : > { %v4423_v40 = vadd.f32 %v4422_v52, %v4421_v19  ;;  %v4332_v45 = vpop.f32.mrf.mxu1 }
 0x4f8   : > { %v4333_v24 = vadd.f32 %v4332_v45, %v4320_v37 }
 0x4f9   : > { %v4431_v23 = vmul.f32 0.25, %v4423_v40 }
 0x4fb   : > { %v4433_v18 = vpack.c.bf16 %v4431_v23, %v4431_v23 }
 0x4fc   : > { %v4321_v49 = vpop.f32.mrf.mxu3 }
 0x4fd   : > { %4572 = vmatmul.bf16.vlgmr.msra.gmra.mxu3 %v4433_v18 }
 0x4ff   : > { %v4334_v25 = vpop.f32.mrf.mxu1 }
 0x505   : > { %v4345_v1 = vpop.f32.mrf.mxu2 }
 0x506   : > { %v4346_v46 = vadd.f32 %v4345_v1, %v4333_v24 }
 0x508   : > { %v4359_v38 = vadd.f32 %v7972_v42, %v4346_v46 }
 0x50d   : > { %v4347_v41 = vpop.f32.mrf.mxu2 }
 0x50e   : > { %v4371_v29 = vpop.f32.mrf.mxu3 }
 0x50f   : > { %v4372_v43 = vadd.f32 %v4371_v29, %v4359_v38 }
 0x511   : > { %v4384_v53 = vpop.f32.mrf.mxu1 }
 0x512   : > { %v4385_v54 = vadd.f32 %v4384_v53, %v4372_v43 }
 0x516   : > { %v4373_v59 = vpop.f32.mrf.mxu3 }
 0x519   : > { %v4386_v5 = vpop.f32.mrf.mxu1 }
 0x525   : > { %v4397_v7 = vpop.f32.mrf.mxu2 }
 0x526   : > { %v4398_v9 = vadd.f32 %v4397_v7, %v4385_v54 }
 0x528   : > { %v4411_v32 = vadd.f32 %v4410_v34, %v4398_v9 }
 0x52a   : > { %v4415_v39 = vmax.f32 %v4411_v32, 0.0 }
 0x52c   : > { %v4424_v57 = vsel %vm4416_vm15, %v4415_v39, 0.0 }
 0x52d   : > { %v4425_v50 = vrot.slane %v4424_v57, 4  ;;  %v4399_v58 = vpop.f32.mrf.mxu2 }
 0x52f   : > { %v4426_v61 = vadd.f32 %v4425_v50, %v4424_v57 }
 0x531   : > { %v4427_v3 = vrot.slane %v4426_v61, 2 }
 0x533   : > { %v4428_v51 = vadd.f32 %v4427_v3, %v4426_v61 }
 0x535   : > { %v4429_v15 = vrot.slane %v4428_v51, 1 }
 0x537   : > { %v4430_v56 = vadd.f32 %v4429_v15, %v4428_v51 }
 0x539   : > { %v4432_v44 = vmul.f32 0.25, %v4430_v56 }
 0x53b   : > { %v4434_v42 = vpack.c.bf16 %v4432_v44, %v4432_v44 }
 0x53d   : > { %4585 = vmatmul.bf16.vlgmr.msra.gmra.mxu1 %v4434_v42 }
 0x580   : > { %v4573_v0 = vpop.f32.mrf.mxu3 }
 0x581   : > { %v4574_v12 = vadd.f32 %v4573_v0, %v4467_v55 }
 0x588   : > { %v4575_v2 = vpop.f32.mrf.mxu3 }
 0x5ba   : > { %v4586_v4 = vpop.f32.mrf.mxu1 }
 0x5bb   : > { %v4587_v6 = vadd.f32 %v4586_v4, %v4574_v12 }
 0x5bd   : > { %4590 = vst [vmem:[%s378_s12] sm:$0x1] %v4587_v6 }
 0x5be   : > { %6231 = shalt.err (!%p6228_p3)
}
 0x5bf   : > { %6017 = dma.vmem_to_hbm [thread:$0]  (%p6370_p5), %s4603_s13, 16, %s4605_s14, %s4592_s16  }
 0x5c2   : > { %v4588_v8 = vpop.f32.mrf.mxu1 }
 0x5c3 PF: > { %p6023_p4 = scmp.ge.s32.totalorder %s6266_s20, 2  ;;  %s4616_s15 = sand.u32 1, %s6254_s17  }
 0x5c4   : > { %s4617_s29 = scalar_lea.sflag [#allocation6], %s4616_s15 }
 0x5c5   : > { %p6020_p7 = pnand %p6023_p4, %p6374_p6 }
 0x5c7   : > { %p6021_p8 = pneg %p6020_p7 }
 0x5c9   : > { %6249 = dma.done.wait (%p6021_p8), %s4617_s29, 16  }
 0x5ca   : > { %6251 = vsyncadd (%p6021_p8), %s4617_s29, 4294967280  ;;  %p21_p9 = scmp.ge.s32.totalorder %s6357_s23, 4   ;;  %s8075_s17 = smov %s6258_s18 }
 0x5cb   : > { %s8076_s18 = smov %s6262_s19  ;;  %s8077_s19 = smov %s6368_s26 }
 0x5cc   : > { %s8078_s20 = smov %s6357_s23  ;;  %23 = sbr.rel (!%p21_p9) target bundleno = 6 (0x6), region = 144 }
 0x5d1   :  { %4622 = vsyncpa [#allocation6], 1 }
 0x5d2   :  { %4624 = vsyncpa [#allocation6 + $0x1], 1 }

</bundles_post_ra>
